<compile_context>
chip_gen: v6e
topology: v6e:2x2x1
jax: 0.10.0
libtpu: 0.0.40
codegen_flags: <defaults>
</compile_context>

<pallas_src>
import jax
import jax.numpy as jnp
from jax.experimental import pallas as pl
from jax.experimental.pallas import tpu as pltpu


def _round_up(a, b):
    return (a + b - 1) // b * b


# ----------------------------------------------------------------------------
# Pallas kernel
# ----------------------------------------------------------------------------
def mutual_gaze_kernel(x_ref,    # (TM, TK)   f32  flattened-image tile
                       wb_ref,   # (TK, 512)  bf16 backbone-projection tile
                       bb_ref,   # (1, 512)   f32
                       w1_ref,   # (512, 256) bf16
                       b1_ref,   # (1, 256)   f32
                       w2_ref,   # (256, 64)  bf16
                       b2_ref,   # (1, 64)    f32
                       w3_ref,   # (1, 64)    f32 (row form of the (64,1) weight)
                       b3_ref,   # (1, 1)     f32 in SMEM
                       o_ref,    # (TM, 128)  f32 (lane-padded sigmoid output)
                       acc_ref): # (TM, 512)  f32 accumulator scratch
    k = pl.program_id(1)

    @pl.when(k == 0)
    def _():
        acc_ref[...] = jnp.zeros_like(acc_ref)

    # Backbone stand-in projection: cast the x tile to bf16 on the VPU (slack
    # in this MXU/DMA-bound loop) and accumulate this K tile in f32.
    acc_ref[...] += jnp.dot(x_ref[...].astype(jnp.bfloat16), wb_ref[...],
                            preferred_element_type=jnp.float32)

    @pl.when(k == pl.num_programs(1) - 1)
    def _():
        # L2-normalized 512-d embedding (facenet embedding contract).
        feat = acc_ref[...] + bb_ref[...]
        norm_sq = jnp.sum(feat * feat, axis=-1, keepdims=True)
        feat = feat * jax.lax.rsqrt(norm_sq + 1e-12)

        # BinaryClassifier(512): Linear->ReLU->Linear->ReLU->Linear->Sigmoid.
        h1 = jnp.dot(feat.astype(jnp.bfloat16), w1_ref[...],
                     preferred_element_type=jnp.float32) + b1_ref[...]
        h1 = jnp.maximum(h1, 0.0)
        h2 = jnp.dot(h1.astype(jnp.bfloat16), w2_ref[...],
                     preferred_element_type=jnp.float32) + b2_ref[...]
        h2 = jnp.maximum(h2, 0.0)

        # Final N=1 layer as a VPU lane reduction (keeps the MXU free and
        # avoids a 1-lane result path). b3 is a scalar read from SMEM.
        logit = jnp.sum(h2 * w3_ref[...], axis=-1, keepdims=True) + b3_ref[0, 0]
        prob = jax.nn.sigmoid(logit)
        o_ref[...] = jnp.broadcast_to(prob, o_ref.shape)


# ----------------------------------------------------------------------------
# One-time weight preparation (pre-cast / pre-pad the static params)
# ----------------------------------------------------------------------------
def prepare_params(params, *, tile_k=4096):
    """Cast + pad the static weights once, at weight-load time."""
    K = params["wb"].shape[0]
    TK = min(tile_k, _round_up(K, 128))
    Kp = _round_up(K, TK)
    return {
        "K": K,
        "TK": TK,
        "wb": jnp.pad(params["wb"].astype(jnp.bfloat16), ((0, Kp - K), (0, 0))),
        "bb": params["bb"].reshape(1, 512).astype(jnp.float32),
        "w1": params["w1"].astype(jnp.bfloat16),
        "b1": params["b1"].reshape(1, 256).astype(jnp.float32),
        "w2": params["w2"].astype(jnp.bfloat16),
        "b2": params["b2"].reshape(1, 64).astype(jnp.float32),
        "w3": params["w3"].reshape(1, 64).astype(jnp.float32),
        "b3": params["b3"].reshape(1, 1).astype(jnp.float32),
    }


# ----------------------------------------------------------------------------
# Wrapper
# ----------------------------------------------------------------------------
def mutual_gaze_detector(x_nchw, prepared, *, tile_m=512):
    """x_nchw: (B, C, H, W) float32.  Returns (B, 1) sigmoid probabilities."""
    B = x_nchw.shape[0]
    x_flat = x_nchw.reshape(B, -1).astype(jnp.float32)
    K = prepared["K"]
    TK = prepared["TK"]
    assert x_flat.shape[1] == K, (x_flat.shape, K)
    Kp = prepared["wb"].shape[0]

    TM = min(tile_m, _round_up(B, 8))
    Bp = _round_up(B, TM)

    # x stays f32 (padding rows/cols are zero so they add nothing to the
    # accumulation); the bf16 cast happens in-kernel on the tile.
    x_p = jnp.pad(x_flat, ((0, Bp - B), (0, Kp - K)))

    grid = (Bp // TM, Kp // TK)
    n_i = grid[0]

    mlp_param_bytes = (512 * 256 + 256 * 64) * 2 + (512 + 256 + 64 + 64 + 1) * 4
    cost = pl.CostEstimate(
        flops=2 * Bp * Kp * 512 + 2 * Bp * (512 * 256 + 256 * 64 + 64),
        transcendentals=2 * Bp,
        bytes_accessed=(Bp * Kp * 4                # x (f32, read once)
                        + n_i * Kp * 512 * 2       # wb re-read per i-block
                        + mlp_param_bytes
                        + Bp * 128 * 4),           # lane-padded output
    )

    out = pl.pallas_call(
        mutual_gaze_kernel,
        out_shape=jax.ShapeDtypeStruct((Bp, 128), jnp.float32),
        grid_spec=pltpu.PrefetchScalarGridSpec(
            num_scalar_prefetch=0,
            grid=grid,
            in_specs=[
                pl.BlockSpec((TM, TK), lambda i, k: (i, k)),    # x tile (f32)
                pl.BlockSpec((TK, 512), lambda i, k: (k, 0)),   # wb tile (bf16)
                # Small, VMEM-resident classifier params (constant index maps
                # -> no re-DMA across grid steps).
                pl.BlockSpec((1, 512), lambda i, k: (0, 0)),    # bb
                pl.BlockSpec((512, 256), lambda i, k: (0, 0)),  # w1 (bf16)
                pl.BlockSpec((1, 256), lambda i, k: (0, 0)),    # b1
                pl.BlockSpec((256, 64), lambda i, k: (0, 0)),   # w2 (bf16)
                pl.BlockSpec((1, 64), lambda i, k: (0, 0)),     # b2
                pl.BlockSpec((1, 64), lambda i, k: (0, 0)),     # w3 row
                pl.BlockSpec(memory_space=pltpu.MemorySpace.SMEM),  # b3 scalar
            ],
            out_specs=pl.BlockSpec((TM, 128), lambda i, k: (i, 0)),
            scratch_shapes=[pltpu.VMEM((TM, 512), jnp.float32)],
        ),
        compiler_params=pltpu.CompilerParams(
            dimension_semantics=("parallel", "arbitrary"),
            vmem_limit_bytes=48 * 1024 * 1024,
        ),
        cost_estimate=cost,
    )(x_p, prepared["wb"], prepared["bb"], prepared["w1"], prepared["b1"],
      prepared["w2"], prepared["b2"], prepared["w3"], prepared["b3"])

    return out[:B, :1]


# ----------------------------------------------------------------------------
# Pure-JAX references for correctness checking
# ----------------------------------------------------------------------------
def reference_f32(x_nchw, p):
    """Module semantics in full f32 (dropout = identity at eval)."""
    x = x_nchw.reshape(x_nchw.shape[0], -1)
    feat = x @ p["wb"] + p["bb"]
    feat = feat / jnp.sqrt(jnp.sum(feat * feat, axis=-1, keepdims=True) + 1e-12)
    h1 = jnp.maximum(feat @ p["w1"] + p["b1"], 0.0)
    h2 = jnp.maximum(h1 @ p["w2"] + p["b2"], 0.0)
    return jax.nn.sigmoid(h2 @ p["w3"] + p["b3"])


def reference_bf16(x_nchw, p):
    """Same math but mirroring the kernel's bf16 casts (f32 accumulate)."""
    up = lambda a: a.astype(jnp.bfloat16).astype(jnp.float32)
    x = x_nchw.reshape(x_nchw.shape[0], -1)
    feat = jnp.dot(up(x), up(p["wb"]),
                   precision=jax.lax.Precision.HIGHEST) + p["bb"]
    feat = feat * jax.lax.rsqrt(
        jnp.sum(feat * feat, axis=-1, keepdims=True) + 1e-12)
    h1 = jnp.dot(up(feat), up(p["w1"]),
                 precision=jax.lax.Precision.HIGHEST) + p["b1"]
    h1 = jnp.maximum(h1, 0.0)
    h2 = jnp.dot(up(h1), up(p["w2"]),
                 precision=jax.lax.Precision.HIGHEST) + p["b2"]
    h2 = jnp.maximum(h2, 0.0)
    return jax.nn.sigmoid(h2 @ p["w3"] + p["b3"])


def init_params(key, in_features):
    ks = jax.random.split(key, 8)

    def lin(kw, fan_in, fan_out):
        scale = 1.0 / jnp.sqrt(jnp.float32(fan_in))
        return jax.random.uniform(kw, (fan_in, fan_out), jnp.float32,
                                  -scale, scale)

    return {
        "wb": lin(ks[0], in_features, 512),
        "bb": jax.random.uniform(ks[1], (1, 512), jnp.float32, -0.01, 0.01),
        "w1": lin(ks[2], 512, 256),
        "b1": jax.random.uniform(ks[3], (1, 256), jnp.float32, -0.01, 0.01),
        "w2": lin(ks[4], 256, 64),
        "b2": jax.random.uniform(ks[5], (1, 64), jnp.float32, -0.01, 0.01),
        "w3": lin(ks[6], 64, 1),
        "b3": jax.random.uniform(ks[7], (1, 1), jnp.float32, -0.01, 0.01),
    }


if __name__ == "__main__":
    key = jax.random.PRNGKey(0)
    k_x, k_p = jax.random.split(key)

    # Small facenet-style input: batch=2, 3 channels, 32x32 spatial (NCHW).
    B, C, H, W = 2, 3, 32, 32
    x = jax.random.normal(k_x, (B, C, H, W), jnp.float32)
    params = init_params(k_p, C * H * W)

    prepared = prepare_params(params)            # one-time weight prep
    out = jax.block_until_ready(mutual_gaze_detector(x, prepared))
    ref32 = jax.block_until_ready(reference_f32(x, params))
    ref16 = jax.block_until_ready(reference_bf16(x, params))

    assert out.shape == (B, 1), out.shape
    assert bool(jnp.all(jnp.isfinite(out)))
    # vs. bf16-consistent reference: tight.
    assert jnp.allclose(out, ref16, atol=2e-3, rtol=2e-3), (out, ref16)
    # vs. pure-f32 module semantics: loose (bf16 casts in the kernel).
    assert jnp.allclose(out, ref32, atol=3e-2, rtol=3e-2), (out, ref32)
    print("KERNEL_OK")
</pallas_src>

<mosaic_0001>
module attributes {stable_mosaic.version = 11 : i64} {
  func.func @mutual_gaze_kernel(%arg0: i32, %arg1: i32, %arg2: memref<8x3072xf32, #tpu.memory_space<vmem>>, %arg3: memref<3072x512xbf16, #tpu.memory_space<vmem>>, %arg4: memref<1x512xf32, #tpu.memory_space<vmem>>, %arg5: memref<512x256xbf16, #tpu.memory_space<vmem>>, %arg6: memref<1x256xf32, #tpu.memory_space<vmem>>, %arg7: memref<256x64xbf16, #tpu.memory_space<vmem>>, %arg8: memref<1x64xf32, #tpu.memory_space<vmem>>, %arg9: memref<1x64xf32, #tpu.memory_space<vmem>>, %arg10: memref<1x1xf32, #tpu.memory_space<smem>>, %arg11: memref<8x128xf32, #tpu.memory_space<vmem>>, %arg12: memref<8x512xf32, #tpu.memory_space<vmem>>) attributes {dimension_semantics = [#tpu.dimension_semantics<parallel>, #tpu.dimension_semantics<arbitrary>], iteration_bounds = array<i64: 1, 1>, scalar_prefetch = 0 : i64, scratch_operands = 1 : i64, tpu.core_type = #tpu.core_type<tc>, window_params = [{transform_indices = @transform_0, window_bounds = array<i64: 8, 3072>}, {transform_indices = @transform_1, window_bounds = array<i64: 3072, 512>}, {pipeline_mode = #tpu.pipeline_mode<synchronous>, transform_indices = @transform_2, window_bounds = array<i64: 1, 512>}, {pipeline_mode = #tpu.pipeline_mode<synchronous>, transform_indices = @transform_3, window_bounds = array<i64: 512, 256>}, {pipeline_mode = #tpu.pipeline_mode<synchronous>, transform_indices = @transform_4, window_bounds = array<i64: 1, 256>}, {pipeline_mode = #tpu.pipeline_mode<synchronous>, transform_indices = @transform_5, window_bounds = array<i64: 256, 64>}, {pipeline_mode = #tpu.pipeline_mode<synchronous>, transform_indices = @transform_6, window_bounds = array<i64: 1, 64>}, {pipeline_mode = #tpu.pipeline_mode<synchronous>, transform_indices = @transform_7, window_bounds = array<i64: 1, 64>}, {transform_indices = @transform_8, window_bounds = array<i64: 1, 1>}, {transform_indices = @transform_9, window_bounds = array<i64: 8, 128>}]} {
    %c0_i32 = arith.constant 0 : i32
    %0 = arith.cmpi eq, %arg1, %c0_i32 : i32
    %1 = arith.extui %0 : i1 to i32
    %c0_i32_0 = arith.constant 0 : i32
    %2 = arith.cmpi ne, %1, %c0_i32_0 : i32
    scf.if %2 {
      %cst_10 = arith.constant 0.000000e+00 : f32
      %13 = vector.broadcast %cst_10 : f32 to vector<8x512xf32>
      %c0_11 = arith.constant 0 : index
      %c0_12 = arith.constant 0 : index
      %14 = vector.load %arg12[%c0_11, %c0_12] : memref<8x512xf32, #tpu.memory_space<vmem>>, vector<8x512xf32>
      tpu.vector_store %arg12[%c0_11, %c0_12], %13 {strides = array<i32>} : memref<8x512xf32, #tpu.memory_space<vmem>>, vector<8x512xf32>,
    } else {
    }
    %c0 = arith.constant 0 : index
    %c0_1 = arith.constant 0 : index
    %3 = vector.load %arg12[%c0, %c0_1] : memref<8x512xf32, #tpu.memory_space<vmem>>, vector<8x512xf32>
    %c0_2 = arith.constant 0 : index
    %c0_3 = arith.constant 0 : index
    %4 = vector.load %arg2[%c0_2, %c0_3] : memref<8x3072xf32, #tpu.memory_space<vmem>>, vector<8x3072xf32>
    %5 = arith.truncf %4 : vector<8x3072xf32> to vector<8x3072xbf16>
    %c0_4 = arith.constant 0 : index
    %c0_5 = arith.constant 0 : index
    %6 = vector.load %arg3[%c0_4, %c0_5] : memref<3072x512xbf16, #tpu.memory_space<vmem>>, vector<3072x512xbf16>
    %cst = arith.constant dense<0.000000e+00> : vector<8x512xf32>
    %7 = tpu.matmul %5, %6, %cst {dimension_numbers = #tpu.dot_dimension_numbers<[1], [0], [0], [1], [0, 0, 1, 1], [], []>} : vector<8x3072xbf16>, vector<3072x512xbf16>, vector<8x512xf32> -> vector<8x512xf32>
    %8 = arith.addf %3, %7 : vector<8x512xf32>
    %c0_6 = arith.constant 0 : index
    %c0_7 = arith.constant 0 : index
    %9 = vector.load %arg12[%c0_6, %c0_7] : memref<8x512xf32, #tpu.memory_space<vmem>>, vector<8x512xf32>
    tpu.vector_store %arg12[%c0_6, %c0_7], %8 {strides = array<i32>} : memref<8x512xf32, #tpu.memory_space<vmem>>, vector<8x512xf32>,
    %c0_i32_8 = arith.constant 0 : i32
    %10 = arith.cmpi eq, %arg1, %c0_i32_8 : i32
    %11 = arith.extui %10 : i1 to i32
    %c0_i32_9 = arith.constant 0 : i32
    %12 = arith.cmpi ne, %11, %c0_i32_9 : i32
    scf.if %12 {
      %c0_10 = arith.constant 0 : index
      %c0_11 = arith.constant 0 : index
      %13 = vector.load %arg12[%c0_10, %c0_11] : memref<8x512xf32, #tpu.memory_space<vmem>>, vector<8x512xf32>
      %c0_12 = arith.constant 0 : index
      %c0_13 = arith.constant 0 : index
      %14 = vector.load %arg4[%c0_12, %c0_13] : memref<1x512xf32, #tpu.memory_space<vmem>>, vector<1x512xf32>
      %15 = vector.broadcast %14 : vector<1x512xf32> to vector<8x512xf32>
      %16 = arith.addf %13, %15 : vector<8x512xf32>
      %17 = arith.mulf %16, %16 : vector<8x512xf32>
      %cst_14 = arith.constant dense<0.000000e+00> : vector<8xf32>
      %18 = vector.multi_reduction <add>, %17, %cst_14 [1] : vector<8x512xf32> to vector<8xf32>
      %19 = vector.shape_cast %18 : vector<8xf32> to vector<8x1xf32>
      %cst_15 = arith.constant 9.99999996E-13 : f32
      %20 = vector.broadcast %cst_15 : f32 to vector<8x1xf32>
      %21 = arith.addf %19, %20 : vector<8x1xf32>
      %22 = math.rsqrt %21 : vector<8x1xf32>
      %23 = vector.broadcast %22 : vector<8x1xf32> to vector<8x512xf32>
      %24 = arith.mulf %16, %23 : vector<8x512xf32>
      %25 = arith.truncf %24 : vector<8x512xf32> to vector<8x512xbf16>
      %c0_16 = arith.constant 0 : index
      %c0_17 = arith.constant 0 : index
      %26 = vector.load %arg5[%c0_16, %c0_17] : memref<512x256xbf16, #tpu.memory_space<vmem>>, vector<512x256xbf16>
      %cst_18 = arith.constant dense<0.000000e+00> : vector<8x256xf32>
      %27 = tpu.matmul %25, %26, %cst_18 {dimension_numbers = #tpu.dot_dimension_numbers<[1], [0], [0], [1], [0, 0, 1, 1], [], []>} : vector<8x512xbf16>, vector<512x256xbf16>, vector<8x256xf32> -> vector<8x256xf32>
      %c0_19 = arith.constant 0 : index
      %c0_20 = arith.constant 0 : index
      %28 = vector.load %arg6[%c0_19, %c0_20] : memref<1x256xf32, #tpu.memory_space<vmem>>, vector<1x256xf32>
      %29 = vector.broadcast %28 : vector<1x256xf32> to vector<8x256xf32>
      %30 = arith.addf %27, %29 : vector<8x256xf32>
      %cst_21 = arith.constant 0.000000e+00 : f32
      %31 = vector.broadcast %cst_21 : f32 to vector<8x256xf32>
      %32 = arith.maximumf %30, %31 : vector<8x256xf32>
      %33 = arith.truncf %32 : vector<8x256xf32> to vector<8x256xbf16>
      %c0_22 = arith.constant 0 : index
      %c0_23 = arith.constant 0 : index
      %34 = vector.load %arg7[%c0_22, %c0_23] : memref<256x64xbf16, #tpu.memory_space<vmem>>, vector<256x64xbf16>
      %cst_24 = arith.constant dense<0.000000e+00> : vector<8x64xf32>
      %35 = tpu.matmul %33, %34, %cst_24 {dimension_numbers = #tpu.dot_dimension_numbers<[1], [0], [0], [1], [0, 0, 1, 1], [], []>} : vector<8x256xbf16>, vector<256x64xbf16>, vector<8x64xf32> -> vector<8x64xf32>
      %c0_25 = arith.constant 0 : index
      %c0_26 = arith.constant 0 : index
      %36 = vector.load %arg8[%c0_25, %c0_26] : memref<1x64xf32, #tpu.memory_space<vmem>>, vector<1x64xf32>
      %37 = vector.broadcast %36 : vector<1x64xf32> to vector<8x64xf32>
      %38 = arith.addf %35, %37 : vector<8x64xf32>
      %cst_27 = arith.constant 0.000000e+00 : f32
      %39 = vector.broadcast %cst_27 : f32 to vector<8x64xf32>
      %40 = arith.maximumf %38, %39 : vector<8x64xf32>
      %c0_28 = arith.constant 0 : index
      %c0_29 = arith.constant 0 : index
      %41 = vector.load %arg9[%c0_28, %c0_29] : memref<1x64xf32, #tpu.memory_space<vmem>>, vector<1x64xf32>
      %42 = vector.broadcast %41 : vector<1x64xf32> to vector<8x64xf32>
      %43 = arith.mulf %40, %42 : vector<8x64xf32>
      %cst_30 = arith.constant dense<0.000000e+00> : vector<8xf32>
      %44 = vector.multi_reduction <add>, %43, %cst_30 [1] : vector<8x64xf32> to vector<8xf32>
      %45 = vector.shape_cast %44 : vector<8xf32> to vector<8x1xf32>
      %c0_31 = arith.constant 0 : index
      %c0_32 = arith.constant 0 : index
      %46 = memref.load %arg10[%c0_31, %c0_32] : memref<1x1xf32, #tpu.memory_space<smem>>
      %47 = vector.broadcast %46 : f32 to vector<8x1xf32>
      %48 = arith.addf %45, %47 : vector<8x1xf32>
      %49 = arith.negf %48 : vector<8x1xf32>
      %50 = math.exp %49 : vector<8x1xf32>
      %cst_33 = arith.constant 1.000000e+00 : f32
      %51 = vector.broadcast %cst_33 : f32 to vector<8x1xf32>
      %52 = arith.addf %51, %50 : vector<8x1xf32>
      %53 = arith.divf %51, %52 : vector<8x1xf32>
      %54 = vector.shape_cast %53 : vector<8x1xf32> to vector<8x1xf32>
      %55 = vector.broadcast %54 : vector<8x1xf32> to vector<8x128xf32>
      %c0_34 = arith.constant 0 : index
      %c0_35 = arith.constant 0 : index
      %56 = vector.load %arg11[%c0_34, %c0_35] : memref<8x128xf32, #tpu.memory_space<vmem>>, vector<8x128xf32>
      tpu.vector_store %arg11[%c0_34, %c0_35], %55 {strides = array<i32>} : memref<8x128xf32, #tpu.memory_space<vmem>>, vector<8x128xf32>,
    } else {
    }
    return
  }
  func.func @transform_0(%arg0: i32, %arg1: i32) -> (i32, i32) {
    %c0_i32 = arith.constant 0 : i32
    return %arg0, %arg1 : i32, i32
  }
  func.func @transform_1(%arg0: i32, %arg1: i32) -> (i32, i32) {
    %c0_i32 = arith.constant 0 : i32
    %c0_i32_0 = arith.constant 0 : i32
    return %arg1, %c0_i32 : i32, i32
  }
  func.func @transform_2(%arg0: i32, %arg1: i32) -> (i32, i32) {
    %c0_i32 = arith.constant 0 : i32
    %c0_i32_0 = arith.constant 0 : i32
    %c0_i32_1 = arith.constant 0 : i32
    return %c0_i32, %c0_i32_0 : i32, i32
  }
  func.func @transform_3(%arg0: i32, %arg1: i32) -> (i32, i32) {
    %c0_i32 = arith.constant 0 : i32
    %c0_i32_0 = arith.constant 0 : i32
    %c0_i32_1 = arith.constant 0 : i32
    return %c0_i32, %c0_i32_0 : i32, i32
  }
  func.func @transform_4(%arg0: i32, %arg1: i32) -> (i32, i32) {
    %c0_i32 = arith.constant 0 : i32
    %c0_i32_0 = arith.constant 0 : i32
    %c0_i32_1 = arith.constant 0 : i32
    return %c0_i32, %c0_i32_0 : i32, i32
  }
  func.func @transform_5(%arg0: i32, %arg1: i32) -> (i32, i32) {
    %c0_i32 = arith.constant 0 : i32
    %c0_i32_0 = arith.constant 0 : i32
    %c0_i32_1 = arith.constant 0 : i32
    return %c0_i32, %c0_i32_0 : i32, i32
  }
  func.func @transform_6(%arg0: i32, %arg1: i32) -> (i32, i32) {
    %c0_i32 = arith.constant 0 : i32
    %c0_i32_0 = arith.constant 0 : i32
    %c0_i32_1 = arith.constant 0 : i32
    return %c0_i32, %c0_i32_0 : i32, i32
  }
  func.func @transform_7(%arg0: i32, %arg1: i32) -> (i32, i32) {
    %c0_i32 = arith.constant 0 : i32
    %c0_i32_0 = arith.constant 0 : i32
    %c0_i32_1 = arith.constant 0 : i32
    return %c0_i32, %c0_i32_0 : i32, i32
  }
  func.func @transform_8(%arg0: i32, %arg1: i32) -> (i32, i32) {
    %c0_i32 = arith.constant 0 : i32
    %c0_i32_0 = arith.constant 0 : i32
    %c0_i32_1 = arith.constant 0 : i32
    return %c0_i32, %c0_i32_0 : i32, i32
  }
  func.func @transform_9(%arg0: i32, %arg1: i32) -> (i32, i32) {
    %c0_i32 = arith.constant 0 : i32
    %c0_i32_0 = arith.constant 0 : i32
    return %arg0, %c0_i32 : i32, i32
  }
}

</mosaic_0001>

<bundles_post_ra>
// kernel: tpu_custom_call.1
= control target key start
LH: loop header
LB: loop body
LE: loop exit
PB: predicated region body
PF: predicated region fallthrough
CT: control target
= control target key end

     0   :  { %15 = vsyncpa [#allocation5], 0  ;;  %s9166_s0 = inlined_call_operand.hbm [shape: f32[8,3072], index: 0, kind: input, shape index: {}]   ;;  %s9167_s1 = inlined_call_operand.hbm [shape: bf16[3072,512], index: 1, kind: input, shape index: {}]   ;;  %s9168_s2 = inlined_call_operand.hbm [shape: f32[1,512], index: 2, kind: input, shape index: {}]   ;;  %s9169_s3 = inlined_call_operand.hbm [shape: bf16[512,256], index: 3, kind: input, shape index: {}]   ;;  %s9170_s4 = inlined_call_operand.hbm [shape: f32[1,256], index: 4, kind: input, shape index: {}]   ;;  %s9171_s5 = inlined_call_operand.vmem [shape: bf16[256,64], index: 5, kind: input, shape index: {}]   ;;  %s9172_s6 = inlined_call_operand.hbm [shape: f32[1,64], index: 6, kind: input, shape index: {}]   ;;  %s9173_s7 = inlined_call_operand.hbm [shape: f32[1,64], index: 7, kind: input, shape index: {}]   ;;  %s9174_s8 = inlined_call_operand.<no memory space> [shape: f32[1,1], index: 8, kind: input, shape index: {}]   ;;  %s9175_s9 = inlined_call_operand.hbm [shape: f32[8,128], index: 9, kind: output, shape index: {}]  }
   0x1   :  { %16 = vsyncpa [#allocation8], 0 }
   0x2   :  { %17 = vsyncpa [#allocation11], 0 }
   0x3   :  { %18 = vsyncpa [#allocation14], 0 }
   0x4   :  { %19 = vsyncpa [#allocation6], 0  ;;  %s8855_s30 = smov [#allocation7]  }
   0x5   :  { %s35_s10 = sshll.u32 %s8855_s30, 4  ;;  %s36_s10 = int_to_ptr.vmem [resolvable:$true] %s35_s10 }
   0x6   :  { %s8693_s11 = scalar_lea.vmem %s36_s10, 98304  ;;  %p8698_p1 = scmp.lt.s32.totalorder %s36_s10, %s36_s10 }
   0x7   :  { %p8694_p0 = scmp.ne.s32.totalorder %s36_s10, %s8693_s11  ;;  %p8699_p2 = scmp.lt.s32.totalorder %s8693_s11, %s8693_s11 }
   0x9   :  { %p8700_p3 = por %p8699_p2, %p8698_p1 }
   0xb   :  { %p8701_p4 = pnand %p8700_p3, %p8694_p0 }
   0xd   :  { %8704 = shalt.err (!%p8701_p4)
}
   0xe   :  { %s8856_s12 = smov 256   ;;  %s8857_s13 = smov 16  }
   0xf   :  { %41 = dma.hbm_to_vmem [thread:$0]  %s9167_s1, 98304, %s36_s10, [#allocation8], %s8856_s12, %s8856_s12, %s8857_s13  }
  0x10   :  { %s8858_s16 = smov [#allocation10]  }
  0x11   :  { %s57_s17 = sshll.u32 %s8858_s16, 4  ;;  %s58_s17 = int_to_ptr.vmem [resolvable:$true] %s57_s17 }
  0x12   :  { %s8713_s18 = scalar_lea.vmem %s58_s17, 8192  ;;  %p8718_p6 = scmp.lt.s32.totalorder %s58_s17, %s58_s17 }
  0x13   :  { %p8714_p5 = scmp.ne.s32.totalorder %s58_s17, %s8713_s18  ;;  %p8719_p7 = scmp.lt.s32.totalorder %s8713_s18, %s8713_s18 }
  0x15   :  { %p8720_p8 = por %p8719_p7, %p8718_p6 }
  0x17   :  { %p8721_p9 = pnand %p8720_p8, %p8714_p5 }
  0x19   :  { %8724 = shalt.err (!%p8721_p9)
}
  0x1a   :  { %s8859_s19 = smov 128   ;;  %s8860_s20 = smov 8  }
  0x1b   :  { %63 = dma.hbm_to_vmem [thread:$0]  %s9169_s3, 8192, %s58_s17, [#allocation11], %s8859_s19, %s8859_s19, %s8860_s20  }
  0x1c   :  { %s8861_s23 = smov [#allocation13]   ;;  %s8862_s25 = smov [#allocation4]  }
  0x1d   :  { %s82_s24 = sshll.u32 %s8861_s23, 4  ;;  %s26_s1 = sshll.u32 %s8862_s25, 4  ;;  %s83_s24 = int_to_ptr.vmem [resolvable:$true] %s82_s24  ;;  %s27_s1 = int_to_ptr.vmem [resolvable:$true] %s26_s1 }
  0x1e   :  { %s8733_s26 = scalar_lea.vmem %s83_s24, 16  ;;  %s8737_s27 = scalar_lea.vmem %s83_s24, 32 }
  0x1f   :  { %p8734_p10 = scmp.ne.s32.totalorder %s83_s24, %s8733_s26  ;;  %p8738_p11 = scmp.lt.s32.totalorder %s83_s24, %s83_s24 }
  0x20   :  { %p8739_p12 = scmp.lt.s32.totalorder %s8737_s27, %s8733_s26 }
  0x22   :  { %p8740_p13 = por %p8739_p12, %p8738_p11 }
  0x24   :  { %p8741_p0 = pnand %p8740_p13, %p8734_p10 }
  0x26   :  { %8744 = shalt.err (!%p8741_p0)
}
  0x27   :  { %85 = dma.hbm_to_vmem [thread:$0]  %s9172_s6, 16, %s83_s24, [#allocation14]  }
  0x28   :  { %s8753_s30 = scalar_lea.vmem %s27_s1, 3072  ;;  %p8758_p2 = scmp.lt.s32.totalorder %s27_s1, %s27_s1 }
  0x29   :  { %p8754_p1 = scmp.ne.s32.totalorder %s27_s1, %s8753_s30  ;;  %p8759_p3 = scmp.lt.s32.totalorder %s8753_s30, %s8753_s30 }
  0x2b   :  { %p8760_p4 = por %p8759_p3, %p8758_p2 }
  0x2d   :  { %p8761_p5 = pnand %p8760_p4, %p8754_p1 }
  0x2f   :  { %8764 = shalt.err (!%p8761_p5)
}
  0x30   :  { %29 = dma.hbm_to_vmem [thread:$0]  %s9166_s0, 3072, %s27_s1, [#allocation5]  }
  0x31   :  { %s8863_s11 = smov [#allocation9]   ;;  %s8864_s13 = smov [#allocation12]  }
  0x32   :  { %s48_s12 = sshll.u32 %s8863_s11, 4  ;;  %s70_s14 = sshll.u32 %s8864_s13, 4  ;;  %s49_s12 = int_to_ptr.vmem [resolvable:$true] %s48_s12  ;;  %s71_s14 = int_to_ptr.vmem [resolvable:$true] %s70_s14 }
  0x33   :  { %s8773_s15 = scalar_lea.vmem %s49_s12, 64  ;;  %p8778_p7 = scmp.lt.s32.totalorder %s49_s12, %s49_s12 }
  0x34   :  { %p8774_p6 = scmp.ne.s32.totalorder %s49_s12, %s8773_s15  ;;  %p8779_p8 = scmp.lt.s32.totalorder %s8773_s15, %s8773_s15 }
  0x36   :  { %p8780_p9 = por %p8779_p8, %p8778_p7 }
  0x38   :  { %p8781_p10 = pnand %p8780_p9, %p8774_p6 }
  0x3a   :  { %8784 = shalt.err (!%p8781_p10)
}
  0x3b   :  { %51 = dma.hbm_to_vmem [thread:$0]  %s9168_s2, 64, %s49_s12, [#allocation8]  }
  0x3c   :  { %s8793_s17 = scalar_lea.vmem %s71_s14, 32  ;;  %p8798_p12 = scmp.lt.s32.totalorder %s71_s14, %s71_s14 }
  0x3d   :  { %p8794_p11 = scmp.ne.s32.totalorder %s71_s14, %s8793_s17  ;;  %p8799_p13 = scmp.lt.s32.totalorder %s8793_s17, %s8793_s17 }
  0x3f   :  { %p8800_p0 = por %p8799_p13, %p8798_p12 }
  0x41   :  { %p8801_p1 = pnand %p8800_p0, %p8794_p11 }
  0x43   :  { %8804 = shalt.err (!%p8801_p1)
}
  0x44   :  { %73 = dma.hbm_to_vmem [thread:$0]  %s9170_s4, 32, %s71_s14, [#allocation11]  }
  0x45   :  { %s8865_s19 = smov [#allocation15]  }
  0x46   :  { %s92_s20 = sshll.u32 %s8865_s19, 4  ;;  %s93_s20 = int_to_ptr.vmem [resolvable:$true] %s92_s20 }
  0x47   :  { %s8813_s21 = scalar_lea.vmem %s93_s20, 16  ;;  %s8817_s22 = scalar_lea.vmem %s93_s20, 32 }
  0x48   :  { %p8814_p2 = scmp.ne.s32.totalorder %s93_s20, %s8813_s21  ;;  %p8818_p3 = scmp.lt.s32.totalorder %s93_s20, %s93_s20 }
  0x49   :  { %p8819_p4 = scmp.lt.s32.totalorder %s8817_s22, %s8813_s21 }
  0x4b   :  { %p8820_p5 = por %p8819_p4, %p8818_p3 }
  0x4d   :  { %p8821_p6 = pnand %p8820_p5, %p8814_p2 }
  0x4f   :  { %8824 = shalt.err (!%p8821_p6)
}
  0x50   :  { %95 = dma.hbm_to_vmem [thread:$0]  %s9173_s7, 16, %s93_s20, [#allocation14]  }
  0x51   :  { %8845 = dma.done.wait [#allocation5], 3072  }
  0x52   :  { %8846 = vsyncadd [#allocation5], 4294964224 }
  0x53   :  { %8847 = dma.done.wait [#allocation8], 98368  }
  0x54   :  { %8848 = vsyncadd [#allocation8], 4294868928 }
  0x55   :  { %8849 = dma.done.wait [#allocation11], 8224  }
  0x56   :  { %8850 = vsyncadd [#allocation11], 4294959072 }
  0x57   :  { %8851 = dma.done.wait [#allocation14], 32  }
  0x58   :  { %8852 = vsyncadd [#allocation14], 4294967264  ;;  %v7415_v0 = vld [vmem:[#allocation7 + $0xe4] ss:$16 sps:$4 sm:$0xff]   ;;  %v7419_v2 = vld [vmem:[#allocation7 + $0xe0] ss:$16 sps:$4 sm:$0xff]  }
  0x59   :  { %v7417_v1 = vld [vmem:[#allocation7 + $0x2e4] ss:$16 sps:$4 sm:$0xff]   ;;  %4788 = vmatprep.subr.bf16.mxu0 %v7415_v0  ;;  %v7420_v3 = vld [vmem:[#allocation7 + $0x2e0] ss:$16 sps:$4 sm:$0xff]   ;;  %v133_v46 = vld [vmem:[#allocation4 + $0x8] sm:$0xff]  ;;  %vm6498_vm0 = vcmask 523264  }
  0x5a   :  { %4829 = vmatprep.subr.bf16.mxu1 %v7417_v1  ;;  %v7421_v4 = vld [vmem:[#allocation7 + $0xc4] ss:$16 sps:$4 sm:$0xff]   ;;  %4789 = vmatpush1.bf16.msra.mxu0 %v7419_v2  ;;  %v7425_v6 = vld [vmem:[#allocation7 + $0xc0] ss:$16 sps:$4 sm:$0xff]   ;;  %v8938_v49 = vpack.c.bf16 %v133_v46, %v133_v46  ;;  %v135_v50 = vld [vmem:[#allocation4 + $0x18] sm:$0xff]  ;;  %s8866_s26 = smov [#allocation16]  }
  0x5b   :  { %4830 = vmatpush1.bf16.msra.mxu1 %v7420_v3  ;;  %v7423_v5 = vld [vmem:[#allocation7 + $0x2c4] ss:$16 sps:$4 sm:$0xff]   ;;  %4790 = vmatprep.subr.bf16.mxu0 %v7421_v4  ;;  %v7426_v7 = vld [vmem:[#allocation7 + $0x2c0] ss:$16 sps:$4 sm:$0xff]   ;;  %v8940_v52 = vpack.c.bf16 %v135_v50, %v135_v50  ;;  %s6518_s27 = sshll.u32 %s8866_s26, 4  ;;  %s6519_s27 = int_to_ptr.vmem [resolvable:$true] %s6518_s27 }
  0x5c   :  { %4831 = vmatprep.subr.bf16.mxu1 %v7423_v5  ;;  %v7427_v8 = vld [vmem:[#allocation7 + $0xa4] ss:$16 sps:$4 sm:$0xff]   ;;  %v7431_v10 = vld [vmem:[#allocation7 + $0xa0] ss:$16 sps:$4 sm:$0xff]   ;;  %4820 = vmatprep.mubr.bf16.mxu0 %v8938_v49  ;;  %s8825_s28 = scalar_lea.vmem %s6519_s27, 128  ;;  %p8830_p8 = scmp.lt.s32.totalorder %s6519_s27, %s6519_s27 }
  0x5d   :  { %v7429_v9 = vld [vmem:[#allocation7 + $0x2a4] ss:$16 sps:$4 sm:$0xff]   ;;  %v7432_v11 = vld [vmem:[#allocation7 + $0x2a0] ss:$16 sps:$4 sm:$0xff]   ;;  %4861 = vmatprep.mubr.bf16.mxu1 %v8940_v52  ;;  %p8826_p7 = scmp.ne.s32.totalorder %s6519_s27, %s8825_s28  ;;  %p8831_p9 = scmp.lt.s32.totalorder %s8825_s28, %s8825_s28 }
  0x5e   :  { %4791 = vmatpush1.bf16.msra.mxu0 %v7425_v6  ;;  %v7433_v12 = vld [vmem:[#allocation7 + $0x84] ss:$16 sps:$4 sm:$0xff]   ;;  %v7437_v14 = vld [vmem:[#allocation7 + $0x80] ss:$16 sps:$4 sm:$0xff]  }
  0x5f   :  { %4832 = vmatpush1.bf16.msra.mxu1 %v7426_v7  ;;  %4792 = vmatprep.subr.bf16.mxu0 %v7427_v8  ;;  %v7435_v13 = vld [vmem:[#allocation7 + $0x284] ss:$16 sps:$4 sm:$0xff]   ;;  %v7438_v15 = vld [vmem:[#allocation7 + $0x280] ss:$16 sps:$4 sm:$0xff]   ;;  %p8832_p10 = por %p8831_p9, %p8830_p8 }
  0x60   :  { %4833 = vmatprep.subr.bf16.mxu1 %v7429_v9  ;;  %v7439_v16 = vld [vmem:[#allocation7 + $0x64] ss:$16 sps:$4 sm:$0xff]   ;;  %v7443_v18 = vld [vmem:[#allocation7 + $0x60] ss:$16 sps:$4 sm:$0xff]  }
  0x61   :  { %v7441_v17 = vld [vmem:[#allocation7 + $0x264] ss:$16 sps:$4 sm:$0xff]   ;;  %v7444_v19 = vld [vmem:[#allocation7 + $0x260] ss:$16 sps:$4 sm:$0xff]   ;;  %p8833_p11 = pnand %p8832_p10, %p8826_p7 }
  0x62   :  { %4793 = vmatpush1.bf16.msra.mxu0 %v7431_v10  ;;  %v7445_v20 = vld [vmem:[#allocation7 + $0x44] ss:$16 sps:$4 sm:$0xff]   ;;  %v7449_v22 = vld [vmem:[#allocation7 + $0x40] ss:$16 sps:$4 sm:$0xff]  }
  0x63   :  { %4834 = vmatpush1.bf16.msra.mxu1 %v7432_v11  ;;  %4794 = vmatprep.subr.bf16.mxu0 %v7433_v12  ;;  %v7447_v21 = vld [vmem:[#allocation7 + $0x244] ss:$16 sps:$4 sm:$0xff]   ;;  %v7450_v23 = vld [vmem:[#allocation7 + $0x240] ss:$16 sps:$4 sm:$0xff]  }
  0x64   :  { %4835 = vmatprep.subr.bf16.mxu1 %v7435_v13  ;;  %v7451_v24 = vld [vmem:[#allocation7 + $0x24] ss:$16 sps:$4 sm:$0xff]   ;;  %v7455_v26 = vld [vmem:[#allocation7 + $0x20] ss:$16 sps:$4 sm:$0xff]  }
  0x65   :  { %v7453_v25 = vld [vmem:[#allocation7 + $0x224] ss:$16 sps:$4 sm:$0xff]   ;;  %v7456_v27 = vld [vmem:[#allocation7 + $0x220] ss:$16 sps:$4 sm:$0xff]  }
  0x66   :  { %4795 = vmatpush1.bf16.msra.mxu0 %v7437_v14  ;;  %v7457_v28 = vld [vmem:[#allocation7 + $0x4] ss:$16 sps:$4 sm:$0xff]   ;;  %v7461_v30 = vld [vmem:[#allocation7] ss:$16 sps:$4 sm:$0xff]  }
  0x67   :  { %4836 = vmatpush1.bf16.msra.mxu1 %v7438_v15  ;;  %4796 = vmatprep.subr.bf16.mxu0 %v7439_v16  ;;  %v7459_v29 = vld [vmem:[#allocation7 + $0x204] ss:$16 sps:$4 sm:$0xff]   ;;  %v7462_v31 = vld [vmem:[#allocation7 + $0x200] ss:$16 sps:$4 sm:$0xff]  }
  0x68   :  { %4837 = vmatprep.subr.bf16.mxu1 %v7441_v17  ;;  %v7463_v32 = vld [vmem:[#allocation7 + $0x1e4] ss:$16 sps:$4 sm:$0xff]   ;;  %v7467_v34 = vld [vmem:[#allocation7 + $0x1e0] ss:$16 sps:$4 sm:$0xff]  }
  0x69   :  { %v7465_v33 = vld [vmem:[#allocation7 + $0x3e4] ss:$16 sps:$4 sm:$0xff]   ;;  %v7468_v35 = vld [vmem:[#allocation7 + $0x3e0] ss:$16 sps:$4 sm:$0xff]  }
  0x6a   :  { %4797 = vmatpush1.bf16.msra.mxu0 %v7443_v18  ;;  %v7469_v36 = vld [vmem:[#allocation7 + $0x1c4] ss:$16 sps:$4 sm:$0xff]   ;;  %v7473_v38 = vld [vmem:[#allocation7 + $0x1c0] ss:$16 sps:$4 sm:$0xff]  }
  0x6b   :  { %4838 = vmatpush1.bf16.msra.mxu1 %v7444_v19  ;;  %4798 = vmatprep.subr.bf16.mxu0 %v7445_v20  ;;  %v7471_v37 = vld [vmem:[#allocation7 + $0x3c4] ss:$16 sps:$4 sm:$0xff]   ;;  %v7474_v39 = vld [vmem:[#allocation7 + $0x3c0] ss:$16 sps:$4 sm:$0xff]  }
  0x6c   :  { %4839 = vmatprep.subr.bf16.mxu1 %v7447_v21  ;;  %v7475_v40 = vld [vmem:[#allocation7 + $0x1a4] ss:$16 sps:$4 sm:$0xff]   ;;  %v7479_v42 = vld [vmem:[#allocation7 + $0x1a0] ss:$16 sps:$4 sm:$0xff]  }
  0x6d   :  { %v7477_v41 = vld [vmem:[#allocation7 + $0x3a4] ss:$16 sps:$4 sm:$0xff]   ;;  %v7480_v43 = vld [vmem:[#allocation7 + $0x3a0] ss:$16 sps:$4 sm:$0xff]  }
  0x6e   :  { %4799 = vmatpush1.bf16.msra.mxu0 %v7449_v22  ;;  %v7481_v44 = vld [vmem:[#allocation7 + $0x184] ss:$16 sps:$4 sm:$0xff]   ;;  %v7485_v47 = vld [vmem:[#allocation7 + $0x180] ss:$16 sps:$4 sm:$0xff]  }
  0x6f   :  { %4840 = vmatpush1.bf16.msra.mxu1 %v7450_v23  ;;  %4800 = vmatprep.subr.bf16.mxu0 %v7451_v24  ;;  %v7483_v45 = vld [vmem:[#allocation7 + $0x384] ss:$16 sps:$4 sm:$0xff]   ;;  %v7486_v48 = vld [vmem:[#allocation7 + $0x380] ss:$16 sps:$4 sm:$0xff]  }
  0x70   :  { %4841 = vmatprep.subr.bf16.mxu1 %v7453_v25  ;;  %v7487_v51 = vld [vmem:[#allocation7 + $0x164] ss:$16 sps:$4 sm:$0xff]   ;;  %v7491_v54 = vld [vmem:[#allocation7 + $0x160] ss:$16 sps:$4 sm:$0xff]  }
  0x71   :  { %v7489_v53 = vld [vmem:[#allocation7 + $0x364] ss:$16 sps:$4 sm:$0xff]   ;;  %v7492_v55 = vld [vmem:[#allocation7 + $0x360] ss:$16 sps:$4 sm:$0xff]  }
  0x72   :  { %4801 = vmatpush1.bf16.msra.mxu0 %v7455_v26  ;;  %v7493_v56 = vld [vmem:[#allocation7 + $0x144] ss:$16 sps:$4 sm:$0xff]   ;;  %v7497_v58 = vld [vmem:[#allocation7 + $0x140] ss:$16 sps:$4 sm:$0xff]  }
  0x73   :  { %4842 = vmatpush1.bf16.msra.mxu1 %v7456_v27  ;;  %4802 = vmatprep.subr.bf16.mxu0 %v7457_v28  ;;  %v7495_v57 = vld [vmem:[#allocation7 + $0x344] ss:$16 sps:$4 sm:$0xff]   ;;  %v7498_v59 = vld [vmem:[#allocation7 + $0x340] ss:$16 sps:$4 sm:$0xff]  }
  0x74   :  { %4843 = vmatprep.subr.bf16.mxu1 %v7459_v29  ;;  %v7499_v60 = vld [vmem:[#allocation7 + $0x124] ss:$16 sps:$4 sm:$0xff]   ;;  %v7503_v62 = vld [vmem:[#allocation7 + $0x120] ss:$16 sps:$4 sm:$0xff]  }
  0x75   :  { %v7501_v61 = vld [vmem:[#allocation7 + $0x324] ss:$16 sps:$4 sm:$0xff]   ;;  %v7504_v63 = vld [vmem:[#allocation7 + $0x320] ss:$16 sps:$4 sm:$0xff]  }
  0x76   :  { %4803 = vmatpush1.bf16.msra.mxu0 %v7461_v30  ;;  %v7505_v0 = vld [vmem:[#allocation7 + $0x104] ss:$16 sps:$4 sm:$0xff]   ;;  %v7509_v2 = vld [vmem:[#allocation7 + $0x100] ss:$16 sps:$4 sm:$0xff]  }
  0x77   :  { %4844 = vmatpush1.bf16.msra.mxu1 %v7462_v31  ;;  %4804 = vmatprep.subr.bf16.mxu0 %v7463_v32  ;;  %v7507_v1 = vld [vmem:[#allocation7 + $0x304] ss:$16 sps:$4 sm:$0xff]   ;;  %v7510_v3 = vld [vmem:[#allocation7 + $0x300] ss:$16 sps:$4 sm:$0xff]  }
  0x78   :  { %4845 = vmatprep.subr.bf16.mxu1 %v7465_v33  ;;  %v132_v4 = vld [vmem:[#allocation4] sm:$0xff]  ;;  %v134_v5 = vld [vmem:[#allocation4 + $0x10] sm:$0xff] }
  0x79   :  { %v7513_v6 = vld [vmem:[#allocation7 + $0x4e4] ss:$16 sps:$4 sm:$0xff]   ;;  %v8944_v8 = vpack.c.bf16 %v132_v4, %v132_v4  ;;  %v8946_v9 = vpack.c.bf16 %v134_v5, %v134_v5  ;;  %v7511_v10 = vld [vmem:[#allocation7 + $0x4e0] ss:$16 sps:$4 sm:$0xff]  }
  0x7a   :  { %4805 = vmatpush2.bf16.msra.mxu0 %v7467_v34  ;;  %v7516_v7 = vld [vmem:[#allocation7 + $0x6e4] ss:$16 sps:$4 sm:$0xff]   ;;  %v7514_v11 = vld [vmem:[#allocation7 + $0x6e0] ss:$16 sps:$4 sm:$0xff]   ;;  %v137_v34 = vld [vmem:[#allocation4 + $0x28] sm:$0xff] }
  0x7b   :  { %4846 = vmatpush2.bf16.msra.mxu1 %v7468_v35  ;;  %4806 = vmatprep.subr.bf16.mxu0 %v7469_v36  ;;  %v7519_v12 = vld [vmem:[#allocation7 + $0x4c4] ss:$16 sps:$4 sm:$0xff]   ;;  %v7517_v14 = vld [vmem:[#allocation7 + $0x4c0] ss:$16 sps:$4 sm:$0xff]  }
  0x7c   :  { %4847 = vmatprep.subr.bf16.mxu1 %v7471_v37  ;;  %v7522_v13 = vld [vmem:[#allocation7 + $0x6c4] ss:$16 sps:$4 sm:$0xff]   ;;  %v7520_v15 = vld [vmem:[#allocation7 + $0x6c0] ss:$16 sps:$4 sm:$0xff]   ;;  %v8950_v37 = vpack.c.bf16 %v137_v34, %v137_v34 }
  0x7d   :  { %v7525_v16 = vld [vmem:[#allocation7 + $0x4a4] ss:$16 sps:$4 sm:$0xff]   ;;  %v7523_v18 = vld [vmem:[#allocation7 + $0x4a0] ss:$16 sps:$4 sm:$0xff]  }
  0x7e   :  { %4807 = vmatpush2.bf16.msra.mxu0 %v7473_v38  ;;  %v7528_v17 = vld [vmem:[#allocation7 + $0x6a4] ss:$16 sps:$4 sm:$0xff]   ;;  %v7526_v19 = vld [vmem:[#allocation7 + $0x6a0] ss:$16 sps:$4 sm:$0xff]   ;;  %v139_v38 = vld [vmem:[#allocation4 + $0x38] sm:$0xff] }
  0x7f   :  { %4848 = vmatpush2.bf16.msra.mxu1 %v7474_v39  ;;  %4808 = vmatprep.subr.bf16.mxu0 %v7475_v40  ;;  %v7531_v20 = vld [vmem:[#allocation7 + $0x484] ss:$16 sps:$4 sm:$0xff]   ;;  %v7529_v22 = vld [vmem:[#allocation7 + $0x480] ss:$16 sps:$4 sm:$0xff]   ;;  %v8952_v40 = vpack.c.bf16 %v139_v38, %v139_v38 }
  0x80   :  { %4849 = vmatprep.subr.bf16.mxu1 %v7477_v41  ;;  %v7534_v21 = vld [vmem:[#allocation7 + $0x684] ss:$16 sps:$4 sm:$0xff]   ;;  %v7532_v23 = vld [vmem:[#allocation7 + $0x680] ss:$16 sps:$4 sm:$0xff]  }
  0x81   :  { %v7537_v24 = vld [vmem:[#allocation7 + $0x464] ss:$16 sps:$4 sm:$0xff]   ;;  %v7535_v26 = vld [vmem:[#allocation7 + $0x460] ss:$16 sps:$4 sm:$0xff]  }
  0x82   :  { %4809 = vmatpush2.bf16.msra.mxu0 %v7479_v42  ;;  %v7540_v25 = vld [vmem:[#allocation7 + $0x664] ss:$16 sps:$4 sm:$0xff]   ;;  %v7538_v27 = vld [vmem:[#allocation7 + $0x660] ss:$16 sps:$4 sm:$0xff]  }
  0x83   :  { %4850 = vmatpush2.bf16.msra.mxu1 %v7480_v43  ;;  %4810 = vmatprep.subr.bf16.mxu0 %v7481_v44  ;;  %v7543_v28 = vld [vmem:[#allocation7 + $0x444] ss:$16 sps:$4 sm:$0xff]   ;;  %v7541_v30 = vld [vmem:[#allocation7 + $0x440] ss:$16 sps:$4 sm:$0xff]  }
  0x84   :  { %4851 = vmatprep.subr.bf16.mxu1 %v7483_v45  ;;  %v7546_v29 = vld [vmem:[#allocation7 + $0x644] ss:$16 sps:$4 sm:$0xff]   ;;  %v7544_v31 = vld [vmem:[#allocation7 + $0x640] ss:$16 sps:$4 sm:$0xff]  }
  0x85   :  { %v7549_v32 = vld [vmem:[#allocation7 + $0x424] ss:$16 sps:$4 sm:$0xff]   ;;  %v7547_v35 = vld [vmem:[#allocation7 + $0x420] ss:$16 sps:$4 sm:$0xff]  }
  0x86   :  { %4811 = vmatpush2.bf16.msra.mxu0 %v7485_v47  ;;  %v7552_v33 = vld [vmem:[#allocation7 + $0x624] ss:$16 sps:$4 sm:$0xff]   ;;  %v7550_v36 = vld [vmem:[#allocation7 + $0x620] ss:$16 sps:$4 sm:$0xff]  }
  0x87   :  { %4852 = vmatpush2.bf16.msra.mxu1 %v7486_v48  ;;  %4812 = vmatprep.subr.bf16.mxu0 %v7487_v51  ;;  %v7555_v39 = vld [vmem:[#allocation7 + $0x404] ss:$16 sps:$4 sm:$0xff]   ;;  %v7553_v42 = vld [vmem:[#allocation7 + $0x400] ss:$16 sps:$4 sm:$0xff]  }
  0x88   :  { %4853 = vmatprep.subr.bf16.mxu1 %v7489_v53  ;;  %v7558_v41 = vld [vmem:[#allocation7 + $0x604] ss:$16 sps:$4 sm:$0xff]   ;;  %v7556_v43 = vld [vmem:[#allocation7 + $0x600] ss:$16 sps:$4 sm:$0xff]  }
  0x89   :  { %v7561_v44 = vld [vmem:[#allocation7 + $0x5e4] ss:$16 sps:$4 sm:$0xff]   ;;  %v7559_v46 = vld [vmem:[#allocation7 + $0x5e0] ss:$16 sps:$4 sm:$0xff]  }
  0x8a   :  { %4813 = vmatpush2.bf16.msra.mxu0 %v7491_v54  ;;  %v7564_v45 = vld [vmem:[#allocation7 + $0x7e4] ss:$16 sps:$4 sm:$0xff]   ;;  %v7562_v47 = vld [vmem:[#allocation7 + $0x7e0] ss:$16 sps:$4 sm:$0xff]  }
  0x8b   :  { %4854 = vmatpush2.bf16.msra.mxu1 %v7492_v55  ;;  %4814 = vmatprep.subr.bf16.mxu0 %v7493_v56  ;;  %v7567_v48 = vld [vmem:[#allocation7 + $0x5c4] ss:$16 sps:$4 sm:$0xff]   ;;  %v7565_v51 = vld [vmem:[#allocation7 + $0x5c0] ss:$16 sps:$4 sm:$0xff]  }
  0x8c   :  { %4855 = vmatprep.subr.bf16.mxu1 %v7495_v57  ;;  %v7570_v50 = vld [vmem:[#allocation7 + $0x7c4] ss:$16 sps:$4 sm:$0xff]   ;;  %v7568_v53 = vld [vmem:[#allocation7 + $0x7c0] ss:$16 sps:$4 sm:$0xff]  }
  0x8d   :  { %v7573_v54 = vld [vmem:[#allocation7 + $0x5a4] ss:$16 sps:$4 sm:$0xff]   ;;  %v7571_v56 = vld [vmem:[#allocation7 + $0x5a0] ss:$16 sps:$4 sm:$0xff]  }
  0x8e   :  { %4815 = vmatpush2.bf16.msra.mxu0 %v7497_v58  ;;  %v7576_v55 = vld [vmem:[#allocation7 + $0x7a4] ss:$16 sps:$4 sm:$0xff]   ;;  %v7574_v57 = vld [vmem:[#allocation7 + $0x7a0] ss:$16 sps:$4 sm:$0xff]  }
  0x8f   :  { %4856 = vmatpush2.bf16.msra.mxu1 %v7498_v59  ;;  %4816 = vmatprep.subr.bf16.mxu0 %v7499_v60  ;;  %v7579_v58 = vld [vmem:[#allocation7 + $0x584] ss:$16 sps:$4 sm:$0xff]   ;;  %v7577_v60 = vld [vmem:[#allocation7 + $0x580] ss:$16 sps:$4 sm:$0xff]  }
  0x90   :  { %4857 = vmatprep.subr.bf16.mxu1 %v7501_v61  ;;  %v7582_v59 = vld [vmem:[#allocation7 + $0x784] ss:$16 sps:$4 sm:$0xff]   ;;  %v7580_v61 = vld [vmem:[#allocation7 + $0x780] ss:$16 sps:$4 sm:$0xff]  }
  0x91   :  { %v7589_v4 = vld [vmem:[#allocation7 + $0x540] ss:$16 sps:$4 sm:$0xff]   ;;  %v7630_v38 = vld [vmem:[#allocation7 + $0xa84] ss:$16 sps:$4 sm:$0xff]  }
  0x92   :  { %4817 = vmatpush2.bf16.msra.mxu0 %v7503_v62  ;;  %v7585_v62 = vld [vmem:[#allocation7 + $0x564] ss:$16 sps:$4 sm:$0xff]   ;;  %v7592_v5 = vld [vmem:[#allocation7 + $0x740] ss:$16 sps:$4 sm:$0xff]  }
  0x93   :  { %4858 = vmatpush2.bf16.msra.mxu1 %v7504_v63  ;;  %4818 = vmatprep.subr.bf16.mxu0 %v7505_v0  ;;  %v7588_v63 = vld [vmem:[#allocation7 + $0x764] ss:$16 sps:$4 sm:$0xff]   ;;  %v7583_v0 = vld [vmem:[#allocation7 + $0x560] ss:$16 sps:$4 sm:$0xff]  }
  0x94   :  { %4859 = vmatprep.subr.bf16.mxu1 %v7507_v1  ;;  %v7586_v1 = vld [vmem:[#allocation7 + $0x760] ss:$16 sps:$4 sm:$0xff]  }
  0x95   :  { %v7619_v34 = vld [vmem:[#allocation7 + $0x8a0] ss:$16 sps:$4 sm:$0xff]  }
  0x96   :  { %4819 = vmatpush2.bf16.msra.mxu0 %v7509_v2  ;;  %v7591_v2 = vld [vmem:[#allocation7 + $0x544] ss:$16 sps:$4 sm:$0xff]  }
  0x97   :  { %4860 = vmatpush2.bf16.msra.mxu1 %v7510_v3  ;;  %4870 = vmatprep.subr.bf16.mxu0 %v7513_v6  ;;  %v7594_v3 = vld [vmem:[#allocation7 + $0x744] ss:$16 sps:$4 sm:$0xff]  }
  0x98   :  { %4911 = vmatprep.subr.bf16.mxu1 %v7516_v7  ;;  %v7597_v6 = vld [vmem:[#allocation7 + $0x524] ss:$16 sps:$4 sm:$0xff]  }
  0x99   :  { %4821 = vmatmul.mubr.bf16.vlgmr.msra.gmra.mxu0 %v8944_v8  ;;  %v7600_v7 = vld [vmem:[#allocation7 + $0x724] ss:$16 sps:$4 sm:$0xff]  }
  0x9a   :  { %4862 = vmatmul.mubr.bf16.vlgmr.msra.gmra.mxu1 %v8946_v9  ;;  %4871 = vmatpush1.bf16.msra.mxu0 %v7511_v10  ;;  %v7595_v10 = vld [vmem:[#allocation7 + $0x520] ss:$16 sps:$4 sm:$0xff]  }
  0x9b   :  { %4912 = vmatpush1.bf16.msra.mxu1 %v7514_v11  ;;  %4872 = vmatprep.subr.bf16.mxu0 %v7519_v12  ;;  %v7598_v11 = vld [vmem:[#allocation7 + $0x720] ss:$16 sps:$4 sm:$0xff]   ;;  %v7603_v12 = vld [vmem:[#allocation7 + $0x504] ss:$16 sps:$4 sm:$0xff]  }
  0x9c   :  { %4913 = vmatprep.subr.bf16.mxu1 %v7522_v13  ;;  %4902 = vmatprep.mubr.bf16.mxu0 %v8950_v37  ;;  %v7606_v13 = vld [vmem:[#allocation7 + $0x704] ss:$16 sps:$4 sm:$0xff]  }
  0x9d   :  { %4943 = vmatprep.mubr.bf16.mxu1 %v8952_v40 }
  0x9e   :  { %4873 = vmatpush1.bf16.msra.mxu0 %v7517_v14  ;;  %v7601_v14 = vld [vmem:[#allocation7 + $0x500] ss:$16 sps:$4 sm:$0xff]  }
  0x9f   :  { %4914 = vmatpush1.bf16.msra.mxu1 %v7520_v15  ;;  %4874 = vmatprep.subr.bf16.mxu0 %v7525_v16  ;;  %v7604_v15 = vld [vmem:[#allocation7 + $0x700] ss:$16 sps:$4 sm:$0xff]  }
  0xa0   :  { %4915 = vmatprep.subr.bf16.mxu1 %v7528_v17  ;;  %v136_v16 = vld [vmem:[#allocation4 + $0x20] sm:$0xff]  ;;  %v138_v17 = vld [vmem:[#allocation4 + $0x30] sm:$0xff] }
  0xa2   :  { %4875 = vmatpush1.bf16.msra.mxu0 %v7523_v18  ;;  %v7609_v18 = vld [vmem:[#allocation7 + $0x8e4] ss:$16 sps:$4 sm:$0xff]  }
  0xa3   :  { %4916 = vmatpush1.bf16.msra.mxu1 %v7526_v19  ;;  %4876 = vmatprep.subr.bf16.mxu0 %v7531_v20  ;;  %v7612_v19 = vld [vmem:[#allocation7 + $0xae4] ss:$16 sps:$4 sm:$0xff]   ;;  %v8956_v20 = vpack.c.bf16 %v136_v16, %v136_v16  ;;  %v7679_v16 = vld [vmem:[#allocation7 + $0x960] ss:$16 sps:$4 sm:$0xff]  }
  0xa4   :  { %4917 = vmatprep.subr.bf16.mxu1 %v7534_v21  ;;  %v8958_v21 = vpack.c.bf16 %v138_v17, %v138_v17  ;;  %v7682_v17 = vld [vmem:[#allocation7 + $0xb60] ss:$16 sps:$4 sm:$0xff]  }
  0xa6   :  { %4877 = vmatpush1.bf16.msra.mxu0 %v7529_v22  ;;  %v7607_v22 = vld [vmem:[#allocation7 + $0x8e0] ss:$16 sps:$4 sm:$0xff]  }
  0xa7   :  { %4918 = vmatpush1.bf16.msra.mxu1 %v7532_v23  ;;  %4878 = vmatprep.subr.bf16.mxu0 %v7537_v24  ;;  %v7610_v23 = vld [vmem:[#allocation7 + $0xae0] ss:$16 sps:$4 sm:$0xff]   ;;  %v7615_v24 = vld [vmem:[#allocation7 + $0x8c4] ss:$16 sps:$4 sm:$0xff]  }
  0xa8   :  { %4919 = vmatprep.subr.bf16.mxu1 %v7540_v25  ;;  %v7618_v25 = vld [vmem:[#allocation7 + $0xac4] ss:$16 sps:$4 sm:$0xff]  }
  0xaa   :  { %4879 = vmatpush1.bf16.msra.mxu0 %v7535_v26  ;;  %v141_v26 = vld [vmem:[#allocation4 + $0x48] sm:$0xff] }
  0xab   :  { %4920 = vmatpush1.bf16.msra.mxu1 %v7538_v27  ;;  %4880 = vmatprep.subr.bf16.mxu0 %v7543_v28  ;;  %v7613_v27 = vld [vmem:[#allocation7 + $0x8c0] ss:$16 sps:$4 sm:$0xff]  }
  0xac   :  { %4921 = vmatprep.subr.bf16.mxu1 %v7546_v29  ;;  %v7616_v28 = vld [vmem:[#allocation7 + $0xac0] ss:$16 sps:$4 sm:$0xff]   ;;  %v8962_v29 = vpack.c.bf16 %v141_v26, %v141_v26 }
  0xad   :  { %v7691_v26 = vld [vmem:[#allocation7 + $0x920] ss:$16 sps:$4 sm:$0xff]  }
  0xae   :  { %4881 = vmatpush1.bf16.msra.mxu0 %v7541_v30  ;;  %v143_v30 = vld [vmem:[#allocation4 + $0x58] sm:$0xff] }
  0xaf   :  { %4922 = vmatpush1.bf16.msra.mxu1 %v7544_v31  ;;  %4882 = vmatprep.subr.bf16.mxu0 %v7549_v32  ;;  %v7621_v31 = vld [vmem:[#allocation7 + $0x8a4] ss:$16 sps:$4 sm:$0xff]   ;;  %v8964_v32 = vpack.c.bf16 %v143_v30, %v143_v30 }
  0xb0   :  { %4923 = vmatprep.subr.bf16.mxu1 %v7552_v33  ;;  %v7624_v33 = vld [vmem:[#allocation7 + $0xaa4] ss:$16 sps:$4 sm:$0xff]  }
  0xb1   :  { %v7702_v30 = vld [vmem:[#allocation7 + $0xb04] ss:$16 sps:$4 sm:$0xff]  }
  0xb2   :  { %4883 = vmatpush1.bf16.msra.mxu0 %v7547_v35  ;;  %v7622_v35 = vld [vmem:[#allocation7 + $0xaa0] ss:$16 sps:$4 sm:$0xff]  }
  0xb3   :  { %4924 = vmatpush1.bf16.msra.mxu1 %v7550_v36  ;;  %4884 = vmatprep.subr.bf16.mxu0 %v7555_v39  ;;  %v7627_v36 = vld [vmem:[#allocation7 + $0x884] ss:$16 sps:$4 sm:$0xff]   ;;  %v7625_v39 = vld [vmem:[#allocation7 + $0x880] ss:$16 sps:$4 sm:$0xff]  }
  0xb4   :  { %4925 = vmatprep.subr.bf16.mxu1 %v7558_v41  ;;  %v7628_v41 = vld [vmem:[#allocation7 + $0xa80] ss:$16 sps:$4 sm:$0xff]  }
  0xb6   :  { %4885 = vmatpush1.bf16.msra.mxu0 %v7553_v42  ;;  %v7633_v42 = vld [vmem:[#allocation7 + $0x864] ss:$16 sps:$4 sm:$0xff]  }
  0xb7   :  { %4926 = vmatpush1.bf16.msra.mxu1 %v7556_v43  ;;  %4886 = vmatprep.subr.bf16.mxu0 %v7561_v44  ;;  %v7636_v43 = vld [vmem:[#allocation7 + $0xa64] ss:$16 sps:$4 sm:$0xff]   ;;  %v7631_v44 = vld [vmem:[#allocation7 + $0x860] ss:$16 sps:$4 sm:$0xff]  }
  0xb8   :  { %4927 = vmatprep.subr.bf16.mxu1 %v7564_v45  ;;  %v7634_v45 = vld [vmem:[#allocation7 + $0xa60] ss:$16 sps:$4 sm:$0xff]  }
  0xba   :  { %4887 = vmatpush2.bf16.msra.mxu0 %v7559_v46  ;;  %v7639_v46 = vld [vmem:[#allocation7 + $0x844] ss:$16 sps:$4 sm:$0xff]  }
  0xbb   :  { %4928 = vmatpush2.bf16.msra.mxu1 %v7562_v47  ;;  %4888 = vmatprep.subr.bf16.mxu0 %v7567_v48  ;;  %v7642_v47 = vld [vmem:[#allocation7 + $0xa44] ss:$16 sps:$4 sm:$0xff]   ;;  %v7637_v48 = vld [vmem:[#allocation7 + $0x840] ss:$16 sps:$4 sm:$0xff]  }
  0xbc   :  { %4929 = vmatprep.subr.bf16.mxu1 %v7570_v50  ;;  %v7640_v50 = vld [vmem:[#allocation7 + $0xa40] ss:$16 sps:$4 sm:$0xff]  }
  0xbe   :  { %4889 = vmatpush2.bf16.msra.mxu0 %v7565_v51  ;;  %v7645_v51 = vld [vmem:[#allocation7 + $0x824] ss:$16 sps:$4 sm:$0xff]  }
  0xbf   :  { %4930 = vmatpush2.bf16.msra.mxu1 %v7568_v53  ;;  %4890 = vmatprep.subr.bf16.mxu0 %v7573_v54  ;;  %v7648_v53 = vld [vmem:[#allocation7 + $0xa24] ss:$16 sps:$4 sm:$0xff]   ;;  %v7643_v54 = vld [vmem:[#allocation7 + $0x820] ss:$16 sps:$4 sm:$0xff]  }
  0xc0   :  { %4931 = vmatprep.subr.bf16.mxu1 %v7576_v55  ;;  %v7646_v55 = vld [vmem:[#allocation7 + $0xa20] ss:$16 sps:$4 sm:$0xff]  }
  0xc2   :  { %4891 = vmatpush2.bf16.msra.mxu0 %v7571_v56  ;;  %v7651_v56 = vld [vmem:[#allocation7 + $0x804] ss:$16 sps:$4 sm:$0xff]  }
  0xc3   :  { %4932 = vmatpush2.bf16.msra.mxu1 %v7574_v57  ;;  %4892 = vmatprep.subr.bf16.mxu0 %v7579_v58  ;;  %v7654_v57 = vld [vmem:[#allocation7 + $0xa04] ss:$16 sps:$4 sm:$0xff]   ;;  %v7649_v58 = vld [vmem:[#allocation7 + $0x800] ss:$16 sps:$4 sm:$0xff]  }
  0xc4   :  { %4933 = vmatprep.subr.bf16.mxu1 %v7582_v59  ;;  %v7652_v59 = vld [vmem:[#allocation7 + $0xa00] ss:$16 sps:$4 sm:$0xff]  }
  0xc6   :  { %4893 = vmatpush2.bf16.msra.mxu0 %v7577_v60  ;;  %v7657_v60 = vld [vmem:[#allocation7 + $0x9e4] ss:$16 sps:$4 sm:$0xff]  }
  0xc7   :  { %4934 = vmatpush2.bf16.msra.mxu1 %v7580_v61  ;;  %4894 = vmatprep.subr.bf16.mxu0 %v7585_v62  ;;  %v7660_v61 = vld [vmem:[#allocation7 + $0xbe4] ss:$16 sps:$4 sm:$0xff]   ;;  %v7655_v62 = vld [vmem:[#allocation7 + $0x9e0] ss:$16 sps:$4 sm:$0xff]  }
  0xc8   :  { %4935 = vmatprep.subr.bf16.mxu1 %v7588_v63  ;;  %v7658_v63 = vld [vmem:[#allocation7 + $0xbe0] ss:$16 sps:$4 sm:$0xff]  }
  0xca   :  { %4895 = vmatpush2.bf16.msra.mxu0 %v7583_v0  ;;  %v7663_v0 = vld [vmem:[#allocation7 + $0x9c4] ss:$16 sps:$4 sm:$0xff]  }
  0xcb   :  { %4936 = vmatpush2.bf16.msra.mxu1 %v7586_v1  ;;  %4896 = vmatprep.subr.bf16.mxu0 %v7591_v2  ;;  %v7666_v1 = vld [vmem:[#allocation7 + $0xbc4] ss:$16 sps:$4 sm:$0xff]   ;;  %v7661_v2 = vld [vmem:[#allocation7 + $0x9c0] ss:$16 sps:$4 sm:$0xff]  }
  0xcc   :  { %4937 = vmatprep.subr.bf16.mxu1 %v7594_v3  ;;  %v7664_v3 = vld [vmem:[#allocation7 + $0xbc0] ss:$16 sps:$4 sm:$0xff]  }
  0xce   :  { %4897 = vmatpush2.bf16.msra.mxu0 %v7589_v4  ;;  %v7669_v4 = vld [vmem:[#allocation7 + $0x9a4] ss:$16 sps:$4 sm:$0xff]  }
  0xcf   :  { %4938 = vmatpush2.bf16.msra.mxu1 %v7592_v5  ;;  %4898 = vmatprep.subr.bf16.mxu0 %v7597_v6  ;;  %v7672_v5 = vld [vmem:[#allocation7 + $0xba4] ss:$16 sps:$4 sm:$0xff]   ;;  %v7667_v6 = vld [vmem:[#allocation7 + $0x9a0] ss:$16 sps:$4 sm:$0xff]  }
  0xd0   :  { %4939 = vmatprep.subr.bf16.mxu1 %v7600_v7  ;;  %v7670_v7 = vld [vmem:[#allocation7 + $0xba0] ss:$16 sps:$4 sm:$0xff]  }
  0xd2   :  { %4899 = vmatpush2.bf16.msra.mxu0 %v7595_v10  ;;  %v7675_v10 = vld [vmem:[#allocation7 + $0x984] ss:$16 sps:$4 sm:$0xff]  }
  0xd3   :  { %4940 = vmatpush2.bf16.msra.mxu1 %v7598_v11  ;;  %4900 = vmatprep.subr.bf16.mxu0 %v7603_v12  ;;  %v7678_v11 = vld [vmem:[#allocation7 + $0xb84] ss:$16 sps:$4 sm:$0xff]   ;;  %v7673_v12 = vld [vmem:[#allocation7 + $0x980] ss:$16 sps:$4 sm:$0xff]  }
  0xd4   :  { %4941 = vmatprep.subr.bf16.mxu1 %v7606_v13  ;;  %v7676_v13 = vld [vmem:[#allocation7 + $0xb80] ss:$16 sps:$4 sm:$0xff]  }
  0xd6   :  { %4901 = vmatpush2.bf16.msra.mxu0 %v7601_v14  ;;  %v7681_v14 = vld [vmem:[#allocation7 + $0x964] ss:$16 sps:$4 sm:$0xff]  }
  0xd7   :  { %4942 = vmatpush2.bf16.msra.mxu1 %v7604_v15  ;;  %4952 = vmatprep.subr.bf16.mxu0 %v7609_v18  ;;  %v7684_v15 = vld [vmem:[#allocation7 + $0xb64] ss:$16 sps:$4 sm:$0xff]  }
  0xd8   :  { %4993 = vmatprep.subr.bf16.mxu1 %v7612_v19  ;;  %v7687_v18 = vld [vmem:[#allocation7 + $0x944] ss:$16 sps:$4 sm:$0xff]  }
  0xd9   :  { %4903 = vmatmul.mubr.bf16.vlgmr.msra.gmra.mxu0 %v8956_v20  ;;  %v7690_v19 = vld [vmem:[#allocation7 + $0xb44] ss:$16 sps:$4 sm:$0xff]  }
  0xda   :  { %4944 = vmatmul.mubr.bf16.vlgmr.msra.gmra.mxu1 %v8958_v21  ;;  %4953 = vmatpush1.bf16.msra.mxu0 %v7607_v22  ;;  %v7685_v22 = vld [vmem:[#allocation7 + $0x940] ss:$16 sps:$4 sm:$0xff]  }
  0xdb   :  { %4994 = vmatpush1.bf16.msra.mxu1 %v7610_v23  ;;  %4954 = vmatprep.subr.bf16.mxu0 %v7615_v24  ;;  %v7688_v23 = vld [vmem:[#allocation7 + $0xb40] ss:$16 sps:$4 sm:$0xff]   ;;  %v7693_v24 = vld [vmem:[#allocation7 + $0x924] ss:$16 sps:$4 sm:$0xff]  }
  0xdc   :  { %4995 = vmatprep.subr.bf16.mxu1 %v7618_v25  ;;  %4984 = vmatprep.mubr.bf16.mxu0 %v8962_v29  ;;  %v7696_v25 = vld [vmem:[#allocation7 + $0xb24] ss:$16 sps:$4 sm:$0xff]  }
  0xdd   :  { %5025 = vmatprep.mubr.bf16.mxu1 %v8964_v32 }
  0xde   :  { %4955 = vmatpush1.bf16.msra.mxu0 %v7613_v27  ;;  %v7694_v27 = vld [vmem:[#allocation7 + $0xb20] ss:$16 sps:$4 sm:$0xff]  }
  0xdf   :  { %4996 = vmatpush1.bf16.msra.mxu1 %v7616_v28  ;;  %4956 = vmatprep.subr.bf16.mxu0 %v7621_v31  ;;  %v7699_v28 = vld [vmem:[#allocation7 + $0x904] ss:$16 sps:$4 sm:$0xff]   ;;  %v7697_v31 = vld [vmem:[#allocation7 + $0x900] ss:$16 sps:$4 sm:$0xff]  }
  0xe0   :  { %4997 = vmatprep.subr.bf16.mxu1 %v7624_v33  ;;  %v7700_v33 = vld [vmem:[#allocation7 + $0xb00] ss:$16 sps:$4 sm:$0xff]  }
  0xe2   :  { %4957 = vmatpush1.bf16.msra.mxu0 %v7619_v34  ;;  %v140_v34 = vld [vmem:[#allocation4 + $0x40] sm:$0xff] }
  0xe3   :  { %4998 = vmatpush1.bf16.msra.mxu1 %v7622_v35  ;;  %4958 = vmatprep.subr.bf16.mxu0 %v7627_v36  ;;  %v142_v35 = vld [vmem:[#allocation4 + $0x50] sm:$0xff] }
  0xe4   :  { %4999 = vmatprep.subr.bf16.mxu1 %v7630_v38  ;;  %v7705_v36 = vld [vmem:[#allocation7 + $0xce4] ss:$16 sps:$4 sm:$0xff]  }
  0xe5   :  { %v7708_v38 = vld [vmem:[#allocation7 + $0xee4] ss:$16 sps:$4 sm:$0xff]  }
  0xe6   :  { %4959 = vmatpush1.bf16.msra.mxu0 %v7625_v39  ;;  %v7703_v39 = vld [vmem:[#allocation7 + $0xce0] ss:$16 sps:$4 sm:$0xff]  }
  0xe7   :  { %5000 = vmatpush1.bf16.msra.mxu1 %v7628_v41  ;;  %4960 = vmatprep.subr.bf16.mxu0 %v7633_v42  ;;  %v7706_v41 = vld [vmem:[#allocation7 + $0xee0] ss:$16 sps:$4 sm:$0xff]   ;;  %v8968_v42 = vpack.c.bf16 %v140_v34, %v140_v34 }
  0xe8   :  { %5001 = vmatprep.subr.bf16.mxu1 %v7636_v43  ;;  %v8970_v43 = vpack.c.bf16 %v142_v35, %v142_v35  ;;  %v7769_v34 = vld [vmem:[#allocation7 + $0xd80] ss:$16 sps:$4 sm:$0xff]  }
  0xe9   :  { %v7772_v35 = vld [vmem:[#allocation7 + $0xf80] ss:$16 sps:$4 sm:$0xff]  }
  0xea   :  { %4961 = vmatpush1.bf16.msra.mxu0 %v7631_v44  ;;  %v145_v44 = vld [vmem:[#allocation4 + $0x68] sm:$0xff] }
  0xeb   :  { %5002 = vmatpush1.bf16.msra.mxu1 %v7634_v45  ;;  %4962 = vmatprep.subr.bf16.mxu0 %v7639_v46  ;;  %v147_v45 = vld [vmem:[#allocation4 + $0x78] sm:$0xff]  ;;  %v7711_v46 = vld [vmem:[#allocation7 + $0xcc4] ss:$16 sps:$4 sm:$0xff]  }
  0xec   :  { %5003 = vmatprep.subr.bf16.mxu1 %v7642_v47  ;;  %v7714_v47 = vld [vmem:[#allocation7 + $0xec4] ss:$16 sps:$4 sm:$0xff]  }
  0xee   :  { %4963 = vmatpush1.bf16.msra.mxu0 %v7637_v48  ;;  %v8972_v48 = vpack.c.bf16 %v145_v44, %v145_v44  ;;  %v7783_v44 = vld [vmem:[#allocation7 + $0xd44] ss:$16 sps:$4 sm:$0xff]  }
  0xef   :  { %5004 = vmatpush1.bf16.msra.mxu1 %v7640_v50  ;;  %4964 = vmatprep.subr.bf16.mxu0 %v7645_v51  ;;  %v8974_v50 = vpack.c.bf16 %v147_v45, %v147_v45  ;;  %v7709_v51 = vld [vmem:[#allocation7 + $0xcc0] ss:$16 sps:$4 sm:$0xff]   ;;  %v7786_v45 = vld [vmem:[#allocation7 + $0xf44] ss:$16 sps:$4 sm:$0xff]  }
  0xf0   :  { %5005 = vmatprep.subr.bf16.mxu1 %v7648_v53  ;;  %v7712_v53 = vld [vmem:[#allocation7 + $0xec0] ss:$16 sps:$4 sm:$0xff]  }
  0xf2   :  { %4965 = vmatpush1.bf16.msra.mxu0 %v7643_v54  ;;  %v7717_v54 = vld [vmem:[#allocation7 + $0xca4] ss:$16 sps:$4 sm:$0xff]  }
  0xf3   :  { %5006 = vmatpush1.bf16.msra.mxu1 %v7646_v55  ;;  %4966 = vmatprep.subr.bf16.mxu0 %v7651_v56  ;;  %v7720_v55 = vld [vmem:[#allocation7 + $0xea4] ss:$16 sps:$4 sm:$0xff]   ;;  %v7715_v56 = vld [vmem:[#allocation7 + $0xca0] ss:$16 sps:$4 sm:$0xff]  }
  0xf4   :  { %5007 = vmatprep.subr.bf16.mxu1 %v7654_v57  ;;  %v7718_v57 = vld [vmem:[#allocation7 + $0xea0] ss:$16 sps:$4 sm:$0xff]  }
  0xf6   :  { %4967 = vmatpush1.bf16.msra.mxu0 %v7649_v58  ;;  %v7723_v58 = vld [vmem:[#allocation7 + $0xc84] ss:$16 sps:$4 sm:$0xff]  }
  0xf7   :  { %5008 = vmatpush1.bf16.msra.mxu1 %v7652_v59  ;;  %4968 = vmatprep.subr.bf16.mxu0 %v7657_v60  ;;  %v7726_v59 = vld [vmem:[#allocation7 + $0xe84] ss:$16 sps:$4 sm:$0xff]   ;;  %v7721_v60 = vld [vmem:[#allocation7 + $0xc80] ss:$16 sps:$4 sm:$0xff]  }
  0xf8   :  { %5009 = vmatprep.subr.bf16.mxu1 %v7660_v61  ;;  %v7724_v61 = vld [vmem:[#allocation7 + $0xe80] ss:$16 sps:$4 sm:$0xff]  }
  0xfa   :  { %4969 = vmatpush2.bf16.msra.mxu0 %v7655_v62  ;;  %v7729_v62 = vld [vmem:[#allocation7 + $0xc64] ss:$16 sps:$4 sm:$0xff]  }
  0xfb   :  { %5010 = vmatpush2.bf16.msra.mxu1 %v7658_v63  ;;  %4970 = vmatprep.subr.bf16.mxu0 %v7663_v0  ;;  %v7732_v63 = vld [vmem:[#allocation7 + $0xe64] ss:$16 sps:$4 sm:$0xff]   ;;  %v7727_v0 = vld [vmem:[#allocation7 + $0xc60] ss:$16 sps:$4 sm:$0xff]  }
  0xfc   :  { %5011 = vmatprep.subr.bf16.mxu1 %v7666_v1  ;;  %v7730_v1 = vld [vmem:[#allocation7 + $0xe60] ss:$16 sps:$4 sm:$0xff]  }
  0xfe   :  { %4971 = vmatpush2.bf16.msra.mxu0 %v7661_v2  ;;  %v7735_v2 = vld [vmem:[#allocation7 + $0xc44] ss:$16 sps:$4 sm:$0xff]  }
  0xff   :  { %5012 = vmatpush2.bf16.msra.mxu1 %v7664_v3  ;;  %4972 = vmatprep.subr.bf16.mxu0 %v7669_v4  ;;  %v7738_v3 = vld [vmem:[#allocation7 + $0xe44] ss:$16 sps:$4 sm:$0xff]   ;;  %v7733_v4 = vld [vmem:[#allocation7 + $0xc40] ss:$16 sps:$4 sm:$0xff]  }
 0x100   :  { %5013 = vmatprep.subr.bf16.mxu1 %v7672_v5  ;;  %v7736_v5 = vld [vmem:[#allocation7 + $0xe40] ss:$16 sps:$4 sm:$0xff]  }
 0x102   :  { %4973 = vmatpush2.bf16.msra.mxu0 %v7667_v6  ;;  %v7741_v6 = vld [vmem:[#allocation7 + $0xc24] ss:$16 sps:$4 sm:$0xff]  }
 0x103   :  { %5014 = vmatpush2.bf16.msra.mxu1 %v7670_v7  ;;  %4974 = vmatprep.subr.bf16.mxu0 %v7675_v10  ;;  %v7744_v7 = vld [vmem:[#allocation7 + $0xe24] ss:$16 sps:$4 sm:$0xff]   ;;  %v7739_v10 = vld [vmem:[#allocation7 + $0xc20] ss:$16 sps:$4 sm:$0xff]  }
 0x104   :  { %5015 = vmatprep.subr.bf16.mxu1 %v7678_v11  ;;  %v7742_v11 = vld [vmem:[#allocation7 + $0xe20] ss:$16 sps:$4 sm:$0xff]  }
 0x106   :  { %4975 = vmatpush2.bf16.msra.mxu0 %v7673_v12  ;;  %v7747_v12 = vld [vmem:[#allocation7 + $0xc04] ss:$16 sps:$4 sm:$0xff]  }
 0x107   :  { %5016 = vmatpush2.bf16.msra.mxu1 %v7676_v13  ;;  %4976 = vmatprep.subr.bf16.mxu0 %v7681_v14  ;;  %v7750_v13 = vld [vmem:[#allocation7 + $0xe04] ss:$16 sps:$4 sm:$0xff]   ;;  %v7745_v14 = vld [vmem:[#allocation7 + $0xc00] ss:$16 sps:$4 sm:$0xff]  }
 0x108   :  { %5017 = vmatprep.subr.bf16.mxu1 %v7684_v15  ;;  %v7748_v15 = vld [vmem:[#allocation7 + $0xe00] ss:$16 sps:$4 sm:$0xff]  }
 0x10a   :  { %4977 = vmatpush2.bf16.msra.mxu0 %v7679_v16  ;;  %v7753_v16 = vld [vmem:[#allocation7 + $0xde4] ss:$16 sps:$4 sm:$0xff]  }
 0x10b   :  { %5018 = vmatpush2.bf16.msra.mxu1 %v7682_v17  ;;  %4978 = vmatprep.subr.bf16.mxu0 %v7687_v18  ;;  %v7756_v17 = vld [vmem:[#allocation7 + $0xfe4] ss:$16 sps:$4 sm:$0xff]   ;;  %v7751_v18 = vld [vmem:[#allocation7 + $0xde0] ss:$16 sps:$4 sm:$0xff]  }
 0x10c   :  { %5019 = vmatprep.subr.bf16.mxu1 %v7690_v19  ;;  %v7754_v19 = vld [vmem:[#allocation7 + $0xfe0] ss:$16 sps:$4 sm:$0xff]  }
 0x10e   :  { %4979 = vmatpush2.bf16.msra.mxu0 %v7685_v22  ;;  %v7759_v22 = vld [vmem:[#allocation7 + $0xdc4] ss:$16 sps:$4 sm:$0xff]  }
 0x10f   :  { %5020 = vmatpush2.bf16.msra.mxu1 %v7688_v23  ;;  %4980 = vmatprep.subr.bf16.mxu0 %v7693_v24  ;;  %v7762_v23 = vld [vmem:[#allocation7 + $0xfc4] ss:$16 sps:$4 sm:$0xff]   ;;  %v7757_v24 = vld [vmem:[#allocation7 + $0xdc0] ss:$16 sps:$4 sm:$0xff]  }
 0x110   :  { %5021 = vmatprep.subr.bf16.mxu1 %v7696_v25  ;;  %v7760_v25 = vld [vmem:[#allocation7 + $0xfc0] ss:$16 sps:$4 sm:$0xff]  }
 0x112   :  { %4981 = vmatpush2.bf16.msra.mxu0 %v7691_v26  ;;  %v7765_v26 = vld [vmem:[#allocation7 + $0xda4] ss:$16 sps:$4 sm:$0xff]  }
 0x113   :  { %5022 = vmatpush2.bf16.msra.mxu1 %v7694_v27  ;;  %4982 = vmatprep.subr.bf16.mxu0 %v7699_v28  ;;  %v7768_v27 = vld [vmem:[#allocation7 + $0xfa4] ss:$16 sps:$4 sm:$0xff]   ;;  %v7763_v28 = vld [vmem:[#allocation7 + $0xda0] ss:$16 sps:$4 sm:$0xff]  }
 0x114   :  { %5023 = vmatprep.subr.bf16.mxu1 %v7702_v30  ;;  %v7766_v30 = vld [vmem:[#allocation7 + $0xfa0] ss:$16 sps:$4 sm:$0xff]  }
 0x116   :  { %4983 = vmatpush2.bf16.msra.mxu0 %v7697_v31  ;;  %v7771_v31 = vld [vmem:[#allocation7 + $0xd84] ss:$16 sps:$4 sm:$0xff]  }
 0x117   :  { %5024 = vmatpush2.bf16.msra.mxu1 %v7700_v33  ;;  %5034 = vmatprep.subr.bf16.mxu0 %v7705_v36  ;;  %v7774_v33 = vld [vmem:[#allocation7 + $0xf84] ss:$16 sps:$4 sm:$0xff]  }
 0x118   :  { %5075 = vmatprep.subr.bf16.mxu1 %v7708_v38  ;;  %v7777_v36 = vld [vmem:[#allocation7 + $0xd64] ss:$16 sps:$4 sm:$0xff]  }
 0x119   :  { %4985 = vmatmul.mubr.bf16.vlgmr.msra.gmra.mxu0 %v8968_v42  ;;  %v7780_v38 = vld [vmem:[#allocation7 + $0xf64] ss:$16 sps:$4 sm:$0xff]  }
 0x11a   :  { %5026 = vmatmul.mubr.bf16.vlgmr.msra.gmra.mxu1 %v8970_v43  ;;  %5035 = vmatpush1.bf16.msra.mxu0 %v7703_v39  ;;  %v7775_v39 = vld [vmem:[#allocation7 + $0xd60] ss:$16 sps:$4 sm:$0xff]  }
 0x11b   :  { %5076 = vmatpush1.bf16.msra.mxu1 %v7706_v41  ;;  %5036 = vmatprep.subr.bf16.mxu0 %v7711_v46  ;;  %v7778_v41 = vld [vmem:[#allocation7 + $0xf60] ss:$16 sps:$4 sm:$0xff]  }
 0x11c   :  { %5077 = vmatprep.subr.bf16.mxu1 %v7714_v47  ;;  %5066 = vmatprep.mubr.bf16.mxu0 %v8972_v48  ;;  %v7781_v46 = vld [vmem:[#allocation7 + $0xd40] ss:$16 sps:$4 sm:$0xff]  }
 0x11d   :  { %5107 = vmatprep.mubr.bf16.mxu1 %v8974_v50  ;;  %v7784_v47 = vld [vmem:[#allocation7 + $0xf40] ss:$16 sps:$4 sm:$0xff]  }
 0x11e   :  { %5037 = vmatpush1.bf16.msra.mxu0 %v7709_v51  ;;  %v7789_v51 = vld [vmem:[#allocation7 + $0xd24] ss:$16 sps:$4 sm:$0xff]  }
 0x11f   :  { %5078 = vmatpush1.bf16.msra.mxu1 %v7712_v53  ;;  %5038 = vmatprep.subr.bf16.mxu0 %v7717_v54  ;;  %v7792_v53 = vld [vmem:[#allocation7 + $0xf24] ss:$16 sps:$4 sm:$0xff]   ;;  %v7787_v54 = vld [vmem:[#allocation7 + $0xd20] ss:$16 sps:$4 sm:$0xff]  }
 0x120   :  { %5079 = vmatprep.subr.bf16.mxu1 %v7720_v55  ;;  %v7790_v55 = vld [vmem:[#allocation7 + $0xf20] ss:$16 sps:$4 sm:$0xff]  }
 0x122   :  { %5039 = vmatpush1.bf16.msra.mxu0 %v7715_v56  ;;  %v7795_v56 = vld [vmem:[#allocation7 + $0xd04] ss:$16 sps:$4 sm:$0xff]  }
 0x123   :  { %5080 = vmatpush1.bf16.msra.mxu1 %v7718_v57  ;;  %5040 = vmatprep.subr.bf16.mxu0 %v7723_v58  ;;  %v7798_v57 = vld [vmem:[#allocation7 + $0xf04] ss:$16 sps:$4 sm:$0xff]   ;;  %v7793_v58 = vld [vmem:[#allocation7 + $0xd00] ss:$16 sps:$4 sm:$0xff]  }
 0x124   :  { %5081 = vmatprep.subr.bf16.mxu1 %v7726_v59  ;;  %v7796_v59 = vld [vmem:[#allocation7 + $0xf00] ss:$16 sps:$4 sm:$0xff]  }
 0x126   :  { %5041 = vmatpush1.bf16.msra.mxu0 %v7721_v60  ;;  %v144_v60 = vld [vmem:[#allocation4 + $0x60] sm:$0xff] }
 0x127   :  { %5082 = vmatpush1.bf16.msra.mxu1 %v7724_v61  ;;  %5042 = vmatprep.subr.bf16.mxu0 %v7729_v62  ;;  %v146_v61 = vld [vmem:[#allocation4 + $0x70] sm:$0xff] }
 0x128   :  { %5083 = vmatprep.subr.bf16.mxu1 %v7732_v63  ;;  %v7801_v62 = vld [vmem:[#allocation7 + $0x10e4] ss:$16 sps:$4 sm:$0xff]  }
 0x129   :  { %v7804_v63 = vld [vmem:[#allocation7 + $0x12e4] ss:$16 sps:$4 sm:$0xff]  }
 0x12a   :  { %5043 = vmatpush1.bf16.msra.mxu0 %v7727_v0  ;;  %v7799_v0 = vld [vmem:[#allocation7 + $0x10e0] ss:$16 sps:$4 sm:$0xff]  }
 0x12b   :  { %5084 = vmatpush1.bf16.msra.mxu1 %v7730_v1  ;;  %5044 = vmatprep.subr.bf16.mxu0 %v7735_v2  ;;  %v7802_v1 = vld [vmem:[#allocation7 + $0x12e0] ss:$16 sps:$4 sm:$0xff]   ;;  %v8980_v2 = vpack.c.bf16 %v144_v60, %v144_v60  ;;  %v7849_v60 = vld [vmem:[#allocation7 + $0x11e4] ss:$16 sps:$4 sm:$0xff]  }
 0x12c   :  { %5085 = vmatprep.subr.bf16.mxu1 %v7738_v3  ;;  %v8982_v3 = vpack.c.bf16 %v146_v61, %v146_v61  ;;  %v7852_v61 = vld [vmem:[#allocation7 + $0x13e4] ss:$16 sps:$4 sm:$0xff]  }
 0x12e   :  { %5045 = vmatpush1.bf16.msra.mxu0 %v7733_v4  ;;  %v149_v4 = vld [vmem:[#allocation4 + $0x88] sm:$0xff] }
 0x12f   :  { %5086 = vmatpush1.bf16.msra.mxu1 %v7736_v5  ;;  %5046 = vmatprep.subr.bf16.mxu0 %v7741_v6  ;;  %v151_v5 = vld [vmem:[#allocation4 + $0x98] sm:$0xff]  ;;  %v7807_v6 = vld [vmem:[#allocation7 + $0x10c4] ss:$16 sps:$4 sm:$0xff]  }
 0x130   :  { %5087 = vmatprep.subr.bf16.mxu1 %v7744_v7  ;;  %v7810_v7 = vld [vmem:[#allocation7 + $0x12c4] ss:$16 sps:$4 sm:$0xff]  }
 0x132   :  { %5047 = vmatpush1.bf16.msra.mxu0 %v7739_v10  ;;  %v8984_v10 = vpack.c.bf16 %v149_v4, %v149_v4  ;;  %v7853_v4 = vld [vmem:[#allocation7 + $0x11c0] ss:$16 sps:$4 sm:$0xff]  }
 0x133   :  { %5088 = vmatpush1.bf16.msra.mxu1 %v7742_v11  ;;  %5048 = vmatprep.subr.bf16.mxu0 %v7747_v12  ;;  %v8986_v11 = vpack.c.bf16 %v151_v5, %v151_v5  ;;  %v7856_v5 = vld [vmem:[#allocation7 + $0x13c0] ss:$16 sps:$4 sm:$0xff]  }
 0x134   :  { %5089 = vmatprep.subr.bf16.mxu1 %v7750_v13 }
 0x136   :  { %5049 = vmatpush1.bf16.msra.mxu0 %v7745_v14  ;;  %v7805_v14 = vld [vmem:[#allocation7 + $0x10c0] ss:$16 sps:$4 sm:$0xff]  }
 0x137   :  { %5090 = vmatpush1.bf16.msra.mxu1 %v7748_v15  ;;  %5050 = vmatprep.subr.bf16.mxu0 %v7753_v16  ;;  %v7808_v15 = vld [vmem:[#allocation7 + $0x12c0] ss:$16 sps:$4 sm:$0xff]  }
 0x138   :  { %5091 = vmatprep.subr.bf16.mxu1 %v7756_v17  ;;  %v7813_v17 = vld [vmem:[#allocation7 + $0x10a4] ss:$16 sps:$4 sm:$0xff]  }
 0x13a   :  { %5051 = vmatpush2.bf16.msra.mxu0 %v7751_v18 }
 0x13b   :  { %5092 = vmatpush2.bf16.msra.mxu1 %v7754_v19  ;;  %5052 = vmatprep.subr.bf16.mxu0 %v7759_v22  ;;  %v7816_v22 = vld [vmem:[#allocation7 + $0x12a4] ss:$16 sps:$4 sm:$0xff]  }
 0x13c   :  { %5093 = vmatprep.subr.bf16.mxu1 %v7762_v23 }
 0x13e   :  { %5053 = vmatpush2.bf16.msra.mxu0 %v7757_v24 }
 0x13f   :  { %5094 = vmatpush2.bf16.msra.mxu1 %v7760_v25  ;;  %5054 = vmatprep.subr.bf16.mxu0 %v7765_v26  ;;  %v7811_v26 = vld [vmem:[#allocation7 + $0x10a0] ss:$16 sps:$4 sm:$0xff]  }
 0x140   :  { %5095 = vmatprep.subr.bf16.mxu1 %v7768_v27  ;;  %v7814_v27 = vld [vmem:[#allocation7 + $0x12a0] ss:$16 sps:$4 sm:$0xff]  }
 0x142   :  { %5055 = vmatpush2.bf16.msra.mxu0 %v7763_v28  ;;  %v7819_v28 = vld [vmem:[#allocation7 + $0x1084] ss:$16 sps:$4 sm:$0xff]  }
 0x143   :  { %5096 = vmatpush2.bf16.msra.mxu1 %v7766_v30  ;;  %5056 = vmatprep.subr.bf16.mxu0 %v7771_v31 }
 0x144   :  { %5097 = vmatprep.subr.bf16.mxu1 %v7774_v33  ;;  %v7822_v33 = vld [vmem:[#allocation7 + $0x1284] ss:$16 sps:$4 sm:$0xff]  }
 0x146   :  { %5057 = vmatpush2.bf16.msra.mxu0 %v7769_v34  ;;  %v7817_v34 = vld [vmem:[#allocation7 + $0x1080] ss:$16 sps:$4 sm:$0xff]  }
 0x147   :  { %5098 = vmatpush2.bf16.msra.mxu1 %v7772_v35  ;;  %5058 = vmatprep.subr.bf16.mxu0 %v7777_v36  ;;  %v7820_v35 = vld [vmem:[#allocation7 + $0x1280] ss:$16 sps:$4 sm:$0xff]   ;;  %v7825_v36 = vld [vmem:[#allocation7 + $0x1064] ss:$16 sps:$4 sm:$0xff]  }
 0x148   :  { %5099 = vmatprep.subr.bf16.mxu1 %v7780_v38  ;;  %v7828_v38 = vld [vmem:[#allocation7 + $0x1264] ss:$16 sps:$4 sm:$0xff]  }
 0x14a   :  { %5059 = vmatpush2.bf16.msra.mxu0 %v7775_v39  ;;  %v7823_v39 = vld [vmem:[#allocation7 + $0x1060] ss:$16 sps:$4 sm:$0xff]  }
 0x14b   :  { %5100 = vmatpush2.bf16.msra.mxu1 %v7778_v41  ;;  %5060 = vmatprep.subr.bf16.mxu0 %v7783_v44  ;;  %v7826_v41 = vld [vmem:[#allocation7 + $0x1260] ss:$16 sps:$4 sm:$0xff]   ;;  %v7831_v44 = vld [vmem:[#allocation7 + $0x1044] ss:$16 sps:$4 sm:$0xff]  }
 0x14c   :  { %5101 = vmatprep.subr.bf16.mxu1 %v7786_v45  ;;  %v7834_v45 = vld [vmem:[#allocation7 + $0x1244] ss:$16 sps:$4 sm:$0xff]  }
 0x14e   :  { %5061 = vmatpush2.bf16.msra.mxu0 %v7781_v46  ;;  %v7829_v46 = vld [vmem:[#allocation7 + $0x1040] ss:$16 sps:$4 sm:$0xff]  }
 0x14f   :  { %5102 = vmatpush2.bf16.msra.mxu1 %v7784_v47  ;;  %5062 = vmatprep.subr.bf16.mxu0 %v7789_v51  ;;  %v7832_v47 = vld [vmem:[#allocation7 + $0x1240] ss:$16 sps:$4 sm:$0xff]   ;;  %v7837_v51 = vld [vmem:[#allocation7 + $0x1024] ss:$16 sps:$4 sm:$0xff]  }
 0x150   :  { %5103 = vmatprep.subr.bf16.mxu1 %v7792_v53  ;;  %v7840_v53 = vld [vmem:[#allocation7 + $0x1224] ss:$16 sps:$4 sm:$0xff]  }
 0x152   :  { %5063 = vmatpush2.bf16.msra.mxu0 %v7787_v54  ;;  %v7835_v54 = vld [vmem:[#allocation7 + $0x1020] ss:$16 sps:$4 sm:$0xff]  }
 0x153   :  { %5104 = vmatpush2.bf16.msra.mxu1 %v7790_v55  ;;  %5064 = vmatprep.subr.bf16.mxu0 %v7795_v56  ;;  %v7838_v55 = vld [vmem:[#allocation7 + $0x1220] ss:$16 sps:$4 sm:$0xff]   ;;  %v7843_v56 = vld [vmem:[#allocation7 + $0x1004] ss:$16 sps:$4 sm:$0xff]  }
 0x154   :  { %5105 = vmatprep.subr.bf16.mxu1 %v7798_v57  ;;  %v7846_v57 = vld [vmem:[#allocation7 + $0x1204] ss:$16 sps:$4 sm:$0xff]  }
 0x156   :  { %5065 = vmatpush2.bf16.msra.mxu0 %v7793_v58  ;;  %v7841_v58 = vld [vmem:[#allocation7 + $0x1000] ss:$16 sps:$4 sm:$0xff]  }
 0x157   :  { %5106 = vmatpush2.bf16.msra.mxu1 %v7796_v59  ;;  %5116 = vmatprep.subr.bf16.mxu0 %v7801_v62  ;;  %v7844_v59 = vld [vmem:[#allocation7 + $0x1200] ss:$16 sps:$4 sm:$0xff]  }
 0x158   :  { %5157 = vmatprep.subr.bf16.mxu1 %v7804_v63  ;;  %v7847_v62 = vld [vmem:[#allocation7 + $0x11e0] ss:$16 sps:$4 sm:$0xff]  }
 0x159   :  { %v4822_v12 = vpop.f32.mrf.mxu0  ;;  %5067 = vmatmul.mubr.bf16.vlgmr.msra.gmra.mxu0 %v8980_v2  ;;  %v7850_v63 = vld [vmem:[#allocation7 + $0x13e0] ss:$16 sps:$4 sm:$0xff]  }
 0x15a   :  { %v4863_v13 = vpop.f32.mrf.mxu1  ;;  %5108 = vmatmul.mubr.bf16.vlgmr.msra.gmra.mxu1 %v8982_v3  ;;  %5117 = vmatpush1.bf16.msra.mxu0 %v7799_v0  ;;  %v7855_v0 = vld [vmem:[#allocation7 + $0x11c4] ss:$16 sps:$4 sm:$0xff]  }
 0x15b   :  { %v8990_v16 = vadd.f32 %v4863_v13, %v4822_v12  ;;  %5158 = vmatpush1.bf16.msra.mxu1 %v7802_v1  ;;  %v4824_v18 = vpop.f32.mrf.mxu0  ;;  %5118 = vmatprep.subr.bf16.mxu0 %v7807_v6  ;;  %v7858_v1 = vld [vmem:[#allocation7 + $0x13c4] ss:$16 sps:$4 sm:$0xff]   ;;  %v7859_v12 = vld [vmem:[#allocation7 + $0x11a0] ss:$16 sps:$4 sm:$0xff]  }
 0x15c   :  { %v4865_v19 = vpop.f32.mrf.mxu1  ;;  %5159 = vmatprep.subr.bf16.mxu1 %v7810_v7  ;;  %5148 = vmatprep.mubr.bf16.mxu0 %v8984_v10  ;;  %v7861_v6 = vld [vmem:[#allocation7 + $0x11a4] ss:$16 sps:$4 sm:$0xff]   ;;  %v7862_v13 = vld [vmem:[#allocation7 + $0x13a0] ss:$16 sps:$4 sm:$0xff]  }
 0x15d   :  { %v8992_v23 = vadd.f32 %v4865_v19, %v4824_v18  ;;  %5189 = vmatprep.mubr.bf16.mxu1 %v8986_v11  ;;  %v4826_v24 = vpop.f32.mrf.mxu0  ;;  %v7864_v7 = vld [vmem:[#allocation7 + $0x13a4] ss:$16 sps:$4 sm:$0xff]   ;;  %v7868_v18 = vld [vmem:[#allocation7 + $0x1380] ss:$16 sps:$4 sm:$0xff]  }
 0x15e   :  { %v4867_v25 = vpop.f32.mrf.mxu1  ;;  %5119 = vmatpush1.bf16.msra.mxu0 %v7805_v14  ;;  %v7867_v14 = vld [vmem:[#allocation7 + $0x1184] ss:$16 sps:$4 sm:$0xff]   ;;  %v7871_v24 = vld [vmem:[#allocation7 + $0x1160] ss:$16 sps:$4 sm:$0xff]  }
 0x15f   :  { %5160 = vmatpush1.bf16.msra.mxu1 %v7808_v15  ;;  %v4827_v30 = vpop.f32.mrf.mxu0  ;;  %5120 = vmatprep.subr.bf16.mxu0 %v7813_v17  ;;  %v7870_v15 = vld [vmem:[#allocation7 + $0x1384] ss:$16 sps:$4 sm:$0xff]   ;;  %v7865_v17 = vld [vmem:[#allocation7 + $0x1180] ss:$16 sps:$4 sm:$0xff]  }
 0x160   :  { %v4868_v31 = vpop.f32.mrf.mxu1  ;;  %5161 = vmatprep.subr.bf16.mxu1 %v7816_v22  ;;  %v7873_v19 = vld [vmem:[#allocation7 + $0x1164] ss:$16 sps:$4 sm:$0xff]   ;;  %v7874_v25 = vld [vmem:[#allocation7 + $0x1360] ss:$16 sps:$4 sm:$0xff]  }
 0x161   :  { %v7876_v22 = vld [vmem:[#allocation7 + $0x1364] ss:$16 sps:$4 sm:$0xff]   ;;  %v7880_v30 = vld [vmem:[#allocation7 + $0x1340] ss:$16 sps:$4 sm:$0xff]  }
 0x162   :  { %5121 = vmatpush1.bf16.msra.mxu0 %v7811_v26  ;;  %v7879_v26 = vld [vmem:[#allocation7 + $0x1144] ss:$16 sps:$4 sm:$0xff]  }
 0x163   :  { %5162 = vmatpush1.bf16.msra.mxu1 %v7814_v27  ;;  %5122 = vmatprep.subr.bf16.mxu0 %v7819_v28  ;;  %v7882_v27 = vld [vmem:[#allocation7 + $0x1344] ss:$16 sps:$4 sm:$0xff]   ;;  %v7877_v28 = vld [vmem:[#allocation7 + $0x1140] ss:$16 sps:$4 sm:$0xff]  }
 0x164   :  { %5163 = vmatprep.subr.bf16.mxu1 %v7822_v33  ;;  %v7885_v31 = vld [vmem:[#allocation7 + $0x1124] ss:$16 sps:$4 sm:$0xff]  }
 0x165   :  { %v7888_v33 = vld [vmem:[#allocation7 + $0x1324] ss:$16 sps:$4 sm:$0xff]  }
 0x166   :  { %5123 = vmatpush1.bf16.msra.mxu0 %v7817_v34  ;;  %v7883_v34 = vld [vmem:[#allocation7 + $0x1120] ss:$16 sps:$4 sm:$0xff]  }
 0x167   :  { %5164 = vmatpush1.bf16.msra.mxu1 %v7820_v35  ;;  %5124 = vmatprep.subr.bf16.mxu0 %v7825_v36  ;;  %v7886_v35 = vld [vmem:[#allocation7 + $0x1320] ss:$16 sps:$4 sm:$0xff]   ;;  %v7891_v36 = vld [vmem:[#allocation7 + $0x1104] ss:$16 sps:$4 sm:$0xff]  }
 0x168   :  { %5165 = vmatprep.subr.bf16.mxu1 %v7828_v38  ;;  %v7894_v38 = vld [vmem:[#allocation7 + $0x1304] ss:$16 sps:$4 sm:$0xff]  }
 0x16a   :  { %5125 = vmatpush1.bf16.msra.mxu0 %v7823_v39  ;;  %v7889_v39 = vld [vmem:[#allocation7 + $0x1100] ss:$16 sps:$4 sm:$0xff]  }
 0x16b   :  { %5166 = vmatpush1.bf16.msra.mxu1 %v7826_v41  ;;  %5126 = vmatprep.subr.bf16.mxu0 %v7831_v44  ;;  %v7892_v41 = vld [vmem:[#allocation7 + $0x1300] ss:$16 sps:$4 sm:$0xff]  }
 0x16c   :  { %5167 = vmatprep.subr.bf16.mxu1 %v7834_v45  ;;  %v148_v44 = vld [vmem:[#allocation4 + $0x80] sm:$0xff]  ;;  %v150_v45 = vld [vmem:[#allocation4 + $0x90] sm:$0xff] }
 0x16e   :  { %5127 = vmatpush1.bf16.msra.mxu0 %v7829_v46  ;;  %v7897_v46 = vld [vmem:[#allocation7 + $0x14e4] ss:$16 sps:$4 sm:$0xff]  }
 0x16f   :  { %5168 = vmatpush1.bf16.msra.mxu1 %v7832_v47  ;;  %5128 = vmatprep.subr.bf16.mxu0 %v7837_v51  ;;  %v7900_v47 = vld [vmem:[#allocation7 + $0x16e4] ss:$16 sps:$4 sm:$0xff]   ;;  %v153_v51 = vld [vmem:[#allocation4 + $0xa8] sm:$0xff] }
 0x170   :  { %5169 = vmatprep.subr.bf16.mxu1 %v7840_v53  ;;  %v155_v53 = vld [vmem:[#allocation4 + $0xb8] sm:$0xff] }
 0x172   :  { %5129 = vmatpush1.bf16.msra.mxu0 %v7835_v54  ;;  %v7895_v54 = vld [vmem:[#allocation7 + $0x14e0] ss:$16 sps:$4 sm:$0xff]  }
 0x173   :  { %5170 = vmatpush1.bf16.msra.mxu1 %v7838_v55  ;;  %5130 = vmatprep.subr.bf16.mxu0 %v7843_v56  ;;  %v7898_v55 = vld [vmem:[#allocation7 + $0x16e0] ss:$16 sps:$4 sm:$0xff]   ;;  %v8996_v56 = vpack.c.bf16 %v148_v44, %v148_v44 }
 0x174   :  { %5171 = vmatprep.subr.bf16.mxu1 %v7846_v57  ;;  %v8998_v57 = vpack.c.bf16 %v150_v45, %v150_v45  ;;  %v7931_v44 = vld [vmem:[#allocation7 + $0x1420] ss:$16 sps:$4 sm:$0xff]  }
 0x175   :  { %v7934_v45 = vld [vmem:[#allocation7 + $0x1620] ss:$16 sps:$4 sm:$0xff]  }
 0x176   :  { %5131 = vmatpush1.bf16.msra.mxu0 %v7841_v58  ;;  %v7903_v58 = vld [vmem:[#allocation7 + $0x14c4] ss:$16 sps:$4 sm:$0xff]  }
 0x177   :  { %5172 = vmatpush1.bf16.msra.mxu1 %v7844_v59  ;;  %5132 = vmatprep.subr.bf16.mxu0 %v7849_v60  ;;  %v7906_v59 = vld [vmem:[#allocation7 + $0x16c4] ss:$16 sps:$4 sm:$0xff]   ;;  %v7901_v60 = vld [vmem:[#allocation7 + $0x14c0] ss:$16 sps:$4 sm:$0xff]  }
 0x178   :  { %5173 = vmatprep.subr.bf16.mxu1 %v7852_v61  ;;  %v7904_v61 = vld [vmem:[#allocation7 + $0x16c0] ss:$16 sps:$4 sm:$0xff]  }
 0x17a   :  { %5133 = vmatpush2.bf16.msra.mxu0 %v7847_v62  ;;  %v9000_v62 = vpack.c.bf16 %v153_v51, %v153_v51  ;;  %v7937_v51 = vld [vmem:[#allocation7 + $0x1400] ss:$16 sps:$4 sm:$0xff]  }
 0x17b   :  { %5174 = vmatpush2.bf16.msra.mxu1 %v7850_v63  ;;  %5134 = vmatprep.subr.bf16.mxu0 %v7855_v0  ;;  %v9002_v63 = vpack.c.bf16 %v155_v53, %v155_v53  ;;  %v7940_v53 = vld [vmem:[#allocation7 + $0x1600] ss:$16 sps:$4 sm:$0xff]  }
 0x17c   :  { %5175 = vmatprep.subr.bf16.mxu1 %v7858_v1 }
 0x17e   :  { %5135 = vmatpush2.bf16.msra.mxu0 %v7853_v4 }
 0x17f   :  { %5176 = vmatpush2.bf16.msra.mxu1 %v7856_v5  ;;  %5136 = vmatprep.subr.bf16.mxu0 %v7861_v6 }
 0x180   :  { %5177 = vmatprep.subr.bf16.mxu1 %v7864_v7  ;;  %v7909_v7 = vld [vmem:[#allocation7 + $0x14a4] ss:$16 sps:$4 sm:$0xff]  }
 0x182   :  { %5137 = vmatpush2.bf16.msra.mxu0 %v7859_v12  ;;  %v7912_v12 = vld [vmem:[#allocation7 + $0x16a4] ss:$16 sps:$4 sm:$0xff]  }
 0x183   :  { %5178 = vmatpush2.bf16.msra.mxu1 %v7862_v13  ;;  %5138 = vmatprep.subr.bf16.mxu0 %v7867_v14 }
 0x184   :  { %5179 = vmatprep.subr.bf16.mxu1 %v7870_v15  ;;  %v7907_v15 = vld [vmem:[#allocation7 + $0x14a0] ss:$16 sps:$4 sm:$0xff]  }
 0x186   :  { %5139 = vmatpush2.bf16.msra.mxu0 %v7865_v17  ;;  %v7910_v17 = vld [vmem:[#allocation7 + $0x16a0] ss:$16 sps:$4 sm:$0xff]  }
 0x187   :  { %5180 = vmatpush2.bf16.msra.mxu1 %v7868_v18  ;;  %5140 = vmatprep.subr.bf16.mxu0 %v7873_v19 }
 0x188   :  { %5181 = vmatprep.subr.bf16.mxu1 %v7876_v22 }
 0x18a   :  { %5141 = vmatpush2.bf16.msra.mxu0 %v7871_v24 }
 0x18b   :  { %5182 = vmatpush2.bf16.msra.mxu1 %v7874_v25  ;;  %5142 = vmatprep.subr.bf16.mxu0 %v7879_v26  ;;  %v7915_v25 = vld [vmem:[#allocation7 + $0x1484] ss:$16 sps:$4 sm:$0xff]  }
 0x18c   :  { %5183 = vmatprep.subr.bf16.mxu1 %v7882_v27  ;;  %v7918_v26 = vld [vmem:[#allocation7 + $0x1684] ss:$16 sps:$4 sm:$0xff]   ;;  %v7916_v27 = vld [vmem:[#allocation7 + $0x1680] ss:$16 sps:$4 sm:$0xff]  }
 0x18e   :  { %5143 = vmatpush2.bf16.msra.mxu0 %v7877_v28  ;;  %v7921_v28 = vld [vmem:[#allocation7 + $0x1464] ss:$16 sps:$4 sm:$0xff]  }
 0x18f   :  { %5184 = vmatpush2.bf16.msra.mxu1 %v7880_v30  ;;  %5144 = vmatprep.subr.bf16.mxu0 %v7885_v31  ;;  %v7924_v30 = vld [vmem:[#allocation7 + $0x1664] ss:$16 sps:$4 sm:$0xff]   ;;  %v7919_v31 = vld [vmem:[#allocation7 + $0x1460] ss:$16 sps:$4 sm:$0xff]  }
 0x190   :  { %5185 = vmatprep.subr.bf16.mxu1 %v7888_v33  ;;  %v7922_v33 = vld [vmem:[#allocation7 + $0x1660] ss:$16 sps:$4 sm:$0xff]  }
 0x192   :  { %5145 = vmatpush2.bf16.msra.mxu0 %v7883_v34  ;;  %v7927_v34 = vld [vmem:[#allocation7 + $0x1444] ss:$16 sps:$4 sm:$0xff]  }
 0x193   :  { %5186 = vmatpush2.bf16.msra.mxu1 %v7886_v35  ;;  %5146 = vmatprep.subr.bf16.mxu0 %v7891_v36  ;;  %v7930_v35 = vld [vmem:[#allocation7 + $0x1644] ss:$16 sps:$4 sm:$0xff]   ;;  %v7925_v36 = vld [vmem:[#allocation7 + $0x1440] ss:$16 sps:$4 sm:$0xff]  }
 0x194   :  { %5187 = vmatprep.subr.bf16.mxu1 %v7894_v38  ;;  %v7928_v38 = vld [vmem:[#allocation7 + $0x1640] ss:$16 sps:$4 sm:$0xff]  }
 0x196   :  { %5147 = vmatpush2.bf16.msra.mxu0 %v7889_v39  ;;  %v7933_v39 = vld [vmem:[#allocation7 + $0x1424] ss:$16 sps:$4 sm:$0xff]  }
 0x197   :  { %5188 = vmatpush2.bf16.msra.mxu1 %v7892_v41  ;;  %5198 = vmatprep.subr.bf16.mxu0 %v7897_v46  ;;  %v7936_v41 = vld [vmem:[#allocation7 + $0x1624] ss:$16 sps:$4 sm:$0xff]  }
 0x198   :  { %5239 = vmatprep.subr.bf16.mxu1 %v7900_v47  ;;  %v7939_v46 = vld [vmem:[#allocation7 + $0x1404] ss:$16 sps:$4 sm:$0xff]  }
 0x199   :  { %v4904_v0 = vpop.f32.mrf.mxu0  ;;  %5149 = vmatmul.mubr.bf16.vlgmr.msra.gmra.mxu0 %v8996_v56  ;;  %v7942_v47 = vld [vmem:[#allocation7 + $0x1604] ss:$16 sps:$4 sm:$0xff]  }
 0x19a   :  { %v4945_v1 = vpop.f32.mrf.mxu1  ;;  %5190 = vmatmul.mubr.bf16.vlgmr.msra.gmra.mxu1 %v8998_v57  ;;  %v4905_v4 = vadd.f32 %v4904_v0, %v8990_v16  ;;  %5199 = vmatpush1.bf16.msra.mxu0 %v7895_v54  ;;  %v7945_v54 = vld [vmem:[#allocation7 + $0x15e4] ss:$16 sps:$4 sm:$0xff]   ;;  %v7949_v0 = vld [vmem:[#allocation7 + $0x15c0] ss:$16 sps:$4 sm:$0xff]  }
 0x19b   :  { %5240 = vmatpush1.bf16.msra.mxu1 %v7898_v55  ;;  %v4906_v5 = vpop.f32.mrf.mxu0  ;;  %5200 = vmatprep.subr.bf16.mxu0 %v7903_v58  ;;  %v7948_v55 = vld [vmem:[#allocation7 + $0x17e4] ss:$16 sps:$4 sm:$0xff]   ;;  %v7943_v58 = vld [vmem:[#allocation7 + $0x15e0] ss:$16 sps:$4 sm:$0xff]  }
 0x19c   :  { %v4947_v6 = vpop.f32.mrf.mxu1  ;;  %5241 = vmatprep.subr.bf16.mxu1 %v7906_v59  ;;  %v9007_v13 = vadd.f32 %v4945_v1, %v4905_v4  ;;  %v4907_v14 = vadd.f32 %v4906_v5, %v8992_v23  ;;  %5230 = vmatprep.mubr.bf16.mxu0 %v9000_v62  ;;  %v7913_v23 = vld [vmem:[#allocation7 + $0x1480] ss:$16 sps:$4 sm:$0xff]   ;;  %v7957_v4 = vld [vmem:[#allocation7 + $0x15a4] ss:$16 sps:$4 sm:$0xff]  }
 0x19d   :  { %5271 = vmatprep.mubr.bf16.mxu1 %v9002_v63  ;;  %v4908_v18 = vpop.f32.mrf.mxu0  ;;  %v7946_v59 = vld [vmem:[#allocation7 + $0x17e0] ss:$16 sps:$4 sm:$0xff]   ;;  %v7960_v5 = vld [vmem:[#allocation7 + $0x17a4] ss:$16 sps:$4 sm:$0xff]  }
 0x19e   :  { %v4949_v16 = vpop.f32.mrf.mxu1  ;;  %v9012_v19 = vadd.f32 %v4947_v6, %v4907_v14  ;;  %5201 = vmatpush1.bf16.msra.mxu0 %v7901_v60  ;;  %v7951_v60 = vld [vmem:[#allocation7 + $0x15c4] ss:$16 sps:$4 sm:$0xff]   ;;  %v7952_v1 = vld [vmem:[#allocation7 + $0x17c0] ss:$16 sps:$4 sm:$0xff]  }
 0x19f   :  { %5242 = vmatpush1.bf16.msra.mxu1 %v7904_v61  ;;  %v4909_v22 = vpop.f32.mrf.mxu0  ;;  %5202 = vmatprep.subr.bf16.mxu0 %v7909_v7  ;;  %v7954_v61 = vld [vmem:[#allocation7 + $0x17c4] ss:$16 sps:$4 sm:$0xff]   ;;  %v7955_v6 = vld [vmem:[#allocation7 + $0x15a0] ss:$16 sps:$4 sm:$0xff]  }
 0x1a0   :  { %v4950_v24 = vpop.f32.mrf.mxu1  ;;  %5243 = vmatprep.subr.bf16.mxu1 %v7912_v12  ;;  %v7958_v7 = vld [vmem:[#allocation7 + $0x17a0] ss:$16 sps:$4 sm:$0xff]   ;;  %v7963_v12 = vld [vmem:[#allocation7 + $0x1584] ss:$16 sps:$4 sm:$0xff]  }
 0x1a1   :  { %v7966_v14 = vld [vmem:[#allocation7 + $0x1784] ss:$16 sps:$4 sm:$0xff]   ;;  %v7967_v22 = vld [vmem:[#allocation7 + $0x1560] ss:$16 sps:$4 sm:$0xff]  }
 0x1a2   :  { %5203 = vmatpush1.bf16.msra.mxu0 %v7907_v15  ;;  %v7961_v15 = vld [vmem:[#allocation7 + $0x1580] ss:$16 sps:$4 sm:$0xff]   ;;  %v7969_v18 = vld [vmem:[#allocation7 + $0x1564] ss:$16 sps:$4 sm:$0xff]  }
 0x1a3   :  { %5244 = vmatpush1.bf16.msra.mxu1 %v7910_v17  ;;  %5204 = vmatprep.subr.bf16.mxu0 %v7915_v25  ;;  %v7964_v17 = vld [vmem:[#allocation7 + $0x1780] ss:$16 sps:$4 sm:$0xff]   ;;  %v7972_v16 = vld [vmem:[#allocation7 + $0x1764] ss:$16 sps:$4 sm:$0xff]  }
 0x1a4   :  { %5245 = vmatprep.subr.bf16.mxu1 %v7918_v26  ;;  %v7970_v24 = vld [vmem:[#allocation7 + $0x1760] ss:$16 sps:$4 sm:$0xff]   ;;  %v7975_v25 = vld [vmem:[#allocation7 + $0x1544] ss:$16 sps:$4 sm:$0xff]  }
 0x1a5   :  { %v7978_v26 = vld [vmem:[#allocation7 + $0x1744] ss:$16 sps:$4 sm:$0xff]  }
 0x1a6   :  { %5205 = vmatpush1.bf16.msra.mxu0 %v7913_v23  ;;  %v7973_v23 = vld [vmem:[#allocation7 + $0x1540] ss:$16 sps:$4 sm:$0xff]  }
 0x1a7   :  { %5246 = vmatpush1.bf16.msra.mxu1 %v7916_v27  ;;  %5206 = vmatprep.subr.bf16.mxu0 %v7921_v28  ;;  %v7976_v27 = vld [vmem:[#allocation7 + $0x1740] ss:$16 sps:$4 sm:$0xff]   ;;  %v7981_v28 = vld [vmem:[#allocation7 + $0x1524] ss:$16 sps:$4 sm:$0xff]  }
 0x1a8   :  { %5247 = vmatprep.subr.bf16.mxu1 %v7924_v30  ;;  %v7984_v30 = vld [vmem:[#allocation7 + $0x1724] ss:$16 sps:$4 sm:$0xff]  }
 0x1aa   :  { %5207 = vmatpush1.bf16.msra.mxu0 %v7919_v31  ;;  %v7979_v31 = vld [vmem:[#allocation7 + $0x1520] ss:$16 sps:$4 sm:$0xff]  }
 0x1ab   :  { %5248 = vmatpush1.bf16.msra.mxu1 %v7922_v33  ;;  %5208 = vmatprep.subr.bf16.mxu0 %v7927_v34  ;;  %v7982_v33 = vld [vmem:[#allocation7 + $0x1720] ss:$16 sps:$4 sm:$0xff]   ;;  %v7987_v34 = vld [vmem:[#allocation7 + $0x1504] ss:$16 sps:$4 sm:$0xff]  }
 0x1ac   :  { %5249 = vmatprep.subr.bf16.mxu1 %v7930_v35  ;;  %v7990_v35 = vld [vmem:[#allocation7 + $0x1704] ss:$16 sps:$4 sm:$0xff]  }
 0x1ae   :  { %5209 = vmatpush1.bf16.msra.mxu0 %v7925_v36  ;;  %v7985_v36 = vld [vmem:[#allocation7 + $0x1500] ss:$16 sps:$4 sm:$0xff]  }
 0x1af   :  { %5250 = vmatpush1.bf16.msra.mxu1 %v7928_v38  ;;  %5210 = vmatprep.subr.bf16.mxu0 %v7933_v39  ;;  %v7988_v38 = vld [vmem:[#allocation7 + $0x1700] ss:$16 sps:$4 sm:$0xff]  }
 0x1b0   :  { %5251 = vmatprep.subr.bf16.mxu1 %v7936_v41  ;;  %v152_v39 = vld [vmem:[#allocation4 + $0xa0] sm:$0xff]  ;;  %v154_v41 = vld [vmem:[#allocation4 + $0xb0] sm:$0xff] }
 0x1b2   :  { %5211 = vmatpush1.bf16.msra.mxu0 %v7931_v44  ;;  %v7993_v44 = vld [vmem:[#allocation7 + $0xec] ss:$16 sps:$4 sm:$0xff]  }
 0x1b3   :  { %5252 = vmatpush1.bf16.msra.mxu1 %v7934_v45  ;;  %5212 = vmatprep.subr.bf16.mxu0 %v7939_v46  ;;  %v7996_v45 = vld [vmem:[#allocation7 + $0x2ec] ss:$16 sps:$4 sm:$0xff]   ;;  %v7991_v46 = vld [vmem:[#allocation7 + $0xe8] ss:$16 sps:$4 sm:$0xff]  }
 0x1b4   :  { %5253 = vmatprep.subr.bf16.mxu1 %v7942_v47  ;;  %v7994_v47 = vld [vmem:[#allocation7 + $0x2e8] ss:$16 sps:$4 sm:$0xff]  }
 0x1b6   :  { %5213 = vmatpush1.bf16.msra.mxu0 %v7937_v51  ;;  %v9014_v51 = vpack.c.bf16 %v152_v39, %v152_v39  ;;  %v8035_v39 = vld [vmem:[#allocation7 + $0xc] ss:$16 sps:$4 sm:$0xff]  }
 0x1b7   :  { %5254 = vmatpush1.bf16.msra.mxu1 %v7940_v53  ;;  %5214 = vmatprep.subr.bf16.mxu0 %v7945_v54  ;;  %v9016_v53 = vpack.c.bf16 %v154_v41, %v154_v41  ;;  %v7999_v54 = vld [vmem:[#allocation7 + $0xcc] ss:$16 sps:$4 sm:$0xff]  }
 0x1b8   :  { %5255 = vmatprep.subr.bf16.mxu1 %v7948_v55  ;;  %v8002_v55 = vld [vmem:[#allocation7 + $0x2cc] ss:$16 sps:$4 sm:$0xff]  }
 0x1b9   :  { %v8038_v41 = vld [vmem:[#allocation7 + $0x20c] ss:$16 sps:$4 sm:$0xff]  }
 0x1ba   :  { %5215 = vmatpush2.bf16.msra.mxu0 %v7943_v58  ;;  %v7997_v58 = vld [vmem:[#allocation7 + $0xc8] ss:$16 sps:$4 sm:$0xff]  }
 0x1bb   :  { %5256 = vmatpush2.bf16.msra.mxu1 %v7946_v59  ;;  %5216 = vmatprep.subr.bf16.mxu0 %v7951_v60  ;;  %v8000_v59 = vld [vmem:[#allocation7 + $0x2c8] ss:$16 sps:$4 sm:$0xff]  }
 0x1bc   :  { %5257 = vmatprep.subr.bf16.mxu1 %v7954_v61 }
 0x1be   :  { %5217 = vmatpush2.bf16.msra.mxu0 %v7949_v0 }
 0x1bf   :  { %5258 = vmatpush2.bf16.msra.mxu1 %v7952_v1  ;;  %5218 = vmatprep.subr.bf16.mxu0 %v7957_v4 }
 0x1c0   :  { %5259 = vmatprep.subr.bf16.mxu1 %v7960_v5  ;;  %v8005_v5 = vld [vmem:[#allocation7 + $0xac] ss:$16 sps:$4 sm:$0xff]  }
 0x1c2   :  { %5219 = vmatpush2.bf16.msra.mxu0 %v7955_v6  ;;  %v8008_v6 = vld [vmem:[#allocation7 + $0x2ac] ss:$16 sps:$4 sm:$0xff]  }
 0x1c3   :  { %5260 = vmatpush2.bf16.msra.mxu1 %v7958_v7  ;;  %5220 = vmatprep.subr.bf16.mxu0 %v7963_v12 }
 0x1c4   :  { %5261 = vmatprep.subr.bf16.mxu1 %v7966_v14  ;;  %v8003_v14 = vld [vmem:[#allocation7 + $0xa8] ss:$16 sps:$4 sm:$0xff]  }
 0x1c6   :  { %5221 = vmatpush2.bf16.msra.mxu0 %v7961_v15  ;;  %v8006_v15 = vld [vmem:[#allocation7 + $0x2a8] ss:$16 sps:$4 sm:$0xff]  }
 0x1c7   :  { %5262 = vmatpush2.bf16.msra.mxu1 %v7964_v17  ;;  %5222 = vmatprep.subr.bf16.mxu0 %v7969_v18 }
 0x1c8   :  { %5263 = vmatprep.subr.bf16.mxu1 %v7972_v16 }
 0x1ca   :  { %5223 = vmatpush2.bf16.msra.mxu0 %v7967_v22 }
 0x1cb   :  { %5264 = vmatpush2.bf16.msra.mxu1 %v7970_v24  ;;  %5224 = vmatprep.subr.bf16.mxu0 %v7975_v25  ;;  %v8011_v24 = vld [vmem:[#allocation7 + $0x8c] ss:$16 sps:$4 sm:$0xff]  }
 0x1cc   :  { %5265 = vmatprep.subr.bf16.mxu1 %v7978_v26  ;;  %v8014_v25 = vld [vmem:[#allocation7 + $0x28c] ss:$16 sps:$4 sm:$0xff]   ;;  %v8012_v26 = vld [vmem:[#allocation7 + $0x288] ss:$16 sps:$4 sm:$0xff]  }
 0x1ce   :  { %5225 = vmatpush2.bf16.msra.mxu0 %v7973_v23  ;;  %v8015_v23 = vld [vmem:[#allocation7 + $0x68] ss:$16 sps:$4 sm:$0xff]  }
 0x1cf   :  { %5266 = vmatpush2.bf16.msra.mxu1 %v7976_v27  ;;  %5226 = vmatprep.subr.bf16.mxu0 %v7981_v28  ;;  %v8018_v27 = vld [vmem:[#allocation7 + $0x268] ss:$16 sps:$4 sm:$0xff]   ;;  %v8023_v28 = vld [vmem:[#allocation7 + $0x4c] ss:$16 sps:$4 sm:$0xff]  }
 0x1d0   :  { %5267 = vmatprep.subr.bf16.mxu1 %v7984_v30  ;;  %v8026_v30 = vld [vmem:[#allocation7 + $0x24c] ss:$16 sps:$4 sm:$0xff]  }
 0x1d2   :  { %5227 = vmatpush2.bf16.msra.mxu0 %v7979_v31  ;;  %v8021_v31 = vld [vmem:[#allocation7 + $0x48] ss:$16 sps:$4 sm:$0xff]  }
 0x1d3   :  { %5268 = vmatpush2.bf16.msra.mxu1 %v7982_v33  ;;  %5228 = vmatprep.subr.bf16.mxu0 %v7987_v34  ;;  %v8024_v33 = vld [vmem:[#allocation7 + $0x248] ss:$16 sps:$4 sm:$0xff]   ;;  %v8029_v34 = vld [vmem:[#allocation7 + $0x2c] ss:$16 sps:$4 sm:$0xff]  }
 0x1d4   :  { %5269 = vmatprep.subr.bf16.mxu1 %v7990_v35  ;;  %v8032_v35 = vld [vmem:[#allocation7 + $0x22c] ss:$16 sps:$4 sm:$0xff]  }
 0x1d6   :  { %5229 = vmatpush2.bf16.msra.mxu0 %v7985_v36  ;;  %v8027_v36 = vld [vmem:[#allocation7 + $0x28] ss:$16 sps:$4 sm:$0xff]  }
 0x1d7   :  { %5270 = vmatpush2.bf16.msra.mxu1 %v7988_v38  ;;  %5280 = vmatprep.subr.bf16.mxu0 %v7993_v44  ;;  %v8030_v38 = vld [vmem:[#allocation7 + $0x228] ss:$16 sps:$4 sm:$0xff]  }
 0x1d8   :  { %5321 = vmatprep.subr.bf16.mxu1 %v7996_v45  ;;  %v8033_v44 = vld [vmem:[#allocation7 + $0x8] ss:$16 sps:$4 sm:$0xff]  }
 0x1d9   :  { %v4986_v60 = vpop.f32.mrf.mxu0  ;;  %5231 = vmatmul.mubr.bf16.vlgmr.msra.gmra.mxu0 %v9014_v51  ;;  %v8036_v45 = vld [vmem:[#allocation7 + $0x208] ss:$16 sps:$4 sm:$0xff]  }
 0x1da   :  { %v5027_v61 = vpop.f32.mrf.mxu1  ;;  %5272 = vmatmul.mubr.bf16.vlgmr.msra.gmra.mxu1 %v9016_v53  ;;  %v4987_v0 = vadd.f32 %v4986_v60, %v9007_v13  ;;  %5281 = vmatpush1.bf16.msra.mxu0 %v7991_v46  ;;  %v8041_v46 = vld [vmem:[#allocation7 + $0x1ec] ss:$16 sps:$4 sm:$0xff]   ;;  %v8045_v60 = vld [vmem:[#allocation7 + $0x1c8] ss:$16 sps:$4 sm:$0xff]  }
 0x1db   :  { %5322 = vmatpush1.bf16.msra.mxu1 %v7994_v47  ;;  %v4988_v1 = vpop.f32.mrf.mxu0  ;;  %5282 = vmatprep.subr.bf16.mxu0 %v7999_v54  ;;  %v8044_v47 = vld [vmem:[#allocation7 + $0x3ec] ss:$16 sps:$4 sm:$0xff]   ;;  %v8039_v54 = vld [vmem:[#allocation7 + $0x1e8] ss:$16 sps:$4 sm:$0xff]  }
 0x1dc   :  { %v5029_v4 = vpop.f32.mrf.mxu1  ;;  %5323 = vmatprep.subr.bf16.mxu1 %v8002_v55  ;;  %v9021_v7 = vadd.f32 %v5027_v61, %v4987_v0  ;;  %v4989_v12 = vadd.f32 %v4988_v1, %v9012_v19  ;;  %5312 = vmatprep.mubr.bf16.mxu0 %v8938_v49  ;;  %v8009_v19 = vld [vmem:[#allocation7 + $0x88] ss:$16 sps:$4 sm:$0xff]   ;;  %v8017_v49 = vld [vmem:[#allocation7 + $0x6c] ss:$16 sps:$4 sm:$0xff]  }
 0x1dd   :  { %5353 = vmatprep.mubr.bf16.mxu1 %v8940_v52  ;;  %v4990_v17 = vpop.f32.mrf.mxu0  ;;  %v8020_v52 = vld [vmem:[#allocation7 + $0x26c] ss:$16 sps:$4 sm:$0xff]   ;;  %v8042_v55 = vld [vmem:[#allocation7 + $0x3e8] ss:$16 sps:$4 sm:$0xff]  }
 0x1de   :  { %v5031_v13 = vpop.f32.mrf.mxu1  ;;  %v9026_v18 = vadd.f32 %v5029_v4, %v4989_v12  ;;  %5283 = vmatpush1.bf16.msra.mxu0 %v7997_v58  ;;  %v8047_v58 = vld [vmem:[#allocation7 + $0x1cc] ss:$16 sps:$4 sm:$0xff]   ;;  %v8048_v61 = vld [vmem:[#allocation7 + $0x3c8] ss:$16 sps:$4 sm:$0xff]  }
 0x1df   :  { %5324 = vmatpush1.bf16.msra.mxu1 %v8000_v59  ;;  %v4991_v16 = vpop.f32.mrf.mxu0  ;;  %5284 = vmatprep.subr.bf16.mxu0 %v8005_v5  ;;  %v8050_v59 = vld [vmem:[#allocation7 + $0x3cc] ss:$16 sps:$4 sm:$0xff]   ;;  %v8051_v4 = vld [vmem:[#allocation7 + $0x1a8] ss:$16 sps:$4 sm:$0xff]  }
 0x1e0   :  { %v5032_v22 = vpop.f32.mrf.mxu1  ;;  %5325 = vmatprep.subr.bf16.mxu1 %v8008_v6  ;;  %v8053_v0 = vld [vmem:[#allocation7 + $0x1ac] ss:$16 sps:$4 sm:$0xff]   ;;  %v8054_v5 = vld [vmem:[#allocation7 + $0x3a8] ss:$16 sps:$4 sm:$0xff]  }
 0x1e1   :  { %v8056_v1 = vld [vmem:[#allocation7 + $0x3ac] ss:$16 sps:$4 sm:$0xff]   ;;  %v8063_v16 = vld [vmem:[#allocation7 + $0x168] ss:$16 sps:$4 sm:$0xff]  }
 0x1e2   :  { %5285 = vmatpush1.bf16.msra.mxu0 %v8003_v14  ;;  %v8059_v6 = vld [vmem:[#allocation7 + $0x18c] ss:$16 sps:$4 sm:$0xff]   ;;  %v8057_v14 = vld [vmem:[#allocation7 + $0x188] ss:$16 sps:$4 sm:$0xff]  }
 0x1e3   :  { %5326 = vmatpush1.bf16.msra.mxu1 %v8006_v15  ;;  %5286 = vmatprep.subr.bf16.mxu0 %v8011_v24  ;;  %v8062_v12 = vld [vmem:[#allocation7 + $0x38c] ss:$16 sps:$4 sm:$0xff]   ;;  %v8060_v15 = vld [vmem:[#allocation7 + $0x388] ss:$16 sps:$4 sm:$0xff]  }
 0x1e4   :  { %5327 = vmatprep.subr.bf16.mxu1 %v8014_v25  ;;  %v8065_v17 = vld [vmem:[#allocation7 + $0x16c] ss:$16 sps:$4 sm:$0xff]   ;;  %v8066_v22 = vld [vmem:[#allocation7 + $0x368] ss:$16 sps:$4 sm:$0xff]  }
 0x1e5   :  { %v8068_v13 = vld [vmem:[#allocation7 + $0x36c] ss:$16 sps:$4 sm:$0xff]  }
 0x1e6   :  { %5287 = vmatpush1.bf16.msra.mxu0 %v8009_v19  ;;  %v8071_v24 = vld [vmem:[#allocation7 + $0x14c] ss:$16 sps:$4 sm:$0xff]   ;;  %v8069_v19 = vld [vmem:[#allocation7 + $0x148] ss:$16 sps:$4 sm:$0xff]  }
 0x1e7   :  { %5328 = vmatpush1.bf16.msra.mxu1 %v8012_v26  ;;  %5288 = vmatprep.subr.bf16.mxu0 %v8017_v49  ;;  %v8074_v25 = vld [vmem:[#allocation7 + $0x34c] ss:$16 sps:$4 sm:$0xff]   ;;  %v8072_v26 = vld [vmem:[#allocation7 + $0x348] ss:$16 sps:$4 sm:$0xff]  }
 0x1e8   :  { %5329 = vmatprep.subr.bf16.mxu1 %v8020_v52  ;;  %v8077_v49 = vld [vmem:[#allocation7 + $0x12c] ss:$16 sps:$4 sm:$0xff]  }
 0x1e9   :  { %v8080_v52 = vld [vmem:[#allocation7 + $0x32c] ss:$16 sps:$4 sm:$0xff]  }
 0x1ea   :  { %5289 = vmatpush1.bf16.msra.mxu0 %v8015_v23  ;;  %v8075_v23 = vld [vmem:[#allocation7 + $0x128] ss:$16 sps:$4 sm:$0xff]  }
 0x1eb   :  { %5330 = vmatpush1.bf16.msra.mxu1 %v8018_v27  ;;  %5290 = vmatprep.subr.bf16.mxu0 %v8023_v28  ;;  %v8078_v27 = vld [vmem:[#allocation7 + $0x328] ss:$16 sps:$4 sm:$0xff]   ;;  %v8083_v28 = vld [vmem:[#allocation7 + $0x10c] ss:$16 sps:$4 sm:$0xff]  }
 0x1ec   :  { %5331 = vmatprep.subr.bf16.mxu1 %v8026_v30  ;;  %v8086_v30 = vld [vmem:[#allocation7 + $0x30c] ss:$16 sps:$4 sm:$0xff]  }
 0x1ee   :  { %5291 = vmatpush1.bf16.msra.mxu0 %v8021_v31  ;;  %v8081_v31 = vld [vmem:[#allocation7 + $0x108] ss:$16 sps:$4 sm:$0xff]  }
 0x1ef   :  { %5332 = vmatpush1.bf16.msra.mxu1 %v8024_v33  ;;  %5292 = vmatprep.subr.bf16.mxu0 %v8029_v34  ;;  %v8084_v33 = vld [vmem:[#allocation7 + $0x308] ss:$16 sps:$4 sm:$0xff]   ;;  %v8089_v34 = vld [vmem:[#allocation7 + $0x4ec] ss:$16 sps:$4 sm:$0xff]  }
 0x1f0   :  { %5333 = vmatprep.subr.bf16.mxu1 %v8032_v35  ;;  %v8092_v35 = vld [vmem:[#allocation7 + $0x6ec] ss:$16 sps:$4 sm:$0xff]  }
 0x1f2   :  { %5293 = vmatpush1.bf16.msra.mxu0 %v8027_v36  ;;  %v8087_v36 = vld [vmem:[#allocation7 + $0x4e8] ss:$16 sps:$4 sm:$0xff]  }
 0x1f3   :  { %5334 = vmatpush1.bf16.msra.mxu1 %v8030_v38  ;;  %5294 = vmatprep.subr.bf16.mxu0 %v8035_v39  ;;  %v8090_v38 = vld [vmem:[#allocation7 + $0x6e8] ss:$16 sps:$4 sm:$0xff]   ;;  %v8095_v39 = vld [vmem:[#allocation7 + $0x4cc] ss:$16 sps:$4 sm:$0xff]  }
 0x1f4   :  { %5335 = vmatprep.subr.bf16.mxu1 %v8038_v41  ;;  %v8098_v41 = vld [vmem:[#allocation7 + $0x6cc] ss:$16 sps:$4 sm:$0xff]  }
 0x1f6   :  { %5295 = vmatpush1.bf16.msra.mxu0 %v8033_v44  ;;  %v8093_v44 = vld [vmem:[#allocation7 + $0x4c8] ss:$16 sps:$4 sm:$0xff]  }
 0x1f7   :  { %5336 = vmatpush1.bf16.msra.mxu1 %v8036_v45  ;;  %5296 = vmatprep.subr.bf16.mxu0 %v8041_v46  ;;  %v8096_v45 = vld [vmem:[#allocation7 + $0x6c8] ss:$16 sps:$4 sm:$0xff]  }
 0x1f8   :  { %5337 = vmatprep.subr.bf16.mxu1 %v8044_v47 }
 0x1fa   :  { %5297 = vmatpush2.bf16.msra.mxu0 %v8039_v54 }
 0x1fb   :  { %5338 = vmatpush2.bf16.msra.mxu1 %v8042_v55  ;;  %5298 = vmatprep.subr.bf16.mxu0 %v8047_v58 }
 0x1fc   :  { %5339 = vmatprep.subr.bf16.mxu1 %v8050_v59  ;;  %v8101_v59 = vld [vmem:[#allocation7 + $0x4ac] ss:$16 sps:$4 sm:$0xff]  }
 0x1fe   :  { %5299 = vmatpush2.bf16.msra.mxu0 %v8045_v60  ;;  %v8104_v60 = vld [vmem:[#allocation7 + $0x6ac] ss:$16 sps:$4 sm:$0xff]  }
 0x1ff   :  { %5340 = vmatpush2.bf16.msra.mxu1 %v8048_v61  ;;  %5300 = vmatprep.subr.bf16.mxu0 %v8053_v0 }
 0x200   :  { %5341 = vmatprep.subr.bf16.mxu1 %v8056_v1  ;;  %v8099_v1 = vld [vmem:[#allocation7 + $0x4a8] ss:$16 sps:$4 sm:$0xff]  }
 0x202   :  { %5301 = vmatpush2.bf16.msra.mxu0 %v8051_v4  ;;  %v8102_v4 = vld [vmem:[#allocation7 + $0x6a8] ss:$16 sps:$4 sm:$0xff]  }
 0x203   :  { %5342 = vmatpush2.bf16.msra.mxu1 %v8054_v5  ;;  %5302 = vmatprep.subr.bf16.mxu0 %v8059_v6 }
 0x204   :  { %5343 = vmatprep.subr.bf16.mxu1 %v8062_v12  ;;  %v8107_v12 = vld [vmem:[#allocation7 + $0x48c] ss:$16 sps:$4 sm:$0xff]  }
 0x206   :  { %5303 = vmatpush2.bf16.msra.mxu0 %v8057_v14  ;;  %v8110_v14 = vld [vmem:[#allocation7 + $0x68c] ss:$16 sps:$4 sm:$0xff]  }
 0x207   :  { %5344 = vmatpush2.bf16.msra.mxu1 %v8060_v15  ;;  %5304 = vmatprep.subr.bf16.mxu0 %v8065_v17  ;;  %v8108_v15 = vld [vmem:[#allocation7 + $0x688] ss:$16 sps:$4 sm:$0xff]  }
 0x208   :  { %5345 = vmatprep.subr.bf16.mxu1 %v8068_v13  ;;  %v8111_v17 = vld [vmem:[#allocation7 + $0x468] ss:$16 sps:$4 sm:$0xff]  }
 0x209   :  { %v8114_v13 = vld [vmem:[#allocation7 + $0x668] ss:$16 sps:$4 sm:$0xff]  }
 0x20a   :  { %5305 = vmatpush2.bf16.msra.mxu0 %v8063_v16  ;;  %v8119_v16 = vld [vmem:[#allocation7 + $0x44c] ss:$16 sps:$4 sm:$0xff]  }
 0x20b   :  { %5346 = vmatpush2.bf16.msra.mxu1 %v8066_v22  ;;  %5306 = vmatprep.subr.bf16.mxu0 %v8071_v24  ;;  %v8122_v22 = vld [vmem:[#allocation7 + $0x64c] ss:$16 sps:$4 sm:$0xff]   ;;  %v8117_v24 = vld [vmem:[#allocation7 + $0x448] ss:$16 sps:$4 sm:$0xff]  }
 0x20c   :  { %5347 = vmatprep.subr.bf16.mxu1 %v8074_v25  ;;  %v8120_v25 = vld [vmem:[#allocation7 + $0x648] ss:$16 sps:$4 sm:$0xff]  }
 0x20e   :  { %5307 = vmatpush2.bf16.msra.mxu0 %v8069_v19  ;;  %v8125_v19 = vld [vmem:[#allocation7 + $0x42c] ss:$16 sps:$4 sm:$0xff]  }
 0x20f   :  { %5348 = vmatpush2.bf16.msra.mxu1 %v8072_v26  ;;  %5308 = vmatprep.subr.bf16.mxu0 %v8077_v49  ;;  %v8128_v26 = vld [vmem:[#allocation7 + $0x62c] ss:$16 sps:$4 sm:$0xff]   ;;  %v8123_v49 = vld [vmem:[#allocation7 + $0x428] ss:$16 sps:$4 sm:$0xff]  }
 0x210   :  { %5349 = vmatprep.subr.bf16.mxu1 %v8080_v52  ;;  %v8126_v52 = vld [vmem:[#allocation7 + $0x628] ss:$16 sps:$4 sm:$0xff]  }
 0x212   :  { %5309 = vmatpush2.bf16.msra.mxu0 %v8075_v23  ;;  %v8131_v23 = vld [vmem:[#allocation7 + $0x40c] ss:$16 sps:$4 sm:$0xff]  }
 0x213   :  { %5350 = vmatpush2.bf16.msra.mxu1 %v8078_v27  ;;  %5310 = vmatprep.subr.bf16.mxu0 %v8083_v28  ;;  %v8134_v27 = vld [vmem:[#allocation7 + $0x60c] ss:$16 sps:$4 sm:$0xff]   ;;  %v8129_v28 = vld [vmem:[#allocation7 + $0x408] ss:$16 sps:$4 sm:$0xff]  }
 0x214   :  { %5351 = vmatprep.subr.bf16.mxu1 %v8086_v30  ;;  %v8132_v30 = vld [vmem:[#allocation7 + $0x608] ss:$16 sps:$4 sm:$0xff]  }
 0x216   :  { %5311 = vmatpush2.bf16.msra.mxu0 %v8081_v31  ;;  %v8137_v31 = vld [vmem:[#allocation7 + $0x5ec] ss:$16 sps:$4 sm:$0xff]  }
 0x217   :  { %5352 = vmatpush2.bf16.msra.mxu1 %v8084_v33  ;;  %5362 = vmatprep.subr.bf16.mxu0 %v8089_v34  ;;  %v8140_v33 = vld [vmem:[#allocation7 + $0x7ec] ss:$16 sps:$4 sm:$0xff]   ;;  %v8135_v34 = vld [vmem:[#allocation7 + $0x5e8] ss:$16 sps:$4 sm:$0xff]  }
 0x218   :  { %5403 = vmatprep.subr.bf16.mxu1 %v8092_v35  ;;  %v8138_v35 = vld [vmem:[#allocation7 + $0x7e8] ss:$16 sps:$4 sm:$0xff]  }
 0x219   :  { %v5068_v46 = vpop.f32.mrf.mxu0  ;;  %5313 = vmatmul.mubr.bf16.vlgmr.msra.gmra.mxu0 %v8944_v8 }
 0x21a   :  { %v5109_v47 = vpop.f32.mrf.mxu1  ;;  %5354 = vmatmul.mubr.bf16.vlgmr.msra.gmra.mxu1 %v8946_v9  ;;  %v5069_v54 = vadd.f32 %v5068_v46, %v9021_v7  ;;  %5363 = vmatpush1.bf16.msra.mxu0 %v8087_v36  ;;  %v8143_v36 = vld [vmem:[#allocation7 + $0x5cc] ss:$16 sps:$4 sm:$0xff]   ;;  %v8147_v46 = vld [vmem:[#allocation7 + $0x5a8] ss:$16 sps:$4 sm:$0xff]  }
 0x21b   :  { %5404 = vmatpush1.bf16.msra.mxu1 %v8090_v38  ;;  %v5070_v55 = vpop.f32.mrf.mxu0  ;;  %5364 = vmatprep.subr.bf16.mxu0 %v8095_v39  ;;  %v8146_v38 = vld [vmem:[#allocation7 + $0x7cc] ss:$16 sps:$4 sm:$0xff]   ;;  %v8141_v39 = vld [vmem:[#allocation7 + $0x5c8] ss:$16 sps:$4 sm:$0xff]  }
 0x21c   :  { %v5111_v58 = vpop.f32.mrf.mxu1  ;;  %5405 = vmatprep.subr.bf16.mxu1 %v8098_v41  ;;  %v9031_v61 = vadd.f32 %v5109_v47, %v5069_v54  ;;  %v5071_v0 = vadd.f32 %v5070_v55, %v9026_v18  ;;  %5394 = vmatprep.mubr.bf16.mxu0 %v8950_v37  ;;  %v8105_v18 = vld [vmem:[#allocation7 + $0x488] ss:$16 sps:$4 sm:$0xff]   ;;  %v8113_v37 = vld [vmem:[#allocation7 + $0x46c] ss:$16 sps:$4 sm:$0xff]  }
 0x21d   :  { %5435 = vmatprep.mubr.bf16.mxu1 %v8952_v40  ;;  %v5072_v8 = vpop.f32.mrf.mxu0  ;;  %v8116_v40 = vld [vmem:[#allocation7 + $0x66c] ss:$16 sps:$4 sm:$0xff]   ;;  %v8144_v41 = vld [vmem:[#allocation7 + $0x7c8] ss:$16 sps:$4 sm:$0xff]  }
 0x21e   :  { %v5113_v9 = vpop.f32.mrf.mxu1  ;;  %v9036_v7 = vadd.f32 %v5111_v58, %v5071_v0  ;;  %5365 = vmatpush1.bf16.msra.mxu0 %v8093_v44  ;;  %v8149_v44 = vld [vmem:[#allocation7 + $0x5ac] ss:$16 sps:$4 sm:$0xff]   ;;  %v8150_v47 = vld [vmem:[#allocation7 + $0x7a8] ss:$16 sps:$4 sm:$0xff]  }
 0x21f   :  { %5406 = vmatpush1.bf16.msra.mxu1 %v8096_v45  ;;  %v5073_v5 = vpop.f32.mrf.mxu0  ;;  %5366 = vmatprep.subr.bf16.mxu0 %v8101_v59  ;;  %v8152_v45 = vld [vmem:[#allocation7 + $0x7ac] ss:$16 sps:$4 sm:$0xff]   ;;  %v8153_v58 = vld [vmem:[#allocation7 + $0x588] ss:$16 sps:$4 sm:$0xff]  }
 0x220   :  { %v5114_v6 = vpop.f32.mrf.mxu1  ;;  %5407 = vmatprep.subr.bf16.mxu1 %v8104_v60  ;;  %v8155_v54 = vld [vmem:[#allocation7 + $0x58c] ss:$16 sps:$4 sm:$0xff]   ;;  %v8156_v59 = vld [vmem:[#allocation7 + $0x788] ss:$16 sps:$4 sm:$0xff]  }
 0x221   :  { %v8158_v55 = vld [vmem:[#allocation7 + $0x78c] ss:$16 sps:$4 sm:$0xff]   ;;  %v8165_v5 = vld [vmem:[#allocation7 + $0x548] ss:$16 sps:$4 sm:$0xff]  }
 0x222   :  { %5367 = vmatpush1.bf16.msra.mxu0 %v8099_v1  ;;  %v8161_v60 = vld [vmem:[#allocation7 + $0x56c] ss:$16 sps:$4 sm:$0xff]   ;;  %v8159_v1 = vld [vmem:[#allocation7 + $0x568] ss:$16 sps:$4 sm:$0xff]  }
 0x223   :  { %5408 = vmatpush1.bf16.msra.mxu1 %v8102_v4  ;;  %5368 = vmatprep.subr.bf16.mxu0 %v8107_v12  ;;  %v8164_v0 = vld [vmem:[#allocation7 + $0x76c] ss:$16 sps:$4 sm:$0xff]   ;;  %v8162_v4 = vld [vmem:[#allocation7 + $0x768] ss:$16 sps:$4 sm:$0xff]  }
 0x224   :  { %5409 = vmatprep.subr.bf16.mxu1 %v8110_v14  ;;  %v8167_v8 = vld [vmem:[#allocation7 + $0x54c] ss:$16 sps:$4 sm:$0xff]   ;;  %v8168_v6 = vld [vmem:[#allocation7 + $0x748] ss:$16 sps:$4 sm:$0xff]  }
 0x225   :  { %v8170_v9 = vld [vmem:[#allocation7 + $0x74c] ss:$16 sps:$4 sm:$0xff]  }
 0x226   :  { %5369 = vmatpush1.bf16.msra.mxu0 %v8105_v18  ;;  %v8173_v12 = vld [vmem:[#allocation7 + $0x52c] ss:$16 sps:$4 sm:$0xff]   ;;  %v8171_v18 = vld [vmem:[#allocation7 + $0x528] ss:$16 sps:$4 sm:$0xff]  }
 0x227   :  { %5410 = vmatpush1.bf16.msra.mxu1 %v8108_v15  ;;  %5370 = vmatprep.subr.bf16.mxu0 %v8113_v37  ;;  %v8176_v14 = vld [vmem:[#allocation7 + $0x72c] ss:$16 sps:$4 sm:$0xff]   ;;  %v8174_v15 = vld [vmem:[#allocation7 + $0x728] ss:$16 sps:$4 sm:$0xff]  }
 0x228   :  { %5411 = vmatprep.subr.bf16.mxu1 %v8116_v40  ;;  %v8179_v37 = vld [vmem:[#allocation7 + $0x50c] ss:$16 sps:$4 sm:$0xff]  }
 0x229   :  { %v8182_v40 = vld [vmem:[#allocation7 + $0x70c] ss:$16 sps:$4 sm:$0xff]  }
 0x22a   :  { %5371 = vmatpush1.bf16.msra.mxu0 %v8111_v17  ;;  %v8177_v17 = vld [vmem:[#allocation7 + $0x508] ss:$16 sps:$4 sm:$0xff]  }
 0x22b   :  { %5412 = vmatpush1.bf16.msra.mxu1 %v8114_v13  ;;  %5372 = vmatprep.subr.bf16.mxu0 %v8119_v16  ;;  %v8180_v13 = vld [vmem:[#allocation7 + $0x708] ss:$16 sps:$4 sm:$0xff]   ;;  %v8185_v16 = vld [vmem:[#allocation7 + $0x8ec] ss:$16 sps:$4 sm:$0xff]  }
 0x22c   :  { %5413 = vmatprep.subr.bf16.mxu1 %v8122_v22  ;;  %v8188_v22 = vld [vmem:[#allocation7 + $0xaec] ss:$16 sps:$4 sm:$0xff]  }
 0x22e   :  { %5373 = vmatpush1.bf16.msra.mxu0 %v8117_v24  ;;  %v8183_v24 = vld [vmem:[#allocation7 + $0x8e8] ss:$16 sps:$4 sm:$0xff]  }
 0x22f   :  { %5414 = vmatpush1.bf16.msra.mxu1 %v8120_v25  ;;  %5374 = vmatprep.subr.bf16.mxu0 %v8125_v19  ;;  %v8186_v25 = vld [vmem:[#allocation7 + $0xae8] ss:$16 sps:$4 sm:$0xff]   ;;  %v8191_v19 = vld [vmem:[#allocation7 + $0x8cc] ss:$16 sps:$4 sm:$0xff]  }
 0x230   :  { %5415 = vmatprep.subr.bf16.mxu1 %v8128_v26  ;;  %v8194_v26 = vld [vmem:[#allocation7 + $0xacc] ss:$16 sps:$4 sm:$0xff]  }
 0x232   :  { %5375 = vmatpush1.bf16.msra.mxu0 %v8123_v49 }
 0x233   :  { %5416 = vmatpush1.bf16.msra.mxu1 %v8126_v52  ;;  %5376 = vmatprep.subr.bf16.mxu0 %v8131_v23 }
 0x234   :  { %5417 = vmatprep.subr.bf16.mxu1 %v8134_v27  ;;  %v8189_v27 = vld [vmem:[#allocation7 + $0x8c8] ss:$16 sps:$4 sm:$0xff]  }
 0x236   :  { %5377 = vmatpush1.bf16.msra.mxu0 %v8129_v28  ;;  %v8192_v28 = vld [vmem:[#allocation7 + $0xac8] ss:$16 sps:$4 sm:$0xff]  }
 0x237   :  { %5418 = vmatpush1.bf16.msra.mxu1 %v8132_v30  ;;  %5378 = vmatprep.subr.bf16.mxu0 %v8137_v31 }
 0x238   :  { %5419 = vmatprep.subr.bf16.mxu1 %v8140_v33  ;;  %v8197_v33 = vld [vmem:[#allocation7 + $0x8ac] ss:$16 sps:$4 sm:$0xff]  }
 0x23a   :  { %5379 = vmatpush2.bf16.msra.mxu0 %v8135_v34  ;;  %v8200_v34 = vld [vmem:[#allocation7 + $0xaac] ss:$16 sps:$4 sm:$0xff]  }
 0x23b   :  { %5420 = vmatpush2.bf16.msra.mxu1 %v8138_v35  ;;  %5380 = vmatprep.subr.bf16.mxu0 %v8143_v36 }
 0x23c   :  { %5421 = vmatprep.subr.bf16.mxu1 %v8146_v38  ;;  %v8195_v38 = vld [vmem:[#allocation7 + $0x8a8] ss:$16 sps:$4 sm:$0xff]  }
 0x23e   :  { %5381 = vmatpush2.bf16.msra.mxu0 %v8141_v39  ;;  %v8198_v39 = vld [vmem:[#allocation7 + $0xaa8] ss:$16 sps:$4 sm:$0xff]  }
 0x23f   :  { %5422 = vmatpush2.bf16.msra.mxu1 %v8144_v41  ;;  %5382 = vmatprep.subr.bf16.mxu0 %v8149_v44 }
 0x240   :  { %5423 = vmatprep.subr.bf16.mxu1 %v8152_v45  ;;  %v8203_v45 = vld [vmem:[#allocation7 + $0x88c] ss:$16 sps:$4 sm:$0xff]  }
 0x242   :  { %5383 = vmatpush2.bf16.msra.mxu0 %v8147_v46  ;;  %v8206_v46 = vld [vmem:[#allocation7 + $0xa8c] ss:$16 sps:$4 sm:$0xff]  }
 0x243   :  { %5424 = vmatpush2.bf16.msra.mxu1 %v8150_v47  ;;  %5384 = vmatprep.subr.bf16.mxu0 %v8155_v54  ;;  %v8212_v47 = vld [vmem:[#allocation7 + $0xa6c] ss:$16 sps:$4 sm:$0xff]   ;;  %v8207_v54 = vld [vmem:[#allocation7 + $0x868] ss:$16 sps:$4 sm:$0xff]  }
 0x244   :  { %5425 = vmatprep.subr.bf16.mxu1 %v8158_v55  ;;  %v8210_v55 = vld [vmem:[#allocation7 + $0xa68] ss:$16 sps:$4 sm:$0xff]  }
 0x246   :  { %5385 = vmatpush2.bf16.msra.mxu0 %v8153_v58  ;;  %v8215_v58 = vld [vmem:[#allocation7 + $0x84c] ss:$16 sps:$4 sm:$0xff]  }
 0x247   :  { %5426 = vmatpush2.bf16.msra.mxu1 %v8156_v59  ;;  %5386 = vmatprep.subr.bf16.mxu0 %v8161_v60  ;;  %v8218_v59 = vld [vmem:[#allocation7 + $0xa4c] ss:$16 sps:$4 sm:$0xff]   ;;  %v8213_v60 = vld [vmem:[#allocation7 + $0x848] ss:$16 sps:$4 sm:$0xff]  }
 0x248   :  { %5427 = vmatprep.subr.bf16.mxu1 %v8164_v0  ;;  %v8216_v0 = vld [vmem:[#allocation7 + $0xa48] ss:$16 sps:$4 sm:$0xff]  }
 0x24a   :  { %5387 = vmatpush2.bf16.msra.mxu0 %v8159_v1  ;;  %v8221_v1 = vld [vmem:[#allocation7 + $0x82c] ss:$16 sps:$4 sm:$0xff]  }
 0x24b   :  { %5428 = vmatpush2.bf16.msra.mxu1 %v8162_v4  ;;  %5388 = vmatprep.subr.bf16.mxu0 %v8167_v8  ;;  %v8224_v4 = vld [vmem:[#allocation7 + $0xa2c] ss:$16 sps:$4 sm:$0xff]   ;;  %v8219_v8 = vld [vmem:[#allocation7 + $0x828] ss:$16 sps:$4 sm:$0xff]  }
 0x24c   :  { %5429 = vmatprep.subr.bf16.mxu1 %v8170_v9  ;;  %v8222_v9 = vld [vmem:[#allocation7 + $0xa28] ss:$16 sps:$4 sm:$0xff]  }
 0x24e   :  { %5389 = vmatpush2.bf16.msra.mxu0 %v8165_v5  ;;  %v8227_v5 = vld [vmem:[#allocation7 + $0x80c] ss:$16 sps:$4 sm:$0xff]  }
 0x24f   :  { %5430 = vmatpush2.bf16.msra.mxu1 %v8168_v6  ;;  %5390 = vmatprep.subr.bf16.mxu0 %v8173_v12  ;;  %v8230_v6 = vld [vmem:[#allocation7 + $0xa0c] ss:$16 sps:$4 sm:$0xff]   ;;  %v8225_v12 = vld [vmem:[#allocation7 + $0x808] ss:$16 sps:$4 sm:$0xff]  }
 0x250   :  { %5431 = vmatprep.subr.bf16.mxu1 %v8176_v14  ;;  %v8228_v14 = vld [vmem:[#allocation7 + $0xa08] ss:$16 sps:$4 sm:$0xff]  }
 0x252   :  { %5391 = vmatpush2.bf16.msra.mxu0 %v8171_v18  ;;  %v8233_v18 = vld [vmem:[#allocation7 + $0x9ec] ss:$16 sps:$4 sm:$0xff]  }
 0x253   :  { %5432 = vmatpush2.bf16.msra.mxu1 %v8174_v15  ;;  %5392 = vmatprep.subr.bf16.mxu0 %v8179_v37  ;;  %v8236_v15 = vld [vmem:[#allocation7 + $0xbec] ss:$16 sps:$4 sm:$0xff]   ;;  %v8231_v37 = vld [vmem:[#allocation7 + $0x9e8] ss:$16 sps:$4 sm:$0xff]  }
 0x254   :  { %5433 = vmatprep.subr.bf16.mxu1 %v8182_v40  ;;  %v8234_v40 = vld [vmem:[#allocation7 + $0xbe8] ss:$16 sps:$4 sm:$0xff]  }
 0x256   :  { %5393 = vmatpush2.bf16.msra.mxu0 %v8177_v17  ;;  %v8239_v17 = vld [vmem:[#allocation7 + $0x9cc] ss:$16 sps:$4 sm:$0xff]  }
 0x257   :  { %5434 = vmatpush2.bf16.msra.mxu1 %v8180_v13  ;;  %5444 = vmatprep.subr.bf16.mxu0 %v8185_v16  ;;  %v8242_v13 = vld [vmem:[#allocation7 + $0xbcc] ss:$16 sps:$4 sm:$0xff]   ;;  %v8237_v16 = vld [vmem:[#allocation7 + $0x9c8] ss:$16 sps:$4 sm:$0xff]  }
 0x258   :  { %5485 = vmatprep.subr.bf16.mxu1 %v8188_v22  ;;  %v8240_v22 = vld [vmem:[#allocation7 + $0xbc8] ss:$16 sps:$4 sm:$0xff]  }
 0x259   :  { %v5150_v49 = vpop.f32.mrf.mxu0  ;;  %5395 = vmatmul.mubr.bf16.vlgmr.msra.gmra.mxu0 %v8956_v20 }
 0x25a   :  { %v5191_v52 = vpop.f32.mrf.mxu1  ;;  %5436 = vmatmul.mubr.bf16.vlgmr.msra.gmra.mxu1 %v8958_v21  ;;  %v5151_v23 = vadd.f32 %v5150_v49, %v9031_v61  ;;  %5445 = vmatpush1.bf16.msra.mxu0 %v8183_v24  ;;  %v8245_v24 = vld [vmem:[#allocation7 + $0x9ac] ss:$16 sps:$4 sm:$0xff]  }
 0x25b   :  { %5486 = vmatpush1.bf16.msra.mxu1 %v8186_v25  ;;  %v5152_v30 = vpop.f32.mrf.mxu0  ;;  %5446 = vmatprep.subr.bf16.mxu0 %v8191_v19  ;;  %v8248_v25 = vld [vmem:[#allocation7 + $0xbac] ss:$16 sps:$4 sm:$0xff]   ;;  %v8243_v19 = vld [vmem:[#allocation7 + $0x9a8] ss:$16 sps:$4 sm:$0xff]  }
 0x25c   :  { %v5193_v31 = vpop.f32.mrf.mxu1  ;;  %5487 = vmatprep.subr.bf16.mxu1 %v8194_v26  ;;  %v9041_v35 = vadd.f32 %v5191_v52, %v5151_v23  ;;  %v5153_v36 = vadd.f32 %v5152_v30, %v9036_v7  ;;  %5476 = vmatprep.mubr.bf16.mxu0 %v8962_v29  ;;  %v8201_v7 = vld [vmem:[#allocation7 + $0x888] ss:$16 sps:$4 sm:$0xff]   ;;  %v8251_v49 = vld [vmem:[#allocation7 + $0x98c] ss:$16 sps:$4 sm:$0xff]  }
 0x25d   :  { %5517 = vmatprep.mubr.bf16.mxu1 %v8964_v32  ;;  %v5154_v20 = vpop.f32.mrf.mxu0  ;;  %v8204_v29 = vld [vmem:[#allocation7 + $0xa88] ss:$16 sps:$4 sm:$0xff]   ;;  %v8209_v32 = vld [vmem:[#allocation7 + $0x86c] ss:$16 sps:$4 sm:$0xff]  }
 0x25e   :  { %v5195_v21 = vpop.f32.mrf.mxu1  ;;  %v9046_v61 = vadd.f32 %v5193_v31, %v5153_v36  ;;  %5447 = vmatpush1.bf16.msra.mxu0 %v8189_v27  ;;  %v8246_v26 = vld [vmem:[#allocation7 + $0xba8] ss:$16 sps:$4 sm:$0xff]   ;;  %v8254_v52 = vld [vmem:[#allocation7 + $0xb8c] ss:$16 sps:$4 sm:$0xff]  }
 0x25f   :  { %5488 = vmatpush1.bf16.msra.mxu1 %v8192_v28  ;;  %v5155_v41 = vpop.f32.mrf.mxu0  ;;  %5448 = vmatprep.subr.bf16.mxu0 %v8197_v33  ;;  %v8249_v23 = vld [vmem:[#allocation7 + $0x988] ss:$16 sps:$4 sm:$0xff]   ;;  %v8257_v28 = vld [vmem:[#allocation7 + $0x96c] ss:$16 sps:$4 sm:$0xff]  }
 0x260   :  { %v5196_v44 = vpop.f32.mrf.mxu1  ;;  %5489 = vmatprep.subr.bf16.mxu1 %v8200_v34  ;;  %v8252_v27 = vld [vmem:[#allocation7 + $0xb88] ss:$16 sps:$4 sm:$0xff]   ;;  %v8260_v30 = vld [vmem:[#allocation7 + $0xb6c] ss:$16 sps:$4 sm:$0xff]  }
 0x261   :  { %v8255_v31 = vld [vmem:[#allocation7 + $0x968] ss:$16 sps:$4 sm:$0xff]   ;;  %v8263_v34 = vld [vmem:[#allocation7 + $0x94c] ss:$16 sps:$4 sm:$0xff]  }
 0x262   :  { %5449 = vmatpush1.bf16.msra.mxu0 %v8195_v38  ;;  %v8258_v33 = vld [vmem:[#allocation7 + $0xb68] ss:$16 sps:$4 sm:$0xff]   ;;  %v8266_v36 = vld [vmem:[#allocation7 + $0xb4c] ss:$16 sps:$4 sm:$0xff]  }
 0x263   :  { %5490 = vmatpush1.bf16.msra.mxu1 %v8198_v39  ;;  %5450 = vmatprep.subr.bf16.mxu0 %v8203_v45  ;;  %v8261_v20 = vld [vmem:[#allocation7 + $0x948] ss:$16 sps:$4 sm:$0xff]   ;;  %v8269_v38 = vld [vmem:[#allocation7 + $0x92c] ss:$16 sps:$4 sm:$0xff]  }
 0x264   :  { %5491 = vmatprep.subr.bf16.mxu1 %v8206_v46  ;;  %v8264_v21 = vld [vmem:[#allocation7 + $0xb48] ss:$16 sps:$4 sm:$0xff]   ;;  %v8272_v39 = vld [vmem:[#allocation7 + $0xb2c] ss:$16 sps:$4 sm:$0xff]  }
 0x265   :  { %v8267_v41 = vld [vmem:[#allocation7 + $0x928] ss:$16 sps:$4 sm:$0xff]   ;;  %v8275_v45 = vld [vmem:[#allocation7 + $0x90c] ss:$16 sps:$4 sm:$0xff]  }
 0x266   :  { %5451 = vmatpush1.bf16.msra.mxu0 %v8201_v7  ;;  %v8270_v44 = vld [vmem:[#allocation7 + $0xb28] ss:$16 sps:$4 sm:$0xff]   ;;  %v8278_v46 = vld [vmem:[#allocation7 + $0xb0c] ss:$16 sps:$4 sm:$0xff]  }
 0x267   :  { %5492 = vmatpush1.bf16.msra.mxu1 %v8204_v29  ;;  %5452 = vmatprep.subr.bf16.mxu0 %v8209_v32  ;;  %v8273_v7 = vld [vmem:[#allocation7 + $0x908] ss:$16 sps:$4 sm:$0xff]   ;;  %v8281_v32 = vld [vmem:[#allocation7 + $0xcec] ss:$16 sps:$4 sm:$0xff]  }
 0x268   :  { %5493 = vmatprep.subr.bf16.mxu1 %v8212_v47  ;;  %v8276_v29 = vld [vmem:[#allocation7 + $0xb08] ss:$16 sps:$4 sm:$0xff]   ;;  %v8284_v47 = vld [vmem:[#allocation7 + $0xeec] ss:$16 sps:$4 sm:$0xff]  }
 0x26a   :  { %5453 = vmatpush1.bf16.msra.mxu0 %v8207_v54  ;;  %v8279_v54 = vld [vmem:[#allocation7 + $0xce8] ss:$16 sps:$4 sm:$0xff]  }
 0x26b   :  { %5494 = vmatpush1.bf16.msra.mxu1 %v8210_v55  ;;  %5454 = vmatprep.subr.bf16.mxu0 %v8215_v58  ;;  %v8282_v55 = vld [vmem:[#allocation7 + $0xee8] ss:$16 sps:$4 sm:$0xff]   ;;  %v8287_v58 = vld [vmem:[#allocation7 + $0xccc] ss:$16 sps:$4 sm:$0xff]  }
 0x26c   :  { %5495 = vmatprep.subr.bf16.mxu1 %v8218_v59  ;;  %v8290_v59 = vld [vmem:[#allocation7 + $0xecc] ss:$16 sps:$4 sm:$0xff]  }
 0x26e   :  { %5455 = vmatpush1.bf16.msra.mxu0 %v8213_v60 }
 0x26f   :  { %5496 = vmatpush1.bf16.msra.mxu1 %v8216_v0  ;;  %5456 = vmatprep.subr.bf16.mxu0 %v8221_v1 }
 0x270   :  { %5497 = vmatprep.subr.bf16.mxu1 %v8224_v4  ;;  %v8285_v4 = vld [vmem:[#allocation7 + $0xcc8] ss:$16 sps:$4 sm:$0xff]  }
 0x272   :  { %5457 = vmatpush1.bf16.msra.mxu0 %v8219_v8  ;;  %v8288_v8 = vld [vmem:[#allocation7 + $0xec8] ss:$16 sps:$4 sm:$0xff]  }
 0x273   :  { %5498 = vmatpush1.bf16.msra.mxu1 %v8222_v9  ;;  %5458 = vmatprep.subr.bf16.mxu0 %v8227_v5 }
 0x274   :  { %5499 = vmatprep.subr.bf16.mxu1 %v8230_v6  ;;  %v8293_v6 = vld [vmem:[#allocation7 + $0xcac] ss:$16 sps:$4 sm:$0xff]  }
 0x276   :  { %5459 = vmatpush1.bf16.msra.mxu0 %v8225_v12  ;;  %v8296_v12 = vld [vmem:[#allocation7 + $0xeac] ss:$16 sps:$4 sm:$0xff]  }
 0x277   :  { %5500 = vmatpush1.bf16.msra.mxu1 %v8228_v14  ;;  %5460 = vmatprep.subr.bf16.mxu0 %v8233_v18 }
 0x278   :  { %5501 = vmatprep.subr.bf16.mxu1 %v8236_v15  ;;  %v8291_v15 = vld [vmem:[#allocation7 + $0xca8] ss:$16 sps:$4 sm:$0xff]  }
 0x27a   :  { %5461 = vmatpush2.bf16.msra.mxu0 %v8231_v37  ;;  %v8294_v37 = vld [vmem:[#allocation7 + $0xea8] ss:$16 sps:$4 sm:$0xff]  }
 0x27b   :  { %5502 = vmatpush2.bf16.msra.mxu1 %v8234_v40  ;;  %5462 = vmatprep.subr.bf16.mxu0 %v8239_v17 }
 0x27c   :  { %5503 = vmatprep.subr.bf16.mxu1 %v8242_v13  ;;  %v8299_v13 = vld [vmem:[#allocation7 + $0xc8c] ss:$16 sps:$4 sm:$0xff]  }
 0x27e   :  { %5463 = vmatpush2.bf16.msra.mxu0 %v8237_v16  ;;  %v8302_v16 = vld [vmem:[#allocation7 + $0xe8c] ss:$16 sps:$4 sm:$0xff]  }
 0x27f   :  { %5504 = vmatpush2.bf16.msra.mxu1 %v8240_v22  ;;  %5464 = vmatprep.subr.bf16.mxu0 %v8245_v24  ;;  %v8308_v22 = vld [vmem:[#allocation7 + $0xe6c] ss:$16 sps:$4 sm:$0xff]   ;;  %v8303_v24 = vld [vmem:[#allocation7 + $0xc68] ss:$16 sps:$4 sm:$0xff]  }
 0x280   :  { %5505 = vmatprep.subr.bf16.mxu1 %v8248_v25  ;;  %v8306_v25 = vld [vmem:[#allocation7 + $0xe68] ss:$16 sps:$4 sm:$0xff]  }
 0x282   :  { %5465 = vmatpush2.bf16.msra.mxu0 %v8243_v19  ;;  %v8311_v19 = vld [vmem:[#allocation7 + $0xc4c] ss:$16 sps:$4 sm:$0xff]  }
 0x283   :  { %5506 = vmatpush2.bf16.msra.mxu1 %v8246_v26  ;;  %5466 = vmatprep.subr.bf16.mxu0 %v8251_v49  ;;  %v8314_v26 = vld [vmem:[#allocation7 + $0xe4c] ss:$16 sps:$4 sm:$0xff]   ;;  %v8309_v49 = vld [vmem:[#allocation7 + $0xc48] ss:$16 sps:$4 sm:$0xff]  }
 0x284   :  { %5507 = vmatprep.subr.bf16.mxu1 %v8254_v52  ;;  %v8312_v52 = vld [vmem:[#allocation7 + $0xe48] ss:$16 sps:$4 sm:$0xff]  }
 0x286   :  { %5467 = vmatpush2.bf16.msra.mxu0 %v8249_v23  ;;  %v8317_v23 = vld [vmem:[#allocation7 + $0xc2c] ss:$16 sps:$4 sm:$0xff]  }
 0x287   :  { %5508 = vmatpush2.bf16.msra.mxu1 %v8252_v27  ;;  %5468 = vmatprep.subr.bf16.mxu0 %v8257_v28  ;;  %v8320_v27 = vld [vmem:[#allocation7 + $0xe2c] ss:$16 sps:$4 sm:$0xff]   ;;  %v8315_v28 = vld [vmem:[#allocation7 + $0xc28] ss:$16 sps:$4 sm:$0xff]  }
 0x288   :  { %5509 = vmatprep.subr.bf16.mxu1 %v8260_v30  ;;  %v8318_v30 = vld [vmem:[#allocation7 + $0xe28] ss:$16 sps:$4 sm:$0xff]  }
 0x28a   :  { %5469 = vmatpush2.bf16.msra.mxu0 %v8255_v31  ;;  %v8323_v31 = vld [vmem:[#allocation7 + $0xc0c] ss:$16 sps:$4 sm:$0xff]  }
 0x28b   :  { %5510 = vmatpush2.bf16.msra.mxu1 %v8258_v33  ;;  %5470 = vmatprep.subr.bf16.mxu0 %v8263_v34  ;;  %v8326_v33 = vld [vmem:[#allocation7 + $0xe0c] ss:$16 sps:$4 sm:$0xff]   ;;  %v8321_v34 = vld [vmem:[#allocation7 + $0xc08] ss:$16 sps:$4 sm:$0xff]  }
 0x28c   :  { %5511 = vmatprep.subr.bf16.mxu1 %v8266_v36  ;;  %v8324_v36 = vld [vmem:[#allocation7 + $0xe08] ss:$16 sps:$4 sm:$0xff]  }
 0x28e   :  { %5471 = vmatpush2.bf16.msra.mxu0 %v8261_v20  ;;  %v8329_v20 = vld [vmem:[#allocation7 + $0xdec] ss:$16 sps:$4 sm:$0xff]  }
 0x28f   :  { %5512 = vmatpush2.bf16.msra.mxu1 %v8264_v21  ;;  %5472 = vmatprep.subr.bf16.mxu0 %v8269_v38  ;;  %v8332_v21 = vld [vmem:[#allocation7 + $0xfec] ss:$16 sps:$4 sm:$0xff]   ;;  %v8327_v38 = vld [vmem:[#allocation7 + $0xde8] ss:$16 sps:$4 sm:$0xff]  }
 0x290   :  { %5513 = vmatprep.subr.bf16.mxu1 %v8272_v39  ;;  %v8330_v39 = vld [vmem:[#allocation7 + $0xfe8] ss:$16 sps:$4 sm:$0xff]  }
 0x292   :  { %5473 = vmatpush2.bf16.msra.mxu0 %v8267_v41  ;;  %v8335_v41 = vld [vmem:[#allocation7 + $0xdcc] ss:$16 sps:$4 sm:$0xff]  }
 0x293   :  { %5514 = vmatpush2.bf16.msra.mxu1 %v8270_v44  ;;  %5474 = vmatprep.subr.bf16.mxu0 %v8275_v45  ;;  %v8338_v44 = vld [vmem:[#allocation7 + $0xfcc] ss:$16 sps:$4 sm:$0xff]   ;;  %v8333_v45 = vld [vmem:[#allocation7 + $0xdc8] ss:$16 sps:$4 sm:$0xff]  }
 0x294   :  { %5515 = vmatprep.subr.bf16.mxu1 %v8278_v46  ;;  %v8336_v46 = vld [vmem:[#allocation7 + $0xfc8] ss:$16 sps:$4 sm:$0xff]  }
 0x296   :  { %5475 = vmatpush2.bf16.msra.mxu0 %v8273_v7  ;;  %v8341_v7 = vld [vmem:[#allocation7 + $0xdac] ss:$16 sps:$4 sm:$0xff]  }
 0x297   :  { %5516 = vmatpush2.bf16.msra.mxu1 %v8276_v29  ;;  %5526 = vmatprep.subr.bf16.mxu0 %v8281_v32  ;;  %v8344_v29 = vld [vmem:[#allocation7 + $0xfac] ss:$16 sps:$4 sm:$0xff]   ;;  %v8339_v32 = vld [vmem:[#allocation7 + $0xda8] ss:$16 sps:$4 sm:$0xff]  }
 0x298   :  { %5567 = vmatprep.subr.bf16.mxu1 %v8284_v47  ;;  %v8342_v47 = vld [vmem:[#allocation7 + $0xfa8] ss:$16 sps:$4 sm:$0xff]  }
 0x299   :  { %v5232_v60 = vpop.f32.mrf.mxu0  ;;  %5477 = vmatmul.mubr.bf16.vlgmr.msra.gmra.mxu0 %v8968_v42 }
 0x29a   :  { %v5273_v0 = vpop.f32.mrf.mxu1  ;;  %5518 = vmatmul.mubr.bf16.vlgmr.msra.gmra.mxu1 %v8970_v43  ;;  %v5233_v1 = vadd.f32 %v5232_v60, %v9041_v35  ;;  %5527 = vmatpush1.bf16.msra.mxu0 %v8279_v54  ;;  %v8347_v54 = vld [vmem:[#allocation7 + $0xd8c] ss:$16 sps:$4 sm:$0xff]  }
 0x29b   :  { %5568 = vmatpush1.bf16.msra.mxu1 %v8282_v55  ;;  %v5234_v9 = vpop.f32.mrf.mxu0  ;;  %5528 = vmatprep.subr.bf16.mxu0 %v8287_v58  ;;  %v8350_v55 = vld [vmem:[#allocation7 + $0xf8c] ss:$16 sps:$4 sm:$0xff]   ;;  %v8345_v58 = vld [vmem:[#allocation7 + $0xd88] ss:$16 sps:$4 sm:$0xff]  }
 0x29c   :  { %v5275_v5 = vpop.f32.mrf.mxu1  ;;  %5569 = vmatprep.subr.bf16.mxu1 %v8290_v59  ;;  %v9051_v14 = vadd.f32 %v5273_v0, %v5233_v1  ;;  %v5235_v18 = vadd.f32 %v5234_v9, %v9046_v61  ;;  %5558 = vmatprep.mubr.bf16.mxu0 %v8972_v48  ;;  %v8297_v61 = vld [vmem:[#allocation7 + $0xc88] ss:$16 sps:$4 sm:$0xff]   ;;  %v8353_v60 = vld [vmem:[#allocation7 + $0xd6c] ss:$16 sps:$4 sm:$0xff]  }
 0x29d   :  { %5599 = vmatprep.mubr.bf16.mxu1 %v8974_v50  ;;  %v5236_v42 = vpop.f32.mrf.mxu0  ;;  %v8300_v48 = vld [vmem:[#allocation7 + $0xe88] ss:$16 sps:$4 sm:$0xff]   ;;  %v8305_v50 = vld [vmem:[#allocation7 + $0xc6c] ss:$16 sps:$4 sm:$0xff]  }
 0x29e   :  { %v5277_v43 = vpop.f32.mrf.mxu1  ;;  %v9056_v35 = vadd.f32 %v5275_v5, %v5235_v18  ;;  %5529 = vmatpush1.bf16.msra.mxu0 %v8285_v4  ;;  %v8348_v59 = vld [vmem:[#allocation7 + $0xf88] ss:$16 sps:$4 sm:$0xff]   ;;  %v8356_v0 = vld [vmem:[#allocation7 + $0xf6c] ss:$16 sps:$4 sm:$0xff]  }
 0x29f   :  { %5570 = vmatpush1.bf16.msra.mxu1 %v8288_v8  ;;  %v5237_v40 = vpop.f32.mrf.mxu0  ;;  %5530 = vmatprep.subr.bf16.mxu0 %v8293_v6  ;;  %v8351_v1 = vld [vmem:[#allocation7 + $0xd68] ss:$16 sps:$4 sm:$0xff]   ;;  %v8359_v8 = vld [vmem:[#allocation7 + $0xd4c] ss:$16 sps:$4 sm:$0xff]  }
 0x2a0   :  { %v5278_v17 = vpop.f32.mrf.mxu1  ;;  %5571 = vmatprep.subr.bf16.mxu1 %v8296_v12  ;;  %v8354_v4 = vld [vmem:[#allocation7 + $0xf68] ss:$16 sps:$4 sm:$0xff]   ;;  %v8362_v9 = vld [vmem:[#allocation7 + $0xf4c] ss:$16 sps:$4 sm:$0xff]  }
 0x2a1   :  { %v8357_v5 = vld [vmem:[#allocation7 + $0xd48] ss:$16 sps:$4 sm:$0xff]   ;;  %v8365_v12 = vld [vmem:[#allocation7 + $0xd2c] ss:$16 sps:$4 sm:$0xff]  }
 0x2a2   :  { %5531 = vmatpush1.bf16.msra.mxu0 %v8291_v15  ;;  %v8360_v6 = vld [vmem:[#allocation7 + $0xf48] ss:$16 sps:$4 sm:$0xff]   ;;  %v8368_v18 = vld [vmem:[#allocation7 + $0xf2c] ss:$16 sps:$4 sm:$0xff]  }
 0x2a3   :  { %5572 = vmatpush1.bf16.msra.mxu1 %v8294_v37  ;;  %5532 = vmatprep.subr.bf16.mxu0 %v8299_v13  ;;  %v8363_v42 = vld [vmem:[#allocation7 + $0xd28] ss:$16 sps:$4 sm:$0xff]   ;;  %v8371_v15 = vld [vmem:[#allocation7 + $0xd0c] ss:$16 sps:$4 sm:$0xff]  }
 0x2a4   :  { %5573 = vmatprep.subr.bf16.mxu1 %v8302_v16  ;;  %v8366_v43 = vld [vmem:[#allocation7 + $0xf28] ss:$16 sps:$4 sm:$0xff]   ;;  %v8374_v37 = vld [vmem:[#allocation7 + $0xf0c] ss:$16 sps:$4 sm:$0xff]  }
 0x2a5   :  { %v8369_v40 = vld [vmem:[#allocation7 + $0xd08] ss:$16 sps:$4 sm:$0xff]   ;;  %v8377_v13 = vld [vmem:[#allocation7 + $0x10ec] ss:$16 sps:$4 sm:$0xff]  }
 0x2a6   :  { %5533 = vmatpush1.bf16.msra.mxu0 %v8297_v61  ;;  %v8372_v17 = vld [vmem:[#allocation7 + $0xf08] ss:$16 sps:$4 sm:$0xff]   ;;  %v8380_v16 = vld [vmem:[#allocation7 + $0x12ec] ss:$16 sps:$4 sm:$0xff]  }
 0x2a7   :  { %5574 = vmatpush1.bf16.msra.mxu1 %v8300_v48  ;;  %5534 = vmatprep.subr.bf16.mxu0 %v8305_v50  ;;  %v8375_v61 = vld [vmem:[#allocation7 + $0x10e8] ss:$16 sps:$4 sm:$0xff]   ;;  %v8383_v50 = vld [vmem:[#allocation7 + $0x10cc] ss:$16 sps:$4 sm:$0xff]  }
 0x2a8   :  { %5575 = vmatprep.subr.bf16.mxu1 %v8308_v22  ;;  %v8378_v48 = vld [vmem:[#allocation7 + $0x12e8] ss:$16 sps:$4 sm:$0xff]   ;;  %v8386_v22 = vld [vmem:[#allocation7 + $0x12cc] ss:$16 sps:$4 sm:$0xff]  }
 0x2aa   :  { %5535 = vmatpush1.bf16.msra.mxu0 %v8303_v24 }
 0x2ab   :  { %5576 = vmatpush1.bf16.msra.mxu1 %v8306_v25  ;;  %5536 = vmatprep.subr.bf16.mxu0 %v8311_v19 }
 0x2ac   :  { %5577 = vmatprep.subr.bf16.mxu1 %v8314_v26  ;;  %v8381_v26 = vld [vmem:[#allocation7 + $0x10c8] ss:$16 sps:$4 sm:$0xff]  }
 0x2ae   :  { %5537 = vmatpush1.bf16.msra.mxu0 %v8309_v49  ;;  %v8384_v49 = vld [vmem:[#allocation7 + $0x12c8] ss:$16 sps:$4 sm:$0xff]  }
 0x2af   :  { %5578 = vmatpush1.bf16.msra.mxu1 %v8312_v52  ;;  %5538 = vmatprep.subr.bf16.mxu0 %v8317_v23 }
 0x2b0   :  { %5579 = vmatprep.subr.bf16.mxu1 %v8320_v27  ;;  %v8389_v27 = vld [vmem:[#allocation7 + $0x10ac] ss:$16 sps:$4 sm:$0xff]  }
 0x2b2   :  { %5539 = vmatpush1.bf16.msra.mxu0 %v8315_v28  ;;  %v8392_v28 = vld [vmem:[#allocation7 + $0x12ac] ss:$16 sps:$4 sm:$0xff]  }
 0x2b3   :  { %5580 = vmatpush1.bf16.msra.mxu1 %v8318_v30  ;;  %5540 = vmatprep.subr.bf16.mxu0 %v8323_v31  ;;  %v8387_v31 = vld [vmem:[#allocation7 + $0x10a8] ss:$16 sps:$4 sm:$0xff]  }
 0x2b4   :  { %5581 = vmatprep.subr.bf16.mxu1 %v8326_v33  ;;  %v8390_v33 = vld [vmem:[#allocation7 + $0x12a8] ss:$16 sps:$4 sm:$0xff]  }
 0x2b6   :  { %5541 = vmatpush1.bf16.msra.mxu0 %v8321_v34 }
 0x2b7   :  { %5582 = vmatpush1.bf16.msra.mxu1 %v8324_v36  ;;  %5542 = vmatprep.subr.bf16.mxu0 %v8329_v20  ;;  %v8395_v20 = vld [vmem:[#allocation7 + $0x108c] ss:$16 sps:$4 sm:$0xff]  }
 0x2b8   :  { %5583 = vmatprep.subr.bf16.mxu1 %v8332_v21  ;;  %v8398_v21 = vld [vmem:[#allocation7 + $0x128c] ss:$16 sps:$4 sm:$0xff]  }
 0x2ba   :  { %5543 = vmatpush2.bf16.msra.mxu0 %v8327_v38  ;;  %v8393_v38 = vld [vmem:[#allocation7 + $0x1088] ss:$16 sps:$4 sm:$0xff]  }
 0x2bb   :  { %5584 = vmatpush2.bf16.msra.mxu1 %v8330_v39  ;;  %5544 = vmatprep.subr.bf16.mxu0 %v8335_v41  ;;  %v8396_v39 = vld [vmem:[#allocation7 + $0x1288] ss:$16 sps:$4 sm:$0xff]  }
 0x2bc   :  { %5585 = vmatprep.subr.bf16.mxu1 %v8338_v44  ;;  %v8399_v41 = vld [vmem:[#allocation7 + $0x1068] ss:$16 sps:$4 sm:$0xff]  }
 0x2bd   :  { %v8402_v44 = vld [vmem:[#allocation7 + $0x1268] ss:$16 sps:$4 sm:$0xff]  }
 0x2be   :  { %5545 = vmatpush2.bf16.msra.mxu0 %v8333_v45  ;;  %v8407_v45 = vld [vmem:[#allocation7 + $0x104c] ss:$16 sps:$4 sm:$0xff]  }
 0x2bf   :  { %5586 = vmatpush2.bf16.msra.mxu1 %v8336_v46  ;;  %5546 = vmatprep.subr.bf16.mxu0 %v8341_v7  ;;  %v8410_v46 = vld [vmem:[#allocation7 + $0x124c] ss:$16 sps:$4 sm:$0xff]   ;;  %v8405_v7 = vld [vmem:[#allocation7 + $0x1048] ss:$16 sps:$4 sm:$0xff]  }
 0x2c0   :  { %5587 = vmatprep.subr.bf16.mxu1 %v8344_v29  ;;  %v8408_v29 = vld [vmem:[#allocation7 + $0x1248] ss:$16 sps:$4 sm:$0xff]  }
 0x2c2   :  { %5547 = vmatpush2.bf16.msra.mxu0 %v8339_v32  ;;  %v8413_v32 = vld [vmem:[#allocation7 + $0x102c] ss:$16 sps:$4 sm:$0xff]  }
 0x2c3   :  { %5588 = vmatpush2.bf16.msra.mxu1 %v8342_v47  ;;  %5548 = vmatprep.subr.bf16.mxu0 %v8347_v54  ;;  %v8416_v47 = vld [vmem:[#allocation7 + $0x122c] ss:$16 sps:$4 sm:$0xff]   ;;  %v8411_v54 = vld [vmem:[#allocation7 + $0x1028] ss:$16 sps:$4 sm:$0xff]  }
 0x2c4   :  { %5589 = vmatprep.subr.bf16.mxu1 %v8350_v55  ;;  %v8414_v55 = vld [vmem:[#allocation7 + $0x1228] ss:$16 sps:$4 sm:$0xff]  }
 0x2c6   :  { %5549 = vmatpush2.bf16.msra.mxu0 %v8345_v58  ;;  %v8419_v58 = vld [vmem:[#allocation7 + $0x100c] ss:$16 sps:$4 sm:$0xff]  }
 0x2c7   :  { %5590 = vmatpush2.bf16.msra.mxu1 %v8348_v59  ;;  %5550 = vmatprep.subr.bf16.mxu0 %v8353_v60  ;;  %v8422_v59 = vld [vmem:[#allocation7 + $0x120c] ss:$16 sps:$4 sm:$0xff]   ;;  %v8417_v60 = vld [vmem:[#allocation7 + $0x1008] ss:$16 sps:$4 sm:$0xff]  }
 0x2c8   :  { %5591 = vmatprep.subr.bf16.mxu1 %v8356_v0  ;;  %v8420_v0 = vld [vmem:[#allocation7 + $0x1208] ss:$16 sps:$4 sm:$0xff]  }
 0x2ca   :  { %5551 = vmatpush2.bf16.msra.mxu0 %v8351_v1  ;;  %v8425_v1 = vld [vmem:[#allocation7 + $0x11ec] ss:$16 sps:$4 sm:$0xff]  }
 0x2cb   :  { %5592 = vmatpush2.bf16.msra.mxu1 %v8354_v4  ;;  %5552 = vmatprep.subr.bf16.mxu0 %v8359_v8  ;;  %v8428_v4 = vld [vmem:[#allocation7 + $0x13ec] ss:$16 sps:$4 sm:$0xff]   ;;  %v8423_v8 = vld [vmem:[#allocation7 + $0x11e8] ss:$16 sps:$4 sm:$0xff]  }
 0x2cc   :  { %5593 = vmatprep.subr.bf16.mxu1 %v8362_v9  ;;  %v8426_v9 = vld [vmem:[#allocation7 + $0x13e8] ss:$16 sps:$4 sm:$0xff]  }
 0x2ce   :  { %5553 = vmatpush2.bf16.msra.mxu0 %v8357_v5  ;;  %v8431_v5 = vld [vmem:[#allocation7 + $0x11cc] ss:$16 sps:$4 sm:$0xff]  }
 0x2cf   :  { %5594 = vmatpush2.bf16.msra.mxu1 %v8360_v6  ;;  %5554 = vmatprep.subr.bf16.mxu0 %v8365_v12  ;;  %v8434_v6 = vld [vmem:[#allocation7 + $0x13cc] ss:$16 sps:$4 sm:$0xff]   ;;  %v8429_v12 = vld [vmem:[#allocation7 + $0x11c8] ss:$16 sps:$4 sm:$0xff]  }
 0x2d0   :  { %5595 = vmatprep.subr.bf16.mxu1 %v8368_v18  ;;  %v8432_v18 = vld [vmem:[#allocation7 + $0x13c8] ss:$16 sps:$4 sm:$0xff]  }
 0x2d2   :  { %5555 = vmatpush2.bf16.msra.mxu0 %v8363_v42  ;;  %v8437_v42 = vld [vmem:[#allocation7 + $0x11ac] ss:$16 sps:$4 sm:$0xff]  }
 0x2d3   :  { %5596 = vmatpush2.bf16.msra.mxu1 %v8366_v43  ;;  %5556 = vmatprep.subr.bf16.mxu0 %v8371_v15  ;;  %v8440_v43 = vld [vmem:[#allocation7 + $0x13ac] ss:$16 sps:$4 sm:$0xff]   ;;  %v8435_v15 = vld [vmem:[#allocation7 + $0x11a8] ss:$16 sps:$4 sm:$0xff]  }
 0x2d4   :  { %5597 = vmatprep.subr.bf16.mxu1 %v8374_v37  ;;  %v8438_v37 = vld [vmem:[#allocation7 + $0x13a8] ss:$16 sps:$4 sm:$0xff]  }
 0x2d6   :  { %5557 = vmatpush2.bf16.msra.mxu0 %v8369_v40  ;;  %v8443_v40 = vld [vmem:[#allocation7 + $0x118c] ss:$16 sps:$4 sm:$0xff]  }
 0x2d7   :  { %5598 = vmatpush2.bf16.msra.mxu1 %v8372_v17  ;;  %5608 = vmatprep.subr.bf16.mxu0 %v8377_v13  ;;  %v8446_v17 = vld [vmem:[#allocation7 + $0x138c] ss:$16 sps:$4 sm:$0xff]   ;;  %v8441_v13 = vld [vmem:[#allocation7 + $0x1188] ss:$16 sps:$4 sm:$0xff]  }
 0x2d8   :  { %5649 = vmatprep.subr.bf16.mxu1 %v8380_v16  ;;  %v8444_v16 = vld [vmem:[#allocation7 + $0x1388] ss:$16 sps:$4 sm:$0xff]  }
 0x2d9   :  { %v5314_v24 = vpop.f32.mrf.mxu0  ;;  %5559 = vmatmul.mubr.bf16.vlgmr.msra.gmra.mxu0 %v8980_v2 }
 0x2da   :  { %v5355_v25 = vpop.f32.mrf.mxu1  ;;  %5600 = vmatmul.mubr.bf16.vlgmr.msra.gmra.mxu1 %v8982_v3  ;;  %5609 = vmatpush1.bf16.msra.mxu0 %v8375_v61  ;;  %v8449_v61 = vld [vmem:[#allocation7 + $0x116c] ss:$16 sps:$4 sm:$0xff]  }
 0x2db   :  { %v9060_v19 = vadd.f32 %v5355_v25, %v5314_v24  ;;  %5650 = vmatpush1.bf16.msra.mxu1 %v8378_v48  ;;  %v5316_v52 = vpop.f32.mrf.mxu0  ;;  %5610 = vmatprep.subr.bf16.mxu0 %v8383_v50  ;;  %v8452_v48 = vld [vmem:[#allocation7 + $0x136c] ss:$16 sps:$4 sm:$0xff]   ;;  %v8447_v50 = vld [vmem:[#allocation7 + $0x1168] ss:$16 sps:$4 sm:$0xff]  }
 0x2dc   :  { %v5357_v23 = vpop.f32.mrf.mxu1  ;;  %5651 = vmatprep.subr.bf16.mxu1 %v8386_v22  ;;  %5640 = vmatprep.mubr.bf16.mxu0 %v8984_v10  ;;  %v8401_v10 = vld [vmem:[#allocation7 + $0x106c] ss:$16 sps:$4 sm:$0xff]   ;;  %v8450_v22 = vld [vmem:[#allocation7 + $0x1368] ss:$16 sps:$4 sm:$0xff]  }
 0x2dd   :  { %v9062_v30 = vadd.f32 %v5357_v23, %v5316_v52  ;;  %5681 = vmatprep.mubr.bf16.mxu1 %v8986_v11  ;;  %v5318_v2 = vpop.f32.mrf.mxu0  ;;  %v8404_v11 = vld [vmem:[#allocation7 + $0x126c] ss:$16 sps:$4 sm:$0xff]  }
 0x2de   :  { %v5359_v3 = vpop.f32.mrf.mxu1  ;;  %5611 = vmatpush1.bf16.msra.mxu0 %v8381_v26  ;;  %v8455_v24 = vld [vmem:[#allocation7 + $0x114c] ss:$16 sps:$4 sm:$0xff]   ;;  %v8453_v26 = vld [vmem:[#allocation7 + $0x1148] ss:$16 sps:$4 sm:$0xff]  }
 0x2df   :  { %5652 = vmatpush1.bf16.msra.mxu1 %v8384_v49  ;;  %v5319_v34 = vpop.f32.mrf.mxu0  ;;  %5612 = vmatprep.subr.bf16.mxu0 %v8389_v27  ;;  %v8458_v25 = vld [vmem:[#allocation7 + $0x134c] ss:$16 sps:$4 sm:$0xff]   ;;  %v8456_v49 = vld [vmem:[#allocation7 + $0x1348] ss:$16 sps:$4 sm:$0xff]  }
 0x2e0   :  { %v5360_v36 = vpop.f32.mrf.mxu1  ;;  %5653 = vmatprep.subr.bf16.mxu1 %v8392_v28  ;;  %v8461_v52 = vld [vmem:[#allocation7 + $0x112c] ss:$16 sps:$4 sm:$0xff]   ;;  %v8459_v27 = vld [vmem:[#allocation7 + $0x1128] ss:$16 sps:$4 sm:$0xff]  }
 0x2e1   :  { %v8464_v23 = vld [vmem:[#allocation7 + $0x132c] ss:$16 sps:$4 sm:$0xff]   ;;  %v8462_v28 = vld [vmem:[#allocation7 + $0x1328] ss:$16 sps:$4 sm:$0xff]  }
 0x2e2   :  { %5613 = vmatpush1.bf16.msra.mxu0 %v8387_v31  ;;  %v8467_v2 = vld [vmem:[#allocation7 + $0x110c] ss:$16 sps:$4 sm:$0xff]   ;;  %v8465_v31 = vld [vmem:[#allocation7 + $0x1108] ss:$16 sps:$4 sm:$0xff]  }
 0x2e3   :  { %5654 = vmatpush1.bf16.msra.mxu1 %v8390_v33  ;;  %5614 = vmatprep.subr.bf16.mxu0 %v8395_v20  ;;  %v8470_v3 = vld [vmem:[#allocation7 + $0x130c] ss:$16 sps:$4 sm:$0xff]   ;;  %v8468_v33 = vld [vmem:[#allocation7 + $0x1308] ss:$16 sps:$4 sm:$0xff]  }
 0x2e4   :  { %5655 = vmatprep.subr.bf16.mxu1 %v8398_v21  ;;  %v8473_v34 = vld [vmem:[#allocation7 + $0x14ec] ss:$16 sps:$4 sm:$0xff]   ;;  %v8471_v20 = vld [vmem:[#allocation7 + $0x14e8] ss:$16 sps:$4 sm:$0xff]  }
 0x2e5   :  { %v8476_v36 = vld [vmem:[#allocation7 + $0x16ec] ss:$16 sps:$4 sm:$0xff]   ;;  %v8474_v21 = vld [vmem:[#allocation7 + $0x16e8] ss:$16 sps:$4 sm:$0xff]  }
 0x2e6   :  { %5615 = vmatpush1.bf16.msra.mxu0 %v8393_v38  ;;  %v8479_v38 = vld [vmem:[#allocation7 + $0x14cc] ss:$16 sps:$4 sm:$0xff]  }
 0x2e7   :  { %5656 = vmatpush1.bf16.msra.mxu1 %v8396_v39  ;;  %5616 = vmatprep.subr.bf16.mxu0 %v8401_v10  ;;  %v8482_v39 = vld [vmem:[#allocation7 + $0x16cc] ss:$16 sps:$4 sm:$0xff]  }
 0x2e8   :  { %5657 = vmatprep.subr.bf16.mxu1 %v8404_v11 }
 0x2ea   :  { %5617 = vmatpush1.bf16.msra.mxu0 %v8399_v41 }
 0x2eb   :  { %5658 = vmatpush1.bf16.msra.mxu1 %v8402_v44  ;;  %5618 = vmatprep.subr.bf16.mxu0 %v8407_v45  ;;  %v8477_v44 = vld [vmem:[#allocation7 + $0x14c8] ss:$16 sps:$4 sm:$0xff]  }
 0x2ec   :  { %5659 = vmatprep.subr.bf16.mxu1 %v8410_v46  ;;  %v8480_v45 = vld [vmem:[#allocation7 + $0x16c8] ss:$16 sps:$4 sm:$0xff]  }
 0x2ee   :  { %5619 = vmatpush1.bf16.msra.mxu0 %v8405_v7 }
 0x2ef   :  { %5660 = vmatpush1.bf16.msra.mxu1 %v8408_v29  ;;  %5620 = vmatprep.subr.bf16.mxu0 %v8413_v32  ;;  %v8485_v29 = vld [vmem:[#allocation7 + $0x14ac] ss:$16 sps:$4 sm:$0xff]  }
 0x2f0   :  { %5661 = vmatprep.subr.bf16.mxu1 %v8416_v47  ;;  %v8488_v32 = vld [vmem:[#allocation7 + $0x16ac] ss:$16 sps:$4 sm:$0xff]  }
 0x2f2   :  { %5621 = vmatpush1.bf16.msra.mxu0 %v8411_v54 }
 0x2f3   :  { %5662 = vmatpush1.bf16.msra.mxu1 %v8414_v55  ;;  %5622 = vmatprep.subr.bf16.mxu0 %v8419_v58  ;;  %v8483_v55 = vld [vmem:[#allocation7 + $0x14a8] ss:$16 sps:$4 sm:$0xff]  }
 0x2f4   :  { %5663 = vmatprep.subr.bf16.mxu1 %v8422_v59  ;;  %v8486_v58 = vld [vmem:[#allocation7 + $0x16a8] ss:$16 sps:$4 sm:$0xff]  }
 0x2f6   :  { %5623 = vmatpush1.bf16.msra.mxu0 %v8417_v60 }
 0x2f7   :  { %5664 = vmatpush1.bf16.msra.mxu1 %v8420_v0  ;;  %5624 = vmatprep.subr.bf16.mxu0 %v8425_v1  ;;  %v8491_v0 = vld [vmem:[#allocation7 + $0x148c] ss:$16 sps:$4 sm:$0xff]  }
 0x2f8   :  { %5665 = vmatprep.subr.bf16.mxu1 %v8428_v4  ;;  %v8494_v1 = vld [vmem:[#allocation7 + $0x168c] ss:$16 sps:$4 sm:$0xff]  }
 0x2f9   :  { %v8500_v4 = vld [vmem:[#allocation7 + $0x166c] ss:$16 sps:$4 sm:$0xff]  }
 0x2fa   :  { %5625 = vmatpush2.bf16.msra.mxu0 %v8423_v8  ;;  %v8495_v8 = vld [vmem:[#allocation7 + $0x1468] ss:$16 sps:$4 sm:$0xff]  }
 0x2fb   :  { %5666 = vmatpush2.bf16.msra.mxu1 %v8426_v9  ;;  %5626 = vmatprep.subr.bf16.mxu0 %v8431_v5  ;;  %v8498_v9 = vld [vmem:[#allocation7 + $0x1668] ss:$16 sps:$4 sm:$0xff]   ;;  %v8503_v5 = vld [vmem:[#allocation7 + $0x144c] ss:$16 sps:$4 sm:$0xff]  }
 0x2fc   :  { %5667 = vmatprep.subr.bf16.mxu1 %v8434_v6  ;;  %v8506_v6 = vld [vmem:[#allocation7 + $0x164c] ss:$16 sps:$4 sm:$0xff]  }
 0x2fe   :  { %5627 = vmatpush2.bf16.msra.mxu0 %v8429_v12  ;;  %v8501_v12 = vld [vmem:[#allocation7 + $0x1448] ss:$16 sps:$4 sm:$0xff]  }
 0x2ff   :  { %5668 = vmatpush2.bf16.msra.mxu1 %v8432_v18  ;;  %5628 = vmatprep.subr.bf16.mxu0 %v8437_v42  ;;  %v8504_v18 = vld [vmem:[#allocation7 + $0x1648] ss:$16 sps:$4 sm:$0xff]   ;;  %v8509_v42 = vld [vmem:[#allocation7 + $0x142c] ss:$16 sps:$4 sm:$0xff]  }
 0x300   :  { %5669 = vmatprep.subr.bf16.mxu1 %v8440_v43  ;;  %v8512_v43 = vld [vmem:[#allocation7 + $0x162c] ss:$16 sps:$4 sm:$0xff]  }
 0x302   :  { %5629 = vmatpush2.bf16.msra.mxu0 %v8435_v15  ;;  %v8507_v15 = vld [vmem:[#allocation7 + $0x1428] ss:$16 sps:$4 sm:$0xff]  }
 0x303   :  { %5670 = vmatpush2.bf16.msra.mxu1 %v8438_v37  ;;  %5630 = vmatprep.subr.bf16.mxu0 %v8443_v40  ;;  %v8510_v37 = vld [vmem:[#allocation7 + $0x1628] ss:$16 sps:$4 sm:$0xff]   ;;  %v8515_v40 = vld [vmem:[#allocation7 + $0x140c] ss:$16 sps:$4 sm:$0xff]  }
 0x304   :  { %5671 = vmatprep.subr.bf16.mxu1 %v8446_v17  ;;  %v8518_v17 = vld [vmem:[#allocation7 + $0x160c] ss:$16 sps:$4 sm:$0xff]  }
 0x306   :  { %5631 = vmatpush2.bf16.msra.mxu0 %v8441_v13  ;;  %v8513_v13 = vld [vmem:[#allocation7 + $0x1408] ss:$16 sps:$4 sm:$0xff]  }
 0x307   :  { %5672 = vmatpush2.bf16.msra.mxu1 %v8444_v16  ;;  %5632 = vmatprep.subr.bf16.mxu0 %v8449_v61  ;;  %v8516_v16 = vld [vmem:[#allocation7 + $0x1608] ss:$16 sps:$4 sm:$0xff]   ;;  %v8521_v61 = vld [vmem:[#allocation7 + $0x15ec] ss:$16 sps:$4 sm:$0xff]  }
 0x308   :  { %5673 = vmatprep.subr.bf16.mxu1 %v8452_v48  ;;  %v8524_v48 = vld [vmem:[#allocation7 + $0x17ec] ss:$16 sps:$4 sm:$0xff]  }
 0x30a   :  { %5633 = vmatpush2.bf16.msra.mxu0 %v8447_v50  ;;  %v8519_v50 = vld [vmem:[#allocation7 + $0x15e8] ss:$16 sps:$4 sm:$0xff]  }
 0x30b   :  { %5674 = vmatpush2.bf16.msra.mxu1 %v8450_v22  ;;  %5634 = vmatprep.subr.bf16.mxu0 %v8455_v24  ;;  %v8522_v22 = vld [vmem:[#allocation7 + $0x17e8] ss:$16 sps:$4 sm:$0xff]   ;;  %v8527_v24 = vld [vmem:[#allocation7 + $0x15cc] ss:$16 sps:$4 sm:$0xff]  }
 0x30c   :  { %5675 = vmatprep.subr.bf16.mxu1 %v8458_v25  ;;  %v8530_v25 = vld [vmem:[#allocation7 + $0x17cc] ss:$16 sps:$4 sm:$0xff]  }
 0x30e   :  { %5635 = vmatpush2.bf16.msra.mxu0 %v8453_v26  ;;  %v8525_v26 = vld [vmem:[#allocation7 + $0x15c8] ss:$16 sps:$4 sm:$0xff]  }
 0x30f   :  { %5676 = vmatpush2.bf16.msra.mxu1 %v8456_v49  ;;  %5636 = vmatprep.subr.bf16.mxu0 %v8461_v52  ;;  %v8528_v49 = vld [vmem:[#allocation7 + $0x17c8] ss:$16 sps:$4 sm:$0xff]   ;;  %v8533_v52 = vld [vmem:[#allocation7 + $0x15ac] ss:$16 sps:$4 sm:$0xff]  }
 0x310   :  { %5677 = vmatprep.subr.bf16.mxu1 %v8464_v23  ;;  %v8536_v23 = vld [vmem:[#allocation7 + $0x17ac] ss:$16 sps:$4 sm:$0xff]  }
 0x312   :  { %5637 = vmatpush2.bf16.msra.mxu0 %v8459_v27  ;;  %v8531_v27 = vld [vmem:[#allocation7 + $0x15a8] ss:$16 sps:$4 sm:$0xff]  }
 0x313   :  { %5678 = vmatpush2.bf16.msra.mxu1 %v8462_v28  ;;  %5638 = vmatprep.subr.bf16.mxu0 %v8467_v2  ;;  %v8534_v28 = vld [vmem:[#allocation7 + $0x17a8] ss:$16 sps:$4 sm:$0xff]   ;;  %v8539_v2 = vld [vmem:[#allocation7 + $0x158c] ss:$16 sps:$4 sm:$0xff]  }
 0x314   :  { %5679 = vmatprep.subr.bf16.mxu1 %v8470_v3  ;;  %v8542_v3 = vld [vmem:[#allocation7 + $0x178c] ss:$16 sps:$4 sm:$0xff]  }
 0x316   :  { %5639 = vmatpush2.bf16.msra.mxu0 %v8465_v31  ;;  %v8537_v31 = vld [vmem:[#allocation7 + $0x1588] ss:$16 sps:$4 sm:$0xff]  }
 0x317   :  { %5680 = vmatpush2.bf16.msra.mxu1 %v8468_v33  ;;  %5690 = vmatprep.subr.bf16.mxu0 %v8473_v34  ;;  %v8540_v33 = vld [vmem:[#allocation7 + $0x1788] ss:$16 sps:$4 sm:$0xff]   ;;  %v8545_v34 = vld [vmem:[#allocation7 + $0x156c] ss:$16 sps:$4 sm:$0xff]  }
 0x318   :  { %5731 = vmatprep.subr.bf16.mxu1 %v8476_v36  ;;  %v8548_v36 = vld [vmem:[#allocation7 + $0x176c] ss:$16 sps:$4 sm:$0xff]  }
 0x319   :  { %v5396_v10 = vpop.f32.mrf.mxu0  ;;  %5641 = vmatmul.mubr.bf16.vlgmr.msra.gmra.mxu0 %v8996_v56 }
 0x31a   :  { %v5437_v11 = vpop.f32.mrf.mxu1  ;;  %5682 = vmatmul.mubr.bf16.vlgmr.msra.gmra.mxu1 %v8998_v57  ;;  %v5397_v41 = vadd.f32 %v5396_v10, %v9060_v19  ;;  %5691 = vmatpush1.bf16.msra.mxu0 %v8471_v20  ;;  %v8543_v20 = vld [vmem:[#allocation7 + $0x1568] ss:$16 sps:$4 sm:$0xff]  }
 0x31b   :  { %5732 = vmatpush1.bf16.msra.mxu1 %v8474_v21  ;;  %v5398_v46 = vpop.f32.mrf.mxu0  ;;  %5692 = vmatprep.subr.bf16.mxu0 %v8479_v38  ;;  %v8546_v21 = vld [vmem:[#allocation7 + $0x1768] ss:$16 sps:$4 sm:$0xff]   ;;  %v8551_v38 = vld [vmem:[#allocation7 + $0x154c] ss:$16 sps:$4 sm:$0xff]  }
 0x31c   :  { %v5439_v7 = vpop.f32.mrf.mxu1  ;;  %5733 = vmatprep.subr.bf16.mxu1 %v8482_v39  ;;  %v9069_v47 = vadd.f32 %v5437_v11, %v5397_v41  ;;  %v5399_v54 = vadd.f32 %v5398_v46, %v9062_v30  ;;  %5722 = vmatprep.mubr.bf16.mxu0 %v9000_v62  ;;  %v8489_v30 = vld [vmem:[#allocation7 + $0x1488] ss:$16 sps:$4 sm:$0xff]   ;;  %v8554_v39 = vld [vmem:[#allocation7 + $0x174c] ss:$16 sps:$4 sm:$0xff]  }
 0x31d   :  { %5763 = vmatprep.mubr.bf16.mxu1 %v9002_v63  ;;  %v5400_v56 = vpop.f32.mrf.mxu0  ;;  %v8492_v62 = vld [vmem:[#allocation7 + $0x1688] ss:$16 sps:$4 sm:$0xff]   ;;  %v8497_v63 = vld [vmem:[#allocation7 + $0x146c] ss:$16 sps:$4 sm:$0xff]  }
 0x31e   :  { %v5441_v57 = vpop.f32.mrf.mxu1  ;;  %v9074_v19 = vadd.f32 %v5439_v7, %v5399_v54  ;;  %5693 = vmatpush1.bf16.msra.mxu0 %v8477_v44  ;;  %v8549_v10 = vld [vmem:[#allocation7 + $0x1548] ss:$16 sps:$4 sm:$0xff]   ;;  %v8557_v41 = vld [vmem:[#allocation7 + $0x152c] ss:$16 sps:$4 sm:$0xff]  }
 0x31f   :  { %5734 = vmatpush1.bf16.msra.mxu1 %v8480_v45  ;;  %v5401_v59 = vpop.f32.mrf.mxu0  ;;  %5694 = vmatprep.subr.bf16.mxu0 %v8485_v29  ;;  %v8552_v11 = vld [vmem:[#allocation7 + $0x1748] ss:$16 sps:$4 sm:$0xff]   ;;  %v8560_v44 = vld [vmem:[#allocation7 + $0x172c] ss:$16 sps:$4 sm:$0xff]  }
 0x320   :  { %v5442_v60 = vpop.f32.mrf.mxu1  ;;  %5735 = vmatprep.subr.bf16.mxu1 %v8488_v32  ;;  %v8555_v45 = vld [vmem:[#allocation7 + $0x1528] ss:$16 sps:$4 sm:$0xff]   ;;  %v8563_v7 = vld [vmem:[#allocation7 + $0x150c] ss:$16 sps:$4 sm:$0xff]  }
 0x321   :  { %v8558_v46 = vld [vmem:[#allocation7 + $0x1728] ss:$16 sps:$4 sm:$0xff]   ;;  %v8566_v29 = vld [vmem:[#allocation7 + $0x170c] ss:$16 sps:$4 sm:$0xff]  }
 0x322   :  { %5695 = vmatpush1.bf16.msra.mxu0 %v8483_v55  ;;  %v8561_v32 = vld [vmem:[#allocation7 + $0x1508] ss:$16 sps:$4 sm:$0xff]  }
 0x323   :  { %5736 = vmatpush1.bf16.msra.mxu1 %v8486_v58  ;;  %5696 = vmatprep.subr.bf16.mxu0 %v8491_v0  ;;  %v8564_v54 = vld [vmem:[#allocation7 + $0x1708] ss:$16 sps:$4 sm:$0xff]  }
 0x324   :  { %5737 = vmatprep.subr.bf16.mxu1 %v8494_v1 }
 0x326   :  { %5697 = vmatpush1.bf16.msra.mxu0 %v8489_v30 }
 0x327   :  { %5738 = vmatpush1.bf16.msra.mxu1 %v8492_v62  ;;  %5698 = vmatprep.subr.bf16.mxu0 %v8497_v63 }
 0x328   :  { %5739 = vmatprep.subr.bf16.mxu1 %v8500_v4 }
 0x32a   :  { %5699 = vmatpush1.bf16.msra.mxu0 %v8495_v8 }
 0x32b   :  { %5740 = vmatpush1.bf16.msra.mxu1 %v8498_v9  ;;  %5700 = vmatprep.subr.bf16.mxu0 %v8503_v5 }
 0x32c   :  { %5741 = vmatprep.subr.bf16.mxu1 %v8506_v6 }
 0x32e   :  { %5701 = vmatpush1.bf16.msra.mxu0 %v8501_v12 }
 0x32f   :  { %5742 = vmatpush1.bf16.msra.mxu1 %v8504_v18  ;;  %5702 = vmatprep.subr.bf16.mxu0 %v8509_v42 }
 0x330   :  { %5743 = vmatprep.subr.bf16.mxu1 %v8512_v43 }
 0x332   :  { %5703 = vmatpush1.bf16.msra.mxu0 %v8507_v15 }
 0x333   :  { %5744 = vmatpush1.bf16.msra.mxu1 %v8510_v37  ;;  %5704 = vmatprep.subr.bf16.mxu0 %v8515_v40  ;;  %v8569_v37 = vld [vmem:[#allocation10 + $0x74] ss:$8 sps:$4 sm:$0xff]   ;;  %v8570_v40 = vld [vmem:[#allocation10 + $0x170] ss:$8 sps:$4 sm:$0xff]  }
 0x334   :  { %5745 = vmatprep.subr.bf16.mxu1 %v8518_v17  ;;  %v8572_v17 = vld [vmem:[#allocation10 + $0x174] ss:$8 sps:$4 sm:$0xff]  }
 0x336   :  { %5705 = vmatpush1.bf16.msra.mxu0 %v8513_v13  ;;  %v8575_v13 = vld [vmem:[#allocation10 + $0x64] ss:$8 sps:$4 sm:$0xff]  }
 0x337   :  { %5746 = vmatpush1.bf16.msra.mxu1 %v8516_v16  ;;  %5706 = vmatprep.subr.bf16.mxu0 %v8521_v61  ;;  %v8578_v16 = vld [vmem:[#allocation10 + $0x164] ss:$8 sps:$4 sm:$0xff]   ;;  %v8573_v61 = vld [vmem:[#allocation10 + $0x60] ss:$8 sps:$4 sm:$0xff]  }
 0x338   :  { %5747 = vmatprep.subr.bf16.mxu1 %v8524_v48  ;;  %v8576_v48 = vld [vmem:[#allocation10 + $0x160] ss:$8 sps:$4 sm:$0xff]  }
 0x33a   :  { %5707 = vmatpush2.bf16.msra.mxu0 %v8519_v50  ;;  %v8581_v50 = vld [vmem:[#allocation10 + $0x54] ss:$8 sps:$4 sm:$0xff]  }
 0x33b   :  { %5748 = vmatpush2.bf16.msra.mxu1 %v8522_v22  ;;  %5708 = vmatprep.subr.bf16.mxu0 %v8527_v24  ;;  %v8584_v22 = vld [vmem:[#allocation10 + $0x154] ss:$8 sps:$4 sm:$0xff]   ;;  %v8579_v24 = vld [vmem:[#allocation10 + $0x50] ss:$8 sps:$4 sm:$0xff]  }
 0x33c   :  { %5749 = vmatprep.subr.bf16.mxu1 %v8530_v25  ;;  %v8582_v25 = vld [vmem:[#allocation10 + $0x150] ss:$8 sps:$4 sm:$0xff]  }
 0x33e   :  { %5709 = vmatpush2.bf16.msra.mxu0 %v8525_v26  ;;  %v8587_v26 = vld [vmem:[#allocation10 + $0x44] ss:$8 sps:$4 sm:$0xff]  }
 0x33f   :  { %5750 = vmatpush2.bf16.msra.mxu1 %v8528_v49  ;;  %5710 = vmatprep.subr.bf16.mxu0 %v8533_v52  ;;  %v8590_v49 = vld [vmem:[#allocation10 + $0x144] ss:$8 sps:$4 sm:$0xff]   ;;  %v8585_v52 = vld [vmem:[#allocation10 + $0x40] ss:$8 sps:$4 sm:$0xff]  }
 0x340   :  { %5751 = vmatprep.subr.bf16.mxu1 %v8536_v23  ;;  %v8588_v23 = vld [vmem:[#allocation10 + $0x140] ss:$8 sps:$4 sm:$0xff]  }
 0x342   :  { %5711 = vmatpush2.bf16.msra.mxu0 %v8531_v27  ;;  %v8593_v27 = vld [vmem:[#allocation10 + $0x34] ss:$8 sps:$4 sm:$0xff]  }
 0x343   :  { %5752 = vmatpush2.bf16.msra.mxu1 %v8534_v28  ;;  %5712 = vmatprep.subr.bf16.mxu0 %v8539_v2  ;;  %v8596_v28 = vld [vmem:[#allocation10 + $0x134] ss:$8 sps:$4 sm:$0xff]   ;;  %v8591_v2 = vld [vmem:[#allocation10 + $0x30] ss:$8 sps:$4 sm:$0xff]  }
 0x344   :  { %5753 = vmatprep.subr.bf16.mxu1 %v8542_v3  ;;  %v8594_v3 = vld [vmem:[#allocation10 + $0x130] ss:$8 sps:$4 sm:$0xff]  }
 0x346   :  { %5713 = vmatpush2.bf16.msra.mxu0 %v8537_v31  ;;  %v8599_v31 = vld [vmem:[#allocation10 + $0x24] ss:$8 sps:$4 sm:$0xff]  }
 0x347   :  { %5754 = vmatpush2.bf16.msra.mxu1 %v8540_v33  ;;  %5714 = vmatprep.subr.bf16.mxu0 %v8545_v34  ;;  %v8602_v33 = vld [vmem:[#allocation10 + $0x124] ss:$8 sps:$4 sm:$0xff]   ;;  %v8597_v34 = vld [vmem:[#allocation10 + $0x20] ss:$8 sps:$4 sm:$0xff]  }
 0x348   :  { %5755 = vmatprep.subr.bf16.mxu1 %v8548_v36  ;;  %v8600_v36 = vld [vmem:[#allocation10 + $0x120] ss:$8 sps:$4 sm:$0xff]  }
 0x34a   :  { %5715 = vmatpush2.bf16.msra.mxu0 %v8543_v20  ;;  %v8605_v20 = vld [vmem:[#allocation10 + $0x14] ss:$8 sps:$4 sm:$0xff]  }
 0x34b   :  { %5756 = vmatpush2.bf16.msra.mxu1 %v8546_v21  ;;  %5716 = vmatprep.subr.bf16.mxu0 %v8551_v38  ;;  %v8608_v21 = vld [vmem:[#allocation10 + $0x114] ss:$8 sps:$4 sm:$0xff]   ;;  %v8603_v38 = vld [vmem:[#allocation10 + $0x10] ss:$8 sps:$4 sm:$0xff]  }
 0x34c   :  { %5757 = vmatprep.subr.bf16.mxu1 %v8554_v39  ;;  %v8606_v39 = vld [vmem:[#allocation10 + $0x110] ss:$8 sps:$4 sm:$0xff]  }
 0x34e   :  { %5717 = vmatpush2.bf16.msra.mxu0 %v8549_v10  ;;  %v8611_v10 = vld [vmem:[#allocation10 + $0x4] ss:$8 sps:$4 sm:$0xff]  }
 0x34f   :  { %5758 = vmatpush2.bf16.msra.mxu1 %v8552_v11  ;;  %5718 = vmatprep.subr.bf16.mxu0 %v8557_v41  ;;  %v8614_v11 = vld [vmem:[#allocation10 + $0x104] ss:$8 sps:$4 sm:$0xff]   ;;  %v8609_v41 = vld [vmem:[#allocation10] ss:$8 sps:$4 sm:$0xff]  }
 0x350   :  { %5759 = vmatprep.subr.bf16.mxu1 %v8560_v44  ;;  %v8612_v44 = vld [vmem:[#allocation10 + $0x100] ss:$8 sps:$4 sm:$0xff]  }
 0x352   :  { %5719 = vmatpush2.bf16.msra.mxu0 %v8555_v45  ;;  %v8617_v45 = vld [vmem:[#allocation10 + $0xf4] ss:$8 sps:$4 sm:$0xff]  }
 0x353   :  { %5760 = vmatpush2.bf16.msra.mxu1 %v8558_v46  ;;  %5720 = vmatprep.subr.bf16.mxu0 %v8563_v7  ;;  %v8620_v46 = vld [vmem:[#allocation10 + $0x1f4] ss:$8 sps:$4 sm:$0xff]   ;;  %v8615_v7 = vld [vmem:[#allocation10 + $0xf0] ss:$8 sps:$4 sm:$0xff]  }
 0x354   :  { %5761 = vmatprep.subr.bf16.mxu1 %v8566_v29  ;;  %v8618_v29 = vld [vmem:[#allocation10 + $0x1f0] ss:$8 sps:$4 sm:$0xff]  }
 0x356   :  { %5721 = vmatpush2.bf16.msra.mxu0 %v8561_v32  ;;  %v8623_v32 = vld [vmem:[#allocation10 + $0xe4] ss:$8 sps:$4 sm:$0xff]  }
 0x357   :  { %5762 = vmatpush2.bf16.msra.mxu1 %v8564_v54  ;;  %6228 = vmatprep.subr.bf16.mxu0 %v8569_v37  ;;  %v8626_v54 = vld [vmem:[#allocation10 + $0x1e4] ss:$8 sps:$4 sm:$0xff]  }
 0x358   :  { %6269 = vmatprep.subr.bf16.mxu1 %v8572_v17 }
 0x359   :  { %v5478_v56 = vpop.f32.mrf.mxu0  ;;  %5723 = vmatmul.mubr.bf16.vlgmr.msra.gmra.mxu0 %v9014_v51 }
 0x35a   :  { %v5519_v57 = vpop.f32.mrf.mxu1  ;;  %5764 = vmatmul.mubr.bf16.vlgmr.msra.gmra.mxu1 %v9016_v53  ;;  %v5479_v55 = vadd.f32 %v5478_v56, %v9069_v47  ;;  %v8621_v56 = vld [vmem:[#allocation10 + $0xe0] ss:$8 sps:$4 sm:$0xff]  }
 0x35b   :  { %v5480_v58 = vpop.f32.mrf.mxu0  ;;  %6270 = vmatpush1.bf16.msra.mxu1 %v8570_v40 }
 0x35c   :  { %v5521_v59 = vpop.f32.mrf.mxu1  ;;  %v5520_v60 = vadd.f32 %v5519_v57, %v5479_v55  ;;  %v5481_v0 = vadd.f32 %v5480_v58, %v9074_v19  ;;  %v8567_v19 = vld [vmem:[#allocation10 + $0x70] ss:$8 sps:$4 sm:$0xff]   ;;  %6271 = vmatprep.subr.bf16.mxu1 %v8578_v16  ;;  %v8624_v57 = vld [vmem:[#allocation10 + $0x1e0] ss:$8 sps:$4 sm:$0xff]   ;;  %v8629_v55 = vld [vmem:[#allocation10 + $0xd4] ss:$8 sps:$4 sm:$0xff]  }
 0x35d   :  { %v5482_v1 = vpop.f32.mrf.mxu0  ;;  %6229 = vmatpush1.bf16.msra.mxu0 %v8567_v19  ;;  %v8632_v58 = vld [vmem:[#allocation10 + $0x1d4] ss:$8 sps:$4 sm:$0xff]  }
 0x35e   :  { %v5523_v30 = vpop.f32.mrf.mxu1  ;;  %v5522_v62 = vadd.f32 %v5521_v59, %v5481_v0  ;;  %6230 = vmatprep.subr.bf16.mxu0 %v8575_v13  ;;  %v8627_v59 = vld [vmem:[#allocation10 + $0xd0] ss:$8 sps:$4 sm:$0xff]  }
 0x35f   :  { %v5483_v63 = vpop.f32.mrf.mxu0  ;;  %6272 = vmatpush1.bf16.msra.mxu1 %v8576_v48 }
 0x360   :  { %v5524_v4 = vpop.f32.mrf.mxu1  ;;  %6273 = vmatprep.subr.bf16.mxu1 %v8584_v22 }
 0x361   :  { %6231 = vmatpush1.bf16.msra.mxu0 %v8573_v61 }
 0x362   :  { %6232 = vmatprep.subr.bf16.mxu0 %v8581_v50 }
 0x363   :  { %6274 = vmatpush1.bf16.msra.mxu1 %v8582_v25 }
 0x364   :  { %6275 = vmatprep.subr.bf16.mxu1 %v8590_v49 }
 0x365   :  { %6233 = vmatpush1.bf16.msra.mxu0 %v8579_v24 }
 0x366   :  { %6234 = vmatprep.subr.bf16.mxu0 %v8587_v26 }
 0x367   :  { %6276 = vmatpush1.bf16.msra.mxu1 %v8588_v23 }
 0x368   :  { %6277 = vmatprep.subr.bf16.mxu1 %v8596_v28 }
 0x369   :  { %6235 = vmatpush1.bf16.msra.mxu0 %v8585_v52 }
 0x36a   :  { %6236 = vmatprep.subr.bf16.mxu0 %v8593_v27 }
 0x36b   :  { %6278 = vmatpush1.bf16.msra.mxu1 %v8594_v3 }
 0x36c   :  { %6279 = vmatprep.subr.bf16.mxu1 %v8602_v33 }
 0x36d   :  { %6237 = vmatpush1.bf16.msra.mxu0 %v8591_v2 }
 0x36e   :  { %6238 = vmatprep.subr.bf16.mxu0 %v8599_v31 }
 0x36f   :  { %6280 = vmatpush1.bf16.msra.mxu1 %v8600_v36 }
 0x370   :  { %6281 = vmatprep.subr.bf16.mxu1 %v8608_v21 }
 0x371   :  { %6239 = vmatpush1.bf16.msra.mxu0 %v8597_v34 }
 0x372   :  { %6240 = vmatprep.subr.bf16.mxu0 %v8605_v20 }
 0x373   :  { %6282 = vmatpush1.bf16.msra.mxu1 %v8606_v39  ;;  %v8638_v39 = vld [vmem:[#allocation10 + $0x1c4] ss:$8 sps:$4 sm:$0xff]  }
 0x374   :  { %6283 = vmatprep.subr.bf16.mxu1 %v8614_v11  ;;  %v8636_v11 = vld [vmem:[#allocation10 + $0x1c0] ss:$8 sps:$4 sm:$0xff]  }
 0x375   :  { %6241 = vmatpush1.bf16.msra.mxu0 %v8603_v38  ;;  %v8635_v38 = vld [vmem:[#allocation10 + $0xc4] ss:$8 sps:$4 sm:$0xff]  }
 0x376   :  { %6242 = vmatprep.subr.bf16.mxu0 %v8611_v10  ;;  %v8633_v10 = vld [vmem:[#allocation10 + $0xc0] ss:$8 sps:$4 sm:$0xff]  }
 0x377   :  { %6284 = vmatpush1.bf16.msra.mxu1 %v8612_v44  ;;  %v8641_v44 = vld [vmem:[#allocation10 + $0xb4] ss:$8 sps:$4 sm:$0xff]  }
 0x378   :  { %6285 = vmatprep.subr.bf16.mxu1 %v8620_v46  ;;  %v8644_v46 = vld [vmem:[#allocation10 + $0x1b4] ss:$8 sps:$4 sm:$0xff]  }
 0x379   :  { %6243 = vmatpush1.bf16.msra.mxu0 %v8609_v41  ;;  %v8639_v41 = vld [vmem:[#allocation10 + $0xb0] ss:$8 sps:$4 sm:$0xff]  }
 0x37a   :  { %6244 = vmatprep.subr.bf16.mxu0 %v8617_v45  ;;  %v8642_v45 = vld [vmem:[#allocation10 + $0x1b0] ss:$8 sps:$4 sm:$0xff]  }
 0x37b   :  { %6286 = vmatpush2.bf16.msra.mxu1 %v8618_v29  ;;  %v8650_v29 = vld [vmem:[#allocation10 + $0x1a4] ss:$8 sps:$4 sm:$0xff]  }
 0x37c   :  { %6287 = vmatprep.subr.bf16.mxu1 %v8626_v54  ;;  %v8648_v54 = vld [vmem:[#allocation10 + $0x1a0] ss:$8 sps:$4 sm:$0xff]  }
 0x37d   :  { %6245 = vmatpush2.bf16.msra.mxu0 %v8615_v7  ;;  %v8647_v7 = vld [vmem:[#allocation10 + $0xa4] ss:$8 sps:$4 sm:$0xff]  }
 0x37e   :  { %6246 = vmatprep.subr.bf16.mxu0 %v8623_v32  ;;  %v8645_v32 = vld [vmem:[#allocation10 + $0xa0] ss:$8 sps:$4 sm:$0xff]  }
 0x37f   :  { %6288 = vmatpush2.bf16.msra.mxu1 %v8624_v57  ;;  %v8656_v57 = vld [vmem:[#allocation10 + $0x194] ss:$8 sps:$4 sm:$0xff]  }
 0x380   :  { %6289 = vmatprep.subr.bf16.mxu1 %v8632_v58  ;;  %v8654_v58 = vld [vmem:[#allocation10 + $0x190] ss:$8 sps:$4 sm:$0xff]  }
 0x381   :  { %6247 = vmatpush2.bf16.msra.mxu0 %v8621_v56  ;;  %v8653_v56 = vld [vmem:[#allocation10 + $0x94] ss:$8 sps:$4 sm:$0xff]  }
 0x382   :  { %6248 = vmatprep.subr.bf16.mxu0 %v8629_v55  ;;  %v8651_v55 = vld [vmem:[#allocation10 + $0x90] ss:$8 sps:$4 sm:$0xff]  }
 0x385   :  { %6249 = vmatpush2.bf16.msra.mxu0 %v8627_v59  ;;  %v8659_v59 = vld [vmem:[#allocation10 + $0x84] ss:$8 sps:$4 sm:$0xff]  }
 0x386   :  { %6250 = vmatprep.subr.bf16.mxu0 %v8635_v38 }
 0x389   :  { %6251 = vmatpush2.bf16.msra.mxu0 %v8633_v10 }
 0x38a   :  { %6252 = vmatprep.subr.bf16.mxu0 %v8641_v44 }
 0x38d   :  { %6253 = vmatpush2.bf16.msra.mxu0 %v8639_v41 }
 0x38e   :  { %6254 = vmatprep.subr.bf16.mxu0 %v8647_v7 }
 0x391   :  { %6255 = vmatpush2.bf16.msra.mxu0 %v8645_v32 }
 0x392   :  { %6256 = vmatprep.subr.bf16.mxu0 %v8653_v56 }
 0x395   :  { %6257 = vmatpush2.bf16.msra.mxu0 %v8651_v55 }
 0x396   :  { %6258 = vmatprep.subr.bf16.mxu0 %v8659_v59 }
 0x399   :  { %v5560_v8 = vpop.f32.mrf.mxu0 }
 0x39a   :  { %v5601_v9 = vpop.f32.mrf.mxu1  ;;  %v5561_v5 = vadd.f32 %v5560_v8, %v5520_v60  ;;  %v8630_v60 = vld [vmem:[#allocation10 + $0x1d0] ss:$8 sps:$4 sm:$0xff]  }
 0x39b   :  { %v5562_v6 = vpop.f32.mrf.mxu0  ;;  %6290 = vmatpush2.bf16.msra.mxu1 %v8630_v60  ;;  %v8662_v60 = vld [vmem:[#allocation10 + $0x184] ss:$8 sps:$4 sm:$0xff]  }
 0x39c   :  { %v5603_v12 = vpop.f32.mrf.mxu1  ;;  %v9080_v51 = vadd.f32 %v5601_v9, %v5561_v5  ;;  %v5563_v53 = vadd.f32 %v5562_v6, %v5522_v62  ;;  %v5789_v5 = vlaneseq  ;;  %6291 = vmatprep.subr.bf16.mxu1 %v8638_v39 }
 0x39d   :  { %v5564_v18 = vpop.f32.mrf.mxu0 }
 0x39e   :  { %v5605_v47 = vpop.f32.mrf.mxu1  ;;  %v9082_v42 = vadd.f32 %v5603_v12, %v5563_v53  ;;  %v9084_v6 = vshrl.u32 %v5789_v5, 7  ;;  %v5787_v18 = vld [vmem:[#allocation9] sm:$0xf] }
 0x39f   :  { %v5565_v43 = vpop.f32.mrf.mxu0  ;;  %6292 = vmatpush2.bf16.msra.mxu1 %v8636_v11 }
 0x3a0   :  { %v5606_v15 = vpop.f32.mrf.mxu1  ;;  %v5795_v12 = vsub.s32 1, %v9084_v6  ;;  %v5791_v53 = vsub.s32 0, %v9084_v6  ;;  %v5799_v37 = vsub.s32 2, %v9084_v6  ;;  %v5803_v13 = vsub.s32 3, %v9084_v6  ;;  %6293 = vmatprep.subr.bf16.mxu1 %v8644_v46 }
 0x3a2   :  { %v5796_v47 = vrot.slane %v5787_v18, %v5795_v12  ;;  %v5792_v15 = vrot.slane %v5787_v18, %v5791_v53  ;;  %v5800_v22 = vrot.slane %v5787_v18, %v5799_v37  ;;  %v8664_v37 = vld [vmem:[%s9171_s5 + $0x38] sm:$0xff]  }
 0x3a3   :  { %6294 = vmatpush2.bf16.msra.mxu1 %v8642_v45 }
 0x3a4   :  { %v9096_v40 = vadd.f32 %v5796_v47, %v9056_v35  ;;  %v9100_v48 = vadd.f32 %v5792_v15, %v9051_v14  ;;  %v5804_v35 = vrot.slane %v5787_v18, %v5803_v13  ;;  %6295 = vmatprep.subr.bf16.mxu1 %v8650_v29  ;;  %v8667_v13 = vld [vmem:[%s9171_s5 + $0x68] sm:$0xff]  }
 0x3a5   :  { %v7379_v29 = vld [vmem:[#allocation15] ss:$0 sm:$0xff] }
 0x3a6   :  { %v5813_v27 = vmul.f32 %v9100_v48, %v9100_v48 }
 0x3a7   :  { %6296 = vmatpush2.bf16.msra.mxu1 %v8648_v54 }
 0x3a8   :  { %6297 = vmatprep.subr.bf16.mxu1 %v8656_v57  ;;  %v6503_v57 = vstv %s9174_s8 }
 0x3ab   :  { %6298 = vmatpush2.bf16.msra.mxu1 %v8654_v58 }
 0x3ac   :  { %6299 = vmatprep.subr.bf16.mxu1 %v8662_v60 }
 0x3d9   :  { %v5642_v0 = vpop.f32.mrf.mxu0 }
 0x3da   :  { %v5683_v1 = vpop.f32.mrf.mxu1  ;;  %v5643_v43 = vadd.f32 %v5642_v0, %v9080_v51  ;;  %v8657_v0 = vld [vmem:[#allocation10 + $0x80] ss:$8 sps:$4 sm:$0xff]  }
 0x3db   :  { %v5644_v30 = vpop.f32.mrf.mxu0  ;;  %6259 = vmatpush2.bf16.msra.mxu0 %v8657_v0 }
 0x3dc   :  { %v5685_v62 = vpop.f32.mrf.mxu1  ;;  %v5645_v19 = vadd.f32 %v5644_v30, %v9082_v42  ;;  %v5684_v17 = vadd.f32 %v5683_v1, %v5643_v43  ;;  %v5814_v42 = vmul.f32 %v9096_v40, %v9096_v40  ;;  %v8660_v1 = vld [vmem:[#allocation10 + $0x180] ss:$8 sps:$4 sm:$0xff]   ;;  %v8663_v30 = vld [vmem:[%s9171_s5 + $0x78] sm:$0xff]  }
 0x3dd   :  { %v5646_v63 = vpop.f32.mrf.mxu0  ;;  %6300 = vmatpush2.bf16.msra.mxu1 %v8660_v1  ;;  %7381 = vmatprep.subr.bf16.mxu0 %v8663_v30 }
 0x3de   :  { %v5687_v4 = vpop.f32.mrf.mxu1  ;;  %v5686_v50 = vadd.f32 %v5685_v62, %v5645_v19  ;;  %v5817_v34 = vadd.f32 %v5814_v42, %v5813_v27  ;;  %v8676_v42 = vld [vmem:[%s9171_s5 + $0x8] sm:$0xff]  }
 0x3df   :  { %v5647_v8 = vpop.f32.mrf.mxu0 }
 0x3e0   :  { %v5688_v9 = vpop.f32.mrf.mxu1 }
 0x419   :  { %v5724_v16 = vpop.f32.mrf.mxu0 }
 0x41a   :  { %v5765_v61 = vpop.f32.mrf.mxu1  ;;  %v5725_v51 = vadd.f32 %v5724_v16, %v5684_v17  ;;  %v8665_v17 = vld [vmem:[%s9171_s5 + $0x70] sm:$0xff]   ;;  %v8668_v16 = vld [vmem:[%s9171_s5 + $0x28] sm:$0xff]  }
 0x41b   :  { %v5726_v24 = vpop.f32.mrf.mxu0 }
 0x41c   :  { %v5767_v25 = vpop.f32.mrf.mxu1  ;;  %v5766_v26 = vadd.f32 %v5765_v61, %v5725_v51  ;;  %v5727_v49 = vadd.f32 %v5726_v24, %v5686_v50  ;;  %v8669_v61 = vld [vmem:[%s9171_s5 + $0x60] sm:$0xff]   ;;  %v8671_v50 = vld [vmem:[%s9171_s5 + $0x58] sm:$0xff]   ;;  %v8674_v24 = vld [vmem:[%s9171_s5 + $0x10] sm:$0xff]  }
 0x41d   :  { %v5728_v52 = vpop.f32.mrf.mxu0  ;;  %v8672_v51 = vld [vmem:[%s9171_s5 + $0x18] sm:$0xff]  }
 0x41e   :  { %v5769_v23 = vpop.f32.mrf.mxu1  ;;  %v5811_v28 = vadd.f32 %v5800_v22, %v5766_v26  ;;  %v5768_v2 = vadd.f32 %v5767_v25, %v5727_v49  ;;  %v8673_v22 = vld [vmem:[%s9171_s5 + $0x50] sm:$0xff]   ;;  %v8675_v25 = vld [vmem:[%s9171_s5 + $0x48] sm:$0xff]   ;;  %v8677_v26 = vld [vmem:[%s9171_s5 + $0x40] sm:$0xff]  }
 0x41f   :  { %v5729_v14 = vpop.f32.mrf.mxu0  ;;  %v8678_v49 = vld [vmem:[%s9171_s5] sm:$0xff]  }
 0x420   :  { %v5770_v3 = vpop.f32.mrf.mxu1  ;;  %v5812_v31 = vadd.f32 %v5804_v35, %v5768_v2  ;;  %v5815_v33 = vmul.f32 %v5811_v28, %v5811_v28  ;;  %v5896_v35 = vld [vmem:[#allocation12] sm:$0x3] }
 0x421   :  { %v5901_v52 = vrot.slane %v5896_v35, %v5791_v53  ;;  %v5905_v23 = vrot.slane %v5896_v35, %v5795_v12  ;;  %v7362_v12 = vld [vmem:[#allocation13] ss:$0 sm:$0xff] }
 0x422   :  { %v5816_v36 = vmul.f32 %v5812_v31, %v5812_v31  ;;  %v5818_v20 = vadd.f32 %v5817_v34, %v5815_v33 }
 0x424   :  { %v5819_v21 = vadd.f32 %v5818_v20, %v5816_v36 }
 0x426   :  { %5820 = vadd.xlane.f32.xlu0 %v5819_v21 }
 0x4af   :  { %v5821_v62 = vpop.xlane.xlu0 %5820 }
 0x4b0   :  { %v5822_v63 = vadd.f32 1e-12, %v5821_v62 }
 0x4b2   :  { %8679 = vrsqrt.f32 %v5822_v63 }
 0x4bf   :  { %v8680_v4 = vpop.eup %8679 }
 0x4c0   :  { %v5825_v8 = vmul.f32 %v8680_v4, %v9096_v40  ;;  %v5827_v9 = vmul.f32 %v8680_v4, %v5812_v31  ;;  %v5824_v5 = vmul.f32 %v8680_v4, %v9100_v48  ;;  %v5826_v18 = vmul.f32 %v8680_v4, %v5811_v28  ;;  %v8666_v40 = vld [vmem:[%s9171_s5 + $0x30] sm:$0xff]   ;;  %v8670_v48 = vld [vmem:[%s9171_s5 + $0x20] sm:$0xff]  }
 0x4c2   :  { %v5829_v47 = vpack.c.bf16 %v5825_v8, %v5825_v8  ;;  %v5831_v43 = vpack.c.bf16 %v5827_v9, %v5827_v9  ;;  %v5828_v15 = vpack.c.bf16 %v5824_v5, %v5824_v5  ;;  %v5830_v19 = vpack.c.bf16 %v5826_v18, %v5826_v18 }
 0x4c4   :  { %6260 = vmatprep.mubr.bf16.mxu0 %v5829_v47  ;;  %6301 = vmatprep.mubr.bf16.mxu1 %v5831_v43 }
 0x4c5   :  { %6261 = vmatmul.mubr.bf16.vlgmr.msra.gmra.mxu0 %v5828_v15  ;;  %6302 = vmatmul.mubr.bf16.vlgmr.msra.gmra.mxu1 %v5830_v19 }
 0x4c6   :  { %7382 = vmatpush3.bf16.msra.mxu0 %v8664_v37 }
 0x4c7   :  { %7383 = vmatprep.subr.bf16.mxu0 %v8665_v17 }
 0x4ca   :  { %7384 = vmatpush3.bf16.msra.mxu0 %v8666_v40 }
 0x4cb   :  { %7385 = vmatprep.subr.bf16.mxu0 %v8667_v13 }
 0x4ce   :  { %7386 = vmatpush3.bf16.msra.mxu0 %v8668_v16 }
 0x4cf   :  { %7387 = vmatprep.subr.bf16.mxu0 %v8669_v61 }
 0x4d2   :  { %7388 = vmatpush3.bf16.msra.mxu0 %v8670_v48 }
 0x4d3   :  { %7389 = vmatprep.subr.bf16.mxu0 %v8671_v50 }
 0x4d6   :  { %7390 = vmatpush3.bf16.msra.mxu0 %v8672_v51 }
 0x4d7   :  { %7391 = vmatprep.subr.bf16.mxu0 %v8673_v22 }
 0x4da   :  { %7392 = vmatpush3.bf16.msra.mxu0 %v8674_v24 }
 0x4db   :  { %7393 = vmatprep.subr.bf16.mxu0 %v8675_v25 }
 0x4de   :  { %7394 = vmatpush3.bf16.msra.mxu0 %v8676_v42 }
 0x4df   :  { %7395 = vmatprep.subr.bf16.mxu0 %v8677_v26 }
 0x4e2   :  { %7396 = vmatpush3.bf16.msra.mxu0 %v8678_v49 }
 0x585   :  { %v6262_v27 = vpop.f32.mrf.mxu0  ;;  %v6303_v28 = vpop.f32.mrf.mxu1 }
 0x586   :  { %v6263_v2 = vadd.f32 %v6262_v27, %v5901_v52 }
 0x587   :  { %v6264_v14 = vpop.f32.mrf.mxu0  ;;  %v6305_v3 = vpop.f32.mrf.mxu1 }
 0x588   :  { %v6304_v31 = vadd.f32 %v6303_v28, %v6263_v2  ;;  %v6265_v33 = vadd.f32 %v6264_v14, %v5905_v23 }
 0x589   :  { %v6266_v34 = vpop.f32.mrf.mxu0  ;;  %v6307_v36 = vpop.f32.mrf.mxu1 }
 0x58a   :  { %v6306_v20 = vadd.f32 %v6305_v3, %v6265_v33  ;;  %v6310_v21 = vmax.f32 %v6304_v31, 0.0 }
 0x58b   :  { %v6267_v38 = vpop.f32.mrf.mxu0  ;;  %v6308_v39 = vpop.f32.mrf.mxu1 }
 0x58c   :  { %v6311_v10 = vmax.f32 %v6306_v20, 0.0  ;;  %v6312_v41 = vpack.c.bf16 %v6310_v21, %v6310_v21 }
 0x58e   :  { %v6313_v11 = vpack.c.bf16 %v6311_v10, %v6311_v10 }
 0x590   :  { %6481 = vmatprep.mubr.bf16.mxu0 %v6313_v11 }
 0x591   :  { %6482 = vmatmul.mubr.bf16.vlgmr.msra.gmra.mxu0 %v6312_v41 }
 0x651   :  { %v7397_v6 = vpop.f32.mrf.mxu0 }
 0x653   :  { %v7398_v53 = vpop.f32.mrf.mxu0 }
 0x654   :  { %v7399_v44 = vadd.f32 %v7398_v53, %v7397_v6 }
 0x655   :  { %v7400_v45 = vpop.f32.mrf.mxu0 }
 0x656   :  { %v6484_v46 = vadd.f32 %v7399_v44, %v7362_v12 }
 0x657   :  { %v7401_v7 = vpop.f32.mrf.mxu0 }
 0x658   :  { %v6489_v32 = vmax.f32 %v6484_v46, 0.0 }
 0x65a   :  { %v6497_v54 = vmul.f32 %v7379_v29, %v6489_v32 }
 0x65c   :  { %v6499_v56 = vsel %vm6498_vm0, %v6497_v54, 0.0 }
 0x65d   :  { %6500 = vadd.xlane.f32.xlu0 %v6499_v56 }
 0x6e6   :  { %v6501_v55 = vpop.xlane.xlu0 %6500 }
 0x6e7   :  { %v6504_v58 = vadd.f32 %v6503_v57, %v6501_v55 }
 0x6e9   :  { %v7380_v59 = vmul.f32 -1.442695, %v6504_v58 }
 0x6eb   :  { %8681 = vpow2.f32 %v7380_v59 }
 0x6f8   :  { %v8682_v60 = vpop.eup %8681 }
 0x6f9   :  { %v6508_v0 = vadd.f32 1.0, %v8682_v60 }
 0x6fb   :  { %8683 = vrcp.f32 %v6508_v0 }
 0x708   :  { %v8684_v1 = vpop.eup %8683 }
 0x709   :  { %6511 = vst [vmem:[#allocation16] sm:$0xff] %v8684_v1 }
 0x70a   :  { %8836 = shalt.err (!%p8833_p11)
}
 0x70b   :  { %6521 = dma.vmem_to_hbm [thread:$0]  %s6519_s27, 128, %s9175_s9, [#allocation6]  }
 0x70c   :  { %8853 = dma.done.wait [#allocation6], 128  }
 0x70d   :  { %8854 = vsyncadd [#allocation6], 4294967168 }
 0x70e   :  { %6525 = vsyncpa [#allocation5], 1 }
 0x70f   :  { %6526 = vsyncpa [#allocation8], 1 }
 0x710   :  { %6527 = vsyncpa [#allocation11], 1 }
 0x711   :  { %6528 = vsyncpa [#allocation14], 1 }
 0x712   :  { %6529 = vsyncpa [#allocation6], 1 }

</bundles_post_ra>
